<compile_context>
chip_gen: v7x
topology: tpu7x:2x2x1
jax: 0.10.0
libtpu: 0.0.40
codegen_flags: <defaults>
</compile_context>

<pallas_src>
import math

import jax
import jax.numpy as jnp
from jax.experimental import pallas as pl
from jax.experimental.pallas import tpu as pltpu


# ------------------------------ small helpers --------------------------------
def _erf_approx(x):
    # TODO(synk): exact lax.erf may not lower in Mosaic; Abramowitz-Stegun 7.1.26
    # polynomial (<= 1.5e-7 abs error) is used instead for the exact-GELU erf.
    a1, a2, a3, a4, a5 = 0.254829592, -0.284496736, 1.421413741, -1.453152027, 1.061405429
    p = 0.3275911
    s = jnp.where(x >= 0.0, 1.0, -1.0)
    ax = jnp.abs(x)
    t = 1.0 / (1.0 + p * ax)
    poly = ((((a5 * t + a4) * t + a3) * t + a2) * t + a1) * t
    return s * (1.0 - poly * jnp.exp(-ax * ax))


def _gelu_exact(x):
    return 0.5 * x * (1.0 + _erf_approx(x * (1.0 / math.sqrt(2.0))))


def _layernorm(x, w, b, eps=1e-5):
    mu = jnp.mean(x, axis=-1, keepdims=True)
    var = jnp.mean((x - mu) ** 2, axis=-1, keepdims=True)
    return (x - mu) * jax.lax.rsqrt(var + eps) * w + b


# ------------------------------ fused kernel ---------------------------------
def fused_rnn_kernel(
        tok_ref, emb_ref, pe_ref,
        gwi_ref, gwh_ref, gbi_ref, gbh_ref,
        qkv_w_ref, qkv_b_ref, out_w_ref, out_b_ref,
        anw_ref, anb_ref,
        p1_wT_ref, p1_b_ref, p2_wT_ref, p2_b_ref,
        pnw_ref, pnb_ref,
        fc_wT_ref, fc_b_ref,
        logits_ref,
        gir_ref, giz_ref, gin_ref, seq_ref):
    S, H = pe_ref.shape
    num_layers = gwi_ref.shape[0]
    num_heads = qkv_w_ref.shape[1]
    hd = H // num_heads

    # ---- embedding + positional encoding (dropout = identity, eval mode) ----
    x = emb_ref[0] + pe_ref[...]                                       # (S, H)

    # ---- padding / causal masks built in-kernel from raw tokens -------------
    tok = tok_ref[0]                                                   # (1, S) int32
    nonpad = tok != 0                                                  # (1, S)
    length = jnp.maximum(
        jnp.sum(nonpad.astype(jnp.int32), axis=1, keepdims=True), 1)   # (1, 1)
    pos = jax.lax.broadcasted_iota(jnp.int32, (S, 1), 0)
    vmask = (pos < length).astype(jnp.float32)                         # (S, 1)
    rowq = jax.lax.broadcasted_iota(jnp.int32, (S, S), 0)
    colk = jax.lax.broadcasted_iota(jnp.int32, (S, S), 1)
    allowed = jnp.logical_and(colk <= rowq, nonpad)                    # causal & key-valid
    bias = jnp.where(allowed, 0.0, -1e30)                              # (S, S)

    # ---- 2-layer GRU, time recurrence fused into this kernel ----------------
    # Time loop is fully unrolled at trace time (S <= max_seq_length is small &
    # static): one kernel invocation, zero per-timestep grid/launch overhead.
    for l in range(num_layers):
        # input-gate projections hoisted out of the recurrence (gate order r,z,n)
        gir_ref[...] = jnp.dot(x, gwi_ref[l, 0],
                               preferred_element_type=jnp.float32) + gbi_ref[l, 0]
        giz_ref[...] = jnp.dot(x, gwi_ref[l, 1],
                               preferred_element_type=jnp.float32) + gbi_ref[l, 1]
        gin_ref[...] = jnp.dot(x, gwi_ref[l, 2],
                               preferred_element_type=jnp.float32) + gbi_ref[l, 2]
        whr, whz, whn = gwh_ref[l, 0], gwh_ref[l, 1], gwh_ref[l, 2]
        bhr, bhz, bhn = gbh_ref[l, 0], gbh_ref[l, 1], gbh_ref[l, 2]

        h = jnp.zeros((1, H), jnp.float32)
        for t in range(S):
            ghr = jnp.dot(h, whr, preferred_element_type=jnp.float32) + bhr
            ghz = jnp.dot(h, whz, preferred_element_type=jnp.float32) + bhz
            ghn = jnp.dot(h, whn, preferred_element_type=jnp.float32) + bhn
            r = jax.nn.sigmoid(gir_ref[pl.ds(t, 1), :] + ghr)
            z = jax.nn.sigmoid(giz_ref[pl.ds(t, 1), :] + ghz)
            n = jnp.tanh(gin_ref[pl.ds(t, 1), :] + r * ghn)
            h = (1.0 - z) * n + z * h
            seq_ref[pl.ds(t, 1), :] = h
        x = seq_ref[...]                                               # next layer input

    # pad_packed_sequence semantics: outputs at (trailing) padded steps are zero.
    rnn = x * vmask                                                    # (S, H)

    # ---- causal multi-head self-attention ------------------------------------
    # Per-head weight blocks are indexed on leading axes (no lane-offset slicing);
    # head outputs are folded through the per-head block of the output projection
    # and accumulated (no concatenate / relayout).
    scale = 1.0 / math.sqrt(hd)
    acc = jnp.zeros((S, H), jnp.float32)
    for hi in range(num_heads):
        qh = jnp.dot(rnn, qkv_w_ref[0, hi],
                     preferred_element_type=jnp.float32) + qkv_b_ref[0, hi]
        kh = jnp.dot(rnn, qkv_w_ref[1, hi],
                     preferred_element_type=jnp.float32) + qkv_b_ref[1, hi]
        vh = jnp.dot(rnn, qkv_w_ref[2, hi],
                     preferred_element_type=jnp.float32) + qkv_b_ref[2, hi]
        s = jnp.einsum('qd,kd->qk', qh, kh,
                       preferred_element_type=jnp.float32) * scale + bias
        s = s - jnp.max(s, axis=-1, keepdims=True)
        p = jnp.exp(s)
        p = p * pl.reciprocal(jnp.sum(p, axis=-1, keepdims=True), approx=True)
        ctx = jnp.dot(p, vh, preferred_element_type=jnp.float32)       # (S, hd)
        acc = acc + jnp.dot(ctx, out_w_ref[hi],
                            preferred_element_type=jnp.float32)        # (S, H)
    attn = acc + out_b_ref[...]

    # residual + LayerNorm
    y = _layernorm(rnn + attn, anw_ref[...], anb_ref[...])

    # projection MLP: Linear -> GELU -> (Dropout id) -> Linear -> LayerNorm
    h1 = jnp.dot(y, p1_wT_ref[...], preferred_element_type=jnp.float32) + p1_b_ref[...]
    h1 = _gelu_exact(h1)
    h2 = jnp.dot(h1, p2_wT_ref[...], preferred_element_type=jnp.float32) + p2_b_ref[...]
    y2 = _layernorm(h2, pnw_ref[...], pnb_ref[...])

    # vocabulary projection (vocab padded to a multiple of 128 -> lane-dense store)
    logits_ref[0] = jnp.dot(y2, fc_wT_ref[...],
                            preferred_element_type=jnp.float32) + fc_b_ref[...]


# ------------------------------ parameter init -------------------------------
def init_params(key, vocab, H, num_layers, max_seq):
    keys = iter(jax.random.split(key, 32))

    def xavier(k, shape):                      # torch (out, in) layout
        fan_out, fan_in = shape
        lim = math.sqrt(6.0 / (fan_in + fan_out))
        return jax.random.uniform(k, shape, jnp.float32, -lim, lim)

    def small(k, shape):
        return 0.02 * jax.random.normal(k, shape, jnp.float32)

    p = {}
    p['emb'] = small(next(keys), (vocab, H))
    p['gru'] = []
    for _ in range(num_layers):
        p['gru'].append(dict(
            w_ih=xavier(next(keys), (3 * H, H)),
            w_hh=xavier(next(keys), (3 * H, H)),
            b_ih=small(next(keys), (3 * H,)),
            b_hh=small(next(keys), (3 * H,)),
        ))
    p['in_proj_w'] = xavier(next(keys), (3 * H, H))
    p['in_proj_b'] = jnp.zeros((3 * H,), jnp.float32)
    p['out_proj_w'] = xavier(next(keys), (H, H))
    p['out_proj_b'] = jnp.zeros((H,), jnp.float32)
    p['attn_norm_w'] = jnp.ones((H,), jnp.float32)
    p['attn_norm_b'] = jnp.zeros((H,), jnp.float32)
    p['p1_w'] = xavier(next(keys), (2 * H, H))
    p['p1_b'] = small(next(keys), (2 * H,))
    p['p2_w'] = xavier(next(keys), (H, 2 * H))
    p['p2_b'] = small(next(keys), (H,))
    p['proj_norm_w'] = jnp.ones((H,), jnp.float32)
    p['proj_norm_b'] = jnp.zeros((H,), jnp.float32)
    p['fc_w'] = xavier(next(keys), (vocab, H))
    p['fc_b'] = small(next(keys), (vocab,))

    # sinusoidal positional-encoding buffer (same construction as the module)
    pos = jnp.arange(max_seq, dtype=jnp.float32)[:, None]
    div = jnp.exp(jnp.arange(0, H, 2, dtype=jnp.float32) * (-math.log(10000.0) / H))
    ang = pos * div
    pe = jnp.zeros((max_seq, H), jnp.float32)
    pe = pe.at[:, 0::2].set(jnp.sin(ang)).at[:, 1::2].set(jnp.cos(ang))
    p['pe'] = pe
    return p


def pack_params(p, num_heads):
    """Pre-split / pre-transpose torch-layout weights into kernel-friendly stacks."""
    H = p['emb'].shape[1]
    hd = H // num_heads

    def split_gates(w):            # (3H, H) -> (3, H, H), per-gate (in, out)
        return jnp.stack([w[g * H:(g + 1) * H, :].T for g in range(3)], axis=0)

    def split_gate_bias(b):        # (3H,) -> (3, 1, H)
        return jnp.stack([b[g * H:(g + 1) * H][None, :] for g in range(3)], axis=0)

    pp = {}
    pp['emb'] = p['emb']
    pp['pe'] = p['pe']
    pp['gru_wi'] = jnp.stack([split_gates(g['w_ih']) for g in p['gru']], axis=0)
    pp['gru_wh'] = jnp.stack([split_gates(g['w_hh']) for g in p['gru']], axis=0)
    pp['gru_bi'] = jnp.stack([split_gate_bias(g['b_ih']) for g in p['gru']], axis=0)
    pp['gru_bh'] = jnp.stack([split_gate_bias(g['b_hh']) for g in p['gru']], axis=0)

    # attention in_proj split per (q/k/v, head): (3, nh, H, hd) / (3, nh, 1, hd)
    qkv_w, qkv_b = [], []
    for c in range(3):
        wc, bc = [], []
        for n in range(num_heads):
            sl = slice(c * H + n * hd, c * H + (n + 1) * hd)
            wc.append(p['in_proj_w'][sl, :].T)          # (H, hd)
            bc.append(p['in_proj_b'][sl][None, :])      # (1, hd)
        qkv_w.append(jnp.stack(wc, axis=0))
        qkv_b.append(jnp.stack(bc, axis=0))
    pp['qkv_w'] = jnp.stack(qkv_w, axis=0)
    pp['qkv_b'] = jnp.stack(qkv_b, axis=0)
    # out_proj split per head: (nh, hd, H)
    pp['out_w'] = jnp.stack(
        [p['out_proj_w'][:, n * hd:(n + 1) * hd].T for n in range(num_heads)], axis=0)
    pp['out_b'] = p['out_proj_b'][None, :]

    pp['attn_norm_w'] = p['attn_norm_w'][None, :]
    pp['attn_norm_b'] = p['attn_norm_b'][None, :]
    pp['p1_wT'] = p['p1_w'].T
    pp['p1_b'] = p['p1_b'][None, :]
    pp['p2_wT'] = p['p2_w'].T
    pp['p2_b'] = p['p2_b'][None, :]
    pp['proj_norm_w'] = p['proj_norm_w'][None, :]
    pp['proj_norm_b'] = p['proj_norm_b'][None, :]

    V = p['fc_w'].shape[0]
    Vp = max(128, ((V + 127) // 128) * 128)              # lane-dense logits
    pp['fc_wT'] = jnp.pad(p['fc_w'].T, ((0, 0), (0, Vp - V)))
    pp['fc_b'] = jnp.pad(p['fc_b'], (0, Vp - V))[None, :]
    pp['vocab'] = V
    return pp


# --------------------------------- forward -----------------------------------
def rnn_model_forward(tokens, pp, *, num_heads=4, max_seq_length=None):
    if tokens.ndim == 1:
        tokens = tokens[None, :]
    max_len = pp['pe'].shape[0] if max_seq_length is None else max_seq_length
    tokens = tokens[:, :max_len]
    B, S = tokens.shape
    H = pp['pe'].shape[1]
    V = pp['vocab']
    Vp = pp['fc_wT'].shape[1]
    L = pp['gru_wi'].shape[0]
    nh = num_heads
    hd = H // nh

    # TODO(synk): the embedding row gather stays as a single XLA take; a
    # data-dependent in-kernel gather would need a per-row DMA grid that
    # conflicts with the fully fused single-block design.
    emb = jnp.take(pp['emb'], tokens, axis=0)                          # (B, S, H)
    pe = pp['pe'][:S]                                                  # (S, H)
    tok3 = tokens.astype(jnp.int32)[:, None, :]                        # (B, 1, S)

    def _rep(arr):               # whole array resident in VMEM for every grid step
        nd = arr.ndim
        return pl.BlockSpec(arr.shape, lambda b, _n=nd: (0,) * _n)

    mm = 2 * B * S * H * H
    flops = int(L * 6 * mm + 4 * mm + 4 * B * nh * S * S * hd
                + 8 * B * S * H * H + 2 * B * S * H * Vp)
    transcendentals = int(B * S * H * (3 * L + 2) + B * nh * S * S)
    weight_bytes = sum(4 * v.size for k, v in pp.items()
                       if hasattr(v, 'size') and k != 'emb')
    bytes_accessed = int(weight_bytes + 4 * (B * S * H + B * S + B * S * Vp))

    logits_p = pl.pallas_call(
        fused_rnn_kernel,
        out_shape=jax.ShapeDtypeStruct((B, S, Vp), jnp.float32),
        grid=(B,),
        in_specs=[
            pl.BlockSpec((1, 1, S), lambda b: (b, 0, 0)),              # tokens
            pl.BlockSpec((1, S, H), lambda b: (b, 0, 0)),              # embeddings
            _rep(pe),
            _rep(pp['gru_wi']), _rep(pp['gru_wh']),
            _rep(pp['gru_bi']), _rep(pp['gru_bh']),
            _rep(pp['qkv_w']), _rep(pp['qkv_b']),
            _rep(pp['out_w']), _rep(pp['out_b']),
            _rep(pp['attn_norm_w']), _rep(pp['attn_norm_b']),
            _rep(pp['p1_wT']), _rep(pp['p1_b']),
            _rep(pp['p2_wT']), _rep(pp['p2_b']),
            _rep(pp['proj_norm_w']), _rep(pp['proj_norm_b']),
            _rep(pp['fc_wT']), _rep(pp['fc_b']),
        ],
        out_specs=pl.BlockSpec((1, S, Vp), lambda b: (b, 0, 0)),
        scratch_shapes=[pltpu.VMEM((S, H), jnp.float32) for _ in range(4)],
        compiler_params=pltpu.CompilerParams(
            dimension_semantics=("parallel",),
            vmem_limit_bytes=32 * 1024 * 1024,
        ),
        cost_estimate=pl.CostEstimate(flops=flops,
                                      transcendentals=transcendentals,
                                      bytes_accessed=bytes_accessed),
    )(tok3, emb, pe,
      pp['gru_wi'], pp['gru_wh'], pp['gru_bi'], pp['gru_bh'],
      pp['qkv_w'], pp['qkv_b'], pp['out_w'], pp['out_b'],
      pp['attn_norm_w'], pp['attn_norm_b'],
      pp['p1_wT'], pp['p1_b'], pp['p2_wT'], pp['p2_b'],
      pp['proj_norm_w'], pp['proj_norm_b'],
      pp['fc_wT'], pp['fc_b'])
    return logits_p[:, :, :V]


if __name__ == "__main__":
    key = jax.random.PRNGKey(0)
    kp, kx = jax.random.split(key)

    vocab, H, num_layers, num_heads, max_seq = 64, 32, 2, 4, 16
    B, S = 2, 8

    params = init_params(kp, vocab, H, num_layers, max_seq)
    packed = pack_params(params, num_heads)
    tokens = jax.random.randint(kx, (B, S), 1, vocab, dtype=jnp.int32)  # no pad tokens

    fwd = jax.jit(lambda t: rnn_model_forward(t, packed, num_heads=num_heads,
                                              max_seq_length=max_seq))
    logits = fwd(tokens)
    jax.block_until_ready(logits)
    assert logits.shape == (B, S, vocab) and logits.dtype == jnp.float32
    print("KERNEL_OK")
</pallas_src>

<mosaic_0001>
module attributes {stable_mosaic.version = 11 : i64} {
  func.func @fused_rnn_kernel(%arg0: i32, %arg1: memref<1x1x8xi32, #tpu.memory_space<vmem>>, %arg2: memref<1x8x32xf32, #tpu.memory_space<vmem>>, %arg3: memref<8x32xf32, #tpu.memory_space<vmem>>, %arg4: memref<2x3x32x32xf32, #tpu.memory_space<vmem>>, %arg5: memref<2x3x32x32xf32, #tpu.memory_space<vmem>>, %arg6: memref<2x3x1x32xf32, #tpu.memory_space<vmem>>, %arg7: memref<2x3x1x32xf32, #tpu.memory_space<vmem>>, %arg8: memref<3x4x32x8xf32, #tpu.memory_space<vmem>>, %arg9: memref<3x4x1x8xf32, #tpu.memory_space<vmem>>, %arg10: memref<4x8x32xf32, #tpu.memory_space<vmem>>, %arg11: memref<1x32xf32, #tpu.memory_space<vmem>>, %arg12: memref<1x32xf32, #tpu.memory_space<vmem>>, %arg13: memref<1x32xf32, #tpu.memory_space<vmem>>, %arg14: memref<32x64xf32, #tpu.memory_space<vmem>>, %arg15: memref<1x64xf32, #tpu.memory_space<vmem>>, %arg16: memref<64x32xf32, #tpu.memory_space<vmem>>, %arg17: memref<1x32xf32, #tpu.memory_space<vmem>>, %arg18: memref<1x32xf32, #tpu.memory_space<vmem>>, %arg19: memref<1x32xf32, #tpu.memory_space<vmem>>, %arg20: memref<32x128xf32, #tpu.memory_space<vmem>>, %arg21: memref<1x128xf32, #tpu.memory_space<vmem>>, %arg22: memref<1x8x128xf32, #tpu.memory_space<vmem>>, %arg23: memref<8x32xf32, #tpu.memory_space<vmem>>, %arg24: memref<8x32xf32, #tpu.memory_space<vmem>>, %arg25: memref<8x32xf32, #tpu.memory_space<vmem>>, %arg26: memref<8x32xf32, #tpu.memory_space<vmem>>) attributes {dimension_semantics = [#tpu.dimension_semantics<parallel>], iteration_bounds = array<i64: 2>, scalar_prefetch = 0 : i64, scratch_operands = 4 : i64, tpu.core_type = #tpu.core_type<tc>, window_params = [{transform_indices = @transform_0, window_bounds = array<i64: 1, 1, 8>}, {transform_indices = @transform_1, window_bounds = array<i64: 1, 8, 32>}, {pipeline_mode = #tpu.pipeline_mode<synchronous>, transform_indices = @transform_2, window_bounds = array<i64: 8, 32>}, {pipeline_mode = #tpu.pipeline_mode<synchronous>, transform_indices = @transform_3, window_bounds = array<i64: 2, 3, 32, 32>}, {pipeline_mode = #tpu.pipeline_mode<synchronous>, transform_indices = @transform_4, window_bounds = array<i64: 2, 3, 32, 32>}, {pipeline_mode = #tpu.pipeline_mode<synchronous>, transform_indices = @transform_5, window_bounds = array<i64: 2, 3, 1, 32>}, {pipeline_mode = #tpu.pipeline_mode<synchronous>, transform_indices = @transform_6, window_bounds = array<i64: 2, 3, 1, 32>}, {pipeline_mode = #tpu.pipeline_mode<synchronous>, transform_indices = @transform_7, window_bounds = array<i64: 3, 4, 32, 8>}, {pipeline_mode = #tpu.pipeline_mode<synchronous>, transform_indices = @transform_8, window_bounds = array<i64: 3, 4, 1, 8>}, {pipeline_mode = #tpu.pipeline_mode<synchronous>, transform_indices = @transform_9, window_bounds = array<i64: 4, 8, 32>}, {pipeline_mode = #tpu.pipeline_mode<synchronous>, transform_indices = @transform_10, window_bounds = array<i64: 1, 32>}, {pipeline_mode = #tpu.pipeline_mode<synchronous>, transform_indices = @transform_11, window_bounds = array<i64: 1, 32>}, {pipeline_mode = #tpu.pipeline_mode<synchronous>, transform_indices = @transform_12, window_bounds = array<i64: 1, 32>}, {pipeline_mode = #tpu.pipeline_mode<synchronous>, transform_indices = @transform_13, window_bounds = array<i64: 32, 64>}, {pipeline_mode = #tpu.pipeline_mode<synchronous>, transform_indices = @transform_14, window_bounds = array<i64: 1, 64>}, {pipeline_mode = #tpu.pipeline_mode<synchronous>, transform_indices = @transform_15, window_bounds = array<i64: 64, 32>}, {pipeline_mode = #tpu.pipeline_mode<synchronous>, transform_indices = @transform_16, window_bounds = array<i64: 1, 32>}, {pipeline_mode = #tpu.pipeline_mode<synchronous>, transform_indices = @transform_17, window_bounds = array<i64: 1, 32>}, {pipeline_mode = #tpu.pipeline_mode<synchronous>, transform_indices = @transform_18, window_bounds = array<i64: 1, 32>}, {pipeline_mode = #tpu.pipeline_mode<synchronous>, transform_indices = @transform_19, window_bounds = array<i64: 32, 128>}, {pipeline_mode = #tpu.pipeline_mode<synchronous>, transform_indices = @transform_20, window_bounds = array<i64: 1, 128>}, {transform_indices = @transform_21, window_bounds = array<i64: 1, 8, 128>}]} {
    %c0 = arith.constant 0 : index
    %c0_0 = arith.constant 0 : index
    %c0_1 = arith.constant 0 : index
    %0 = vector.load %arg2[%c0, %c0_0, %c0_1] : memref<1x8x32xf32, #tpu.memory_space<vmem>>, vector<1x8x32xf32>
    %1 = vector.shape_cast %0 : vector<1x8x32xf32> to vector<8x32xf32>
    %c0_2 = arith.constant 0 : index
    %c0_3 = arith.constant 0 : index
    %2 = vector.load %arg3[%c0_2, %c0_3] : memref<8x32xf32, #tpu.memory_space<vmem>>, vector<8x32xf32>
    %3 = arith.addf %1, %2 : vector<8x32xf32>
    %c0_4 = arith.constant 0 : index
    %c0_5 = arith.constant 0 : index
    %c0_6 = arith.constant 0 : index
    %4 = vector.load %arg1[%c0_4, %c0_5, %c0_6] : memref<1x1x8xi32, #tpu.memory_space<vmem>>, vector<1x1x8xi32>
    %5 = vector.shape_cast %4 : vector<1x1x8xi32> to vector<1x8xi32>
    %c0_i32 = arith.constant 0 : i32
    %6 = vector.broadcast %c0_i32 : i32 to vector<1x8xi32>
    %7 = arith.cmpi ne, %5, %6 : vector<1x8xi32>
    %8 = arith.extui %7 : vector<1x8xi1> to vector<1x8xi32>
    %cst = arith.constant dense<0> : vector<1xi32>
    %9 = vector.multi_reduction <add>, %8, %cst [1] : vector<1x8xi32> to vector<1xi32>
    %10 = vector.shape_cast %9 : vector<1xi32> to vector<1x1xi32>
    %c1_i32 = arith.constant 1 : i32
    %11 = vector.broadcast %c1_i32 : i32 to vector<1x1xi32>
    %12 = arith.maxsi %10, %11 : vector<1x1xi32>
    %13 = tpu.iota {dimensions = array<i32: 0>} : vector<8x1xi32>
    %14 = vector.broadcast %12 : vector<1x1xi32> to vector<8x1xi32>
    %15 = arith.cmpi slt, %13, %14 : vector<8x1xi32>
    %16 = arith.extui %15 : vector<8x1xi1> to vector<8x1xi32>
    %17 = arith.sitofp %16 : vector<8x1xi32> to vector<8x1xf32>
    %18 = tpu.iota {dimensions = array<i32: 0>} : vector<8x8xi32>
    %19 = tpu.iota {dimensions = array<i32: 1>} : vector<8x8xi32>
    %20 = arith.cmpi sle, %19, %18 : vector<8x8xi32>
    %21 = vector.broadcast %7 : vector<1x8xi1> to vector<8x8xi1>
    %22 = arith.andi %20, %21 : vector<8x8xi1>
    %cst_7 = arith.constant 0.000000e+00 : f32
    %cst_8 = arith.constant -1.000000e+30 : f32
    %23 = vector.broadcast %cst_7 : f32 to vector<8x8xf32>
    %24 = vector.broadcast %cst_8 : f32 to vector<8x8xf32>
    %25 = arith.select %22, %23, %24 : vector<8x8xi1>, vector<8x8xf32>
    %c0_9 = arith.constant 0 : index
    %c0_10 = arith.constant 0 : index
    %c0_11 = arith.constant 0 : index
    %c0_12 = arith.constant 0 : index
    %26 = vector.load %arg4[%c0_9, %c0_10, %c0_11, %c0_12] : memref<2x3x32x32xf32, #tpu.memory_space<vmem>>, vector<1x1x32x32xf32>
    %27 = vector.shape_cast %26 : vector<1x1x32x32xf32> to vector<32x32xf32>
    %cst_13 = arith.constant dense<0.000000e+00> : vector<8x32xf32>
    %28 = tpu.matmul %3, %27, %cst_13 {dimension_numbers = #tpu.dot_dimension_numbers<[1], [0], [0], [1], [0, 0, 1, 1], [], []>} : vector<8x32xf32>, vector<32x32xf32>, vector<8x32xf32> -> vector<8x32xf32>
    %c0_14 = arith.constant 0 : index
    %c0_15 = arith.constant 0 : index
    %c0_16 = arith.constant 0 : index
    %c0_17 = arith.constant 0 : index
    %29 = vector.load %arg6[%c0_14, %c0_15, %c0_16, %c0_17] : memref<2x3x1x32xf32, #tpu.memory_space<vmem>>, vector<1x1x1x32xf32>
    %30 = vector.shape_cast %29 : vector<1x1x1x32xf32> to vector<1x32xf32>
    %31 = vector.broadcast %30 : vector<1x32xf32> to vector<8x32xf32>
    %32 = arith.addf %28, %31 : vector<8x32xf32>
    %c0_18 = arith.constant 0 : index
    %c0_19 = arith.constant 0 : index
    %33 = vector.load %arg23[%c0_18, %c0_19] : memref<8x32xf32, #tpu.memory_space<vmem>>, vector<8x32xf32>
    tpu.vector_store %arg23[%c0_18, %c0_19], %32 {strides = array<i32>} : memref<8x32xf32, #tpu.memory_space<vmem>>, vector<8x32xf32>,
    %c0_20 = arith.constant 0 : index
    %c1 = arith.constant 1 : index
    %c0_21 = arith.constant 0 : index
    %c0_22 = arith.constant 0 : index
    %34 = vector.load %arg4[%c0_20, %c1, %c0_21, %c0_22] : memref<2x3x32x32xf32, #tpu.memory_space<vmem>>, vector<1x1x32x32xf32>
    %35 = vector.shape_cast %34 : vector<1x1x32x32xf32> to vector<32x32xf32>
    %cst_23 = arith.constant dense<0.000000e+00> : vector<8x32xf32>
    %36 = tpu.matmul %3, %35, %cst_23 {dimension_numbers = #tpu.dot_dimension_numbers<[1], [0], [0], [1], [0, 0, 1, 1], [], []>} : vector<8x32xf32>, vector<32x32xf32>, vector<8x32xf32> -> vector<8x32xf32>
    %c0_24 = arith.constant 0 : index
    %c1_25 = arith.constant 1 : index
    %c0_26 = arith.constant 0 : index
    %c0_27 = arith.constant 0 : index
    %37 = vector.load %arg6[%c0_24, %c1_25, %c0_26, %c0_27] : memref<2x3x1x32xf32, #tpu.memory_space<vmem>>, vector<1x1x1x32xf32>
    %38 = vector.shape_cast %37 : vector<1x1x1x32xf32> to vector<1x32xf32>
    %39 = vector.broadcast %38 : vector<1x32xf32> to vector<8x32xf32>
    %40 = arith.addf %36, %39 : vector<8x32xf32>
    %c0_28 = arith.constant 0 : index
    %c0_29 = arith.constant 0 : index
    %41 = vector.load %arg24[%c0_28, %c0_29] : memref<8x32xf32, #tpu.memory_space<vmem>>, vector<8x32xf32>
    tpu.vector_store %arg24[%c0_28, %c0_29], %40 {strides = array<i32>} : memref<8x32xf32, #tpu.memory_space<vmem>>, vector<8x32xf32>,
    %c0_30 = arith.constant 0 : index
    %c2 = arith.constant 2 : index
    %c0_31 = arith.constant 0 : index
    %c0_32 = arith.constant 0 : index
    %42 = vector.load %arg4[%c0_30, %c2, %c0_31, %c0_32] : memref<2x3x32x32xf32, #tpu.memory_space<vmem>>, vector<1x1x32x32xf32>
    %43 = vector.shape_cast %42 : vector<1x1x32x32xf32> to vector<32x32xf32>
    %cst_33 = arith.constant dense<0.000000e+00> : vector<8x32xf32>
    %44 = tpu.matmul %3, %43, %cst_33 {dimension_numbers = #tpu.dot_dimension_numbers<[1], [0], [0], [1], [0, 0, 1, 1], [], []>} : vector<8x32xf32>, vector<32x32xf32>, vector<8x32xf32> -> vector<8x32xf32>
    %c0_34 = arith.constant 0 : index
    %c2_35 = arith.constant 2 : index
    %c0_36 = arith.constant 0 : index
    %c0_37 = arith.constant 0 : index
    %45 = vector.load %arg6[%c0_34, %c2_35, %c0_36, %c0_37] : memref<2x3x1x32xf32, #tpu.memory_space<vmem>>, vector<1x1x1x32xf32>
    %46 = vector.shape_cast %45 : vector<1x1x1x32xf32> to vector<1x32xf32>
    %47 = vector.broadcast %46 : vector<1x32xf32> to vector<8x32xf32>
    %48 = arith.addf %44, %47 : vector<8x32xf32>
    %c0_38 = arith.constant 0 : index
    %c0_39 = arith.constant 0 : index
    %49 = vector.load %arg25[%c0_38, %c0_39] : memref<8x32xf32, #tpu.memory_space<vmem>>, vector<8x32xf32>
    tpu.vector_store %arg25[%c0_38, %c0_39], %48 {strides = array<i32>} : memref<8x32xf32, #tpu.memory_space<vmem>>, vector<8x32xf32>,
    %c0_40 = arith.constant 0 : index
    %c0_41 = arith.constant 0 : index
    %c0_42 = arith.constant 0 : index
    %c0_43 = arith.constant 0 : index
    %50 = vector.load %arg5[%c0_40, %c0_41, %c0_42, %c0_43] : memref<2x3x32x32xf32, #tpu.memory_space<vmem>>, vector<1x1x32x32xf32>
    %51 = vector.shape_cast %50 : vector<1x1x32x32xf32> to vector<32x32xf32>
    %c0_44 = arith.constant 0 : index
    %c1_45 = arith.constant 1 : index
    %c0_46 = arith.constant 0 : index
    %c0_47 = arith.constant 0 : index
    %52 = vector.load %arg5[%c0_44, %c1_45, %c0_46, %c0_47] : memref<2x3x32x32xf32, #tpu.memory_space<vmem>>, vector<1x1x32x32xf32>
    %53 = vector.shape_cast %52 : vector<1x1x32x32xf32> to vector<32x32xf32>
    %c0_48 = arith.constant 0 : index
    %c2_49 = arith.constant 2 : index
    %c0_50 = arith.constant 0 : index
    %c0_51 = arith.constant 0 : index
    %54 = vector.load %arg5[%c0_48, %c2_49, %c0_50, %c0_51] : memref<2x3x32x32xf32, #tpu.memory_space<vmem>>, vector<1x1x32x32xf32>
    %55 = vector.shape_cast %54 : vector<1x1x32x32xf32> to vector<32x32xf32>
    %c0_52 = arith.constant 0 : index
    %c0_53 = arith.constant 0 : index
    %c0_54 = arith.constant 0 : index
    %c0_55 = arith.constant 0 : index
    %56 = vector.load %arg7[%c0_52, %c0_53, %c0_54, %c0_55] : memref<2x3x1x32xf32, #tpu.memory_space<vmem>>, vector<1x1x1x32xf32>
    %57 = vector.shape_cast %56 : vector<1x1x1x32xf32> to vector<1x32xf32>
    %c0_56 = arith.constant 0 : index
    %c1_57 = arith.constant 1 : index
    %c0_58 = arith.constant 0 : index
    %c0_59 = arith.constant 0 : index
    %58 = vector.load %arg7[%c0_56, %c1_57, %c0_58, %c0_59] : memref<2x3x1x32xf32, #tpu.memory_space<vmem>>, vector<1x1x1x32xf32>
    %59 = vector.shape_cast %58 : vector<1x1x1x32xf32> to vector<1x32xf32>
    %c0_60 = arith.constant 0 : index
    %c2_61 = arith.constant 2 : index
    %c0_62 = arith.constant 0 : index
    %c0_63 = arith.constant 0 : index
    %60 = vector.load %arg7[%c0_60, %c2_61, %c0_62, %c0_63] : memref<2x3x1x32xf32, #tpu.memory_space<vmem>>, vector<1x1x1x32xf32>
    %61 = vector.shape_cast %60 : vector<1x1x1x32xf32> to vector<1x32xf32>
    %cst_64 = arith.constant 0.000000e+00 : f32
    %62 = vector.broadcast %cst_64 : f32 to vector<1x32xf32>
    %cst_65 = arith.constant dense<0.000000e+00> : vector<1x32xf32>
    %63 = tpu.matmul %62, %51, %cst_65 {dimension_numbers = #tpu.dot_dimension_numbers<[1], [0], [0], [1], [0, 0, 1, 1], [], []>} : vector<1x32xf32>, vector<32x32xf32>, vector<1x32xf32> -> vector<1x32xf32>
    %64 = arith.addf %63, %57 : vector<1x32xf32>
    %cst_66 = arith.constant dense<0.000000e+00> : vector<1x32xf32>
    %65 = tpu.matmul %62, %53, %cst_66 {dimension_numbers = #tpu.dot_dimension_numbers<[1], [0], [0], [1], [0, 0, 1, 1], [], []>} : vector<1x32xf32>, vector<32x32xf32>, vector<1x32xf32> -> vector<1x32xf32>
    %66 = arith.addf %65, %59 : vector<1x32xf32>
    %cst_67 = arith.constant dense<0.000000e+00> : vector<1x32xf32>
    %67 = tpu.matmul %62, %55, %cst_67 {dimension_numbers = #tpu.dot_dimension_numbers<[1], [0], [0], [1], [0, 0, 1, 1], [], []>} : vector<1x32xf32>, vector<32x32xf32>, vector<1x32xf32> -> vector<1x32xf32>
    %68 = arith.addf %67, %61 : vector<1x32xf32>
    %c0_68 = arith.constant 0 : index
    %c0_69 = arith.constant 0 : index
    %69 = vector.load %arg23[%c0_68, %c0_69] : memref<8x32xf32, #tpu.memory_space<vmem>>, vector<1x32xf32>
    %70 = arith.addf %69, %64 : vector<1x32xf32>
    %71 = arith.negf %70 : vector<1x32xf32>
    %72 = math.exp %71 : vector<1x32xf32>
    %cst_70 = arith.constant 1.000000e+00 : f32
    %73 = vector.broadcast %cst_70 : f32 to vector<1x32xf32>
    %74 = arith.addf %73, %72 : vector<1x32xf32>
    %75 = arith.divf %73, %74 : vector<1x32xf32>
    %c0_71 = arith.constant 0 : index
    %c0_72 = arith.constant 0 : index
    %76 = vector.load %arg24[%c0_71, %c0_72] : memref<8x32xf32, #tpu.memory_space<vmem>>, vector<1x32xf32>
    %77 = arith.addf %76, %66 : vector<1x32xf32>
    %78 = arith.negf %77 : vector<1x32xf32>
    %79 = math.exp %78 : vector<1x32xf32>
    %cst_73 = arith.constant 1.000000e+00 : f32
    %80 = vector.broadcast %cst_73 : f32 to vector<1x32xf32>
    %81 = arith.addf %80, %79 : vector<1x32xf32>
    %82 = arith.divf %80, %81 : vector<1x32xf32>
    %c0_74 = arith.constant 0 : index
    %c0_75 = arith.constant 0 : index
    %83 = vector.load %arg25[%c0_74, %c0_75] : memref<8x32xf32, #tpu.memory_space<vmem>>, vector<1x32xf32>
    %84 = arith.mulf %75, %68 : vector<1x32xf32>
    %85 = arith.addf %83, %84 : vector<1x32xf32>
    %86 = math.tanh %85 : vector<1x32xf32>
    %cst_76 = arith.constant 1.000000e+00 : f32
    %87 = vector.broadcast %cst_76 : f32 to vector<1x32xf32>
    %88 = arith.subf %87, %82 : vector<1x32xf32>
    %89 = arith.mulf %88, %86 : vector<1x32xf32>
    %90 = arith.mulf %82, %62 : vector<1x32xf32>
    %91 = arith.addf %89, %90 : vector<1x32xf32>
    %c0_77 = arith.constant 0 : index
    %c0_78 = arith.constant 0 : index
    %92 = vector.load %arg26[%c0_77, %c0_78] : memref<8x32xf32, #tpu.memory_space<vmem>>, vector<1x32xf32>
    tpu.vector_store %arg26[%c0_77, %c0_78], %91 {strides = array<i32>} : memref<8x32xf32, #tpu.memory_space<vmem>>, vector<1x32xf32>,
    %cst_79 = arith.constant dense<0.000000e+00> : vector<1x32xf32>
    %93 = tpu.matmul %91, %51, %cst_79 {dimension_numbers = #tpu.dot_dimension_numbers<[1], [0], [0], [1], [0, 0, 1, 1], [], []>} : vector<1x32xf32>, vector<32x32xf32>, vector<1x32xf32> -> vector<1x32xf32>
    %94 = arith.addf %93, %57 : vector<1x32xf32>
    %cst_80 = arith.constant dense<0.000000e+00> : vector<1x32xf32>
    %95 = tpu.matmul %91, %53, %cst_80 {dimension_numbers = #tpu.dot_dimension_numbers<[1], [0], [0], [1], [0, 0, 1, 1], [], []>} : vector<1x32xf32>, vector<32x32xf32>, vector<1x32xf32> -> vector<1x32xf32>
    %96 = arith.addf %95, %59 : vector<1x32xf32>
    %cst_81 = arith.constant dense<0.000000e+00> : vector<1x32xf32>
    %97 = tpu.matmul %91, %55, %cst_81 {dimension_numbers = #tpu.dot_dimension_numbers<[1], [0], [0], [1], [0, 0, 1, 1], [], []>} : vector<1x32xf32>, vector<32x32xf32>, vector<1x32xf32> -> vector<1x32xf32>
    %98 = arith.addf %97, %61 : vector<1x32xf32>
    %c1_82 = arith.constant 1 : index
    %c0_83 = arith.constant 0 : index
    %99 = vector.load %arg23[%c1_82, %c0_83] : memref<8x32xf32, #tpu.memory_space<vmem>>, vector<1x32xf32>
    %100 = arith.addf %99, %94 : vector<1x32xf32>
    %101 = arith.negf %100 : vector<1x32xf32>
    %102 = math.exp %101 : vector<1x32xf32>
    %cst_84 = arith.constant 1.000000e+00 : f32
    %103 = vector.broadcast %cst_84 : f32 to vector<1x32xf32>
    %104 = arith.addf %103, %102 : vector<1x32xf32>
    %105 = arith.divf %103, %104 : vector<1x32xf32>
    %c1_85 = arith.constant 1 : index
    %c0_86 = arith.constant 0 : index
    %106 = vector.load %arg24[%c1_85, %c0_86] : memref<8x32xf32, #tpu.memory_space<vmem>>, vector<1x32xf32>
    %107 = arith.addf %106, %96 : vector<1x32xf32>
    %108 = arith.negf %107 : vector<1x32xf32>
    %109 = math.exp %108 : vector<1x32xf32>
    %cst_87 = arith.constant 1.000000e+00 : f32
    %110 = vector.broadcast %cst_87 : f32 to vector<1x32xf32>
    %111 = arith.addf %110, %109 : vector<1x32xf32>
    %112 = arith.divf %110, %111 : vector<1x32xf32>
    %c1_88 = arith.constant 1 : index
    %c0_89 = arith.constant 0 : index
    %113 = vector.load %arg25[%c1_88, %c0_89] : memref<8x32xf32, #tpu.memory_space<vmem>>, vector<1x32xf32>
    %114 = arith.mulf %105, %98 : vector<1x32xf32>
    %115 = arith.addf %113, %114 : vector<1x32xf32>
    %116 = math.tanh %115 : vector<1x32xf32>
    %cst_90 = arith.constant 1.000000e+00 : f32
    %117 = vector.broadcast %cst_90 : f32 to vector<1x32xf32>
    %118 = arith.subf %117, %112 : vector<1x32xf32>
    %119 = arith.mulf %118, %116 : vector<1x32xf32>
    %120 = arith.mulf %112, %91 : vector<1x32xf32>
    %121 = arith.addf %119, %120 : vector<1x32xf32>
    %c1_91 = arith.constant 1 : index
    %c0_92 = arith.constant 0 : index
    %122 = vector.load %arg26[%c1_91, %c0_92] : memref<8x32xf32, #tpu.memory_space<vmem>>, vector<1x32xf32>
    tpu.vector_store %arg26[%c1_91, %c0_92], %121 {strides = array<i32>} : memref<8x32xf32, #tpu.memory_space<vmem>>, vector<1x32xf32>,
    %cst_93 = arith.constant dense<0.000000e+00> : vector<1x32xf32>
    %123 = tpu.matmul %121, %51, %cst_93 {dimension_numbers = #tpu.dot_dimension_numbers<[1], [0], [0], [1], [0, 0, 1, 1], [], []>} : vector<1x32xf32>, vector<32x32xf32>, vector<1x32xf32> -> vector<1x32xf32>
    %124 = arith.addf %123, %57 : vector<1x32xf32>
    %cst_94 = arith.constant dense<0.000000e+00> : vector<1x32xf32>
    %125 = tpu.matmul %121, %53, %cst_94 {dimension_numbers = #tpu.dot_dimension_numbers<[1], [0], [0], [1], [0, 0, 1, 1], [], []>} : vector<1x32xf32>, vector<32x32xf32>, vector<1x32xf32> -> vector<1x32xf32>
    %126 = arith.addf %125, %59 : vector<1x32xf32>
    %cst_95 = arith.constant dense<0.000000e+00> : vector<1x32xf32>
    %127 = tpu.matmul %121, %55, %cst_95 {dimension_numbers = #tpu.dot_dimension_numbers<[1], [0], [0], [1], [0, 0, 1, 1], [], []>} : vector<1x32xf32>, vector<32x32xf32>, vector<1x32xf32> -> vector<1x32xf32>
    %128 = arith.addf %127, %61 : vector<1x32xf32>
    %c2_96 = arith.constant 2 : index
    %c0_97 = arith.constant 0 : index
    %129 = vector.load %arg23[%c2_96, %c0_97] : memref<8x32xf32, #tpu.memory_space<vmem>>, vector<1x32xf32>
    %130 = arith.addf %129, %124 : vector<1x32xf32>
    %131 = arith.negf %130 : vector<1x32xf32>
    %132 = math.exp %131 : vector<1x32xf32>
    %cst_98 = arith.constant 1.000000e+00 : f32
    %133 = vector.broadcast %cst_98 : f32 to vector<1x32xf32>
    %134 = arith.addf %133, %132 : vector<1x32xf32>
    %135 = arith.divf %133, %134 : vector<1x32xf32>
    %c2_99 = arith.constant 2 : index
    %c0_100 = arith.constant 0 : index
    %136 = vector.load %arg24[%c2_99, %c0_100] : memref<8x32xf32, #tpu.memory_space<vmem>>, vector<1x32xf32>
    %137 = arith.addf %136, %126 : vector<1x32xf32>
    %138 = arith.negf %137 : vector<1x32xf32>
    %139 = math.exp %138 : vector<1x32xf32>
    %cst_101 = arith.constant 1.000000e+00 : f32
    %140 = vector.broadcast %cst_101 : f32 to vector<1x32xf32>
    %141 = arith.addf %140, %139 : vector<1x32xf32>
    %142 = arith.divf %140, %141 : vector<1x32xf32>
    %c2_102 = arith.constant 2 : index
    %c0_103 = arith.constant 0 : index
    %143 = vector.load %arg25[%c2_102, %c0_103] : memref<8x32xf32, #tpu.memory_space<vmem>>, vector<1x32xf32>
    %144 = arith.mulf %135, %128 : vector<1x32xf32>
    %145 = arith.addf %143, %144 : vector<1x32xf32>
    %146 = math.tanh %145 : vector<1x32xf32>
    %cst_104 = arith.constant 1.000000e+00 : f32
    %147 = vector.broadcast %cst_104 : f32 to vector<1x32xf32>
    %148 = arith.subf %147, %142 : vector<1x32xf32>
    %149 = arith.mulf %148, %146 : vector<1x32xf32>
    %150 = arith.mulf %142, %121 : vector<1x32xf32>
    %151 = arith.addf %149, %150 : vector<1x32xf32>
    %c2_105 = arith.constant 2 : index
    %c0_106 = arith.constant 0 : index
    %152 = vector.load %arg26[%c2_105, %c0_106] : memref<8x32xf32, #tpu.memory_space<vmem>>, vector<1x32xf32>
    tpu.vector_store %arg26[%c2_105, %c0_106], %151 {strides = array<i32>} : memref<8x32xf32, #tpu.memory_space<vmem>>, vector<1x32xf32>,
    %cst_107 = arith.constant dense<0.000000e+00> : vector<1x32xf32>
    %153 = tpu.matmul %151, %51, %cst_107 {dimension_numbers = #tpu.dot_dimension_numbers<[1], [0], [0], [1], [0, 0, 1, 1], [], []>} : vector<1x32xf32>, vector<32x32xf32>, vector<1x32xf32> -> vector<1x32xf32>
    %154 = arith.addf %153, %57 : vector<1x32xf32>
    %cst_108 = arith.constant dense<0.000000e+00> : vector<1x32xf32>
    %155 = tpu.matmul %151, %53, %cst_108 {dimension_numbers = #tpu.dot_dimension_numbers<[1], [0], [0], [1], [0, 0, 1, 1], [], []>} : vector<1x32xf32>, vector<32x32xf32>, vector<1x32xf32> -> vector<1x32xf32>
    %156 = arith.addf %155, %59 : vector<1x32xf32>
    %cst_109 = arith.constant dense<0.000000e+00> : vector<1x32xf32>
    %157 = tpu.matmul %151, %55, %cst_109 {dimension_numbers = #tpu.dot_dimension_numbers<[1], [0], [0], [1], [0, 0, 1, 1], [], []>} : vector<1x32xf32>, vector<32x32xf32>, vector<1x32xf32> -> vector<1x32xf32>
    %158 = arith.addf %157, %61 : vector<1x32xf32>
    %c3 = arith.constant 3 : index
    %c0_110 = arith.constant 0 : index
    %159 = vector.load %arg23[%c3, %c0_110] : memref<8x32xf32, #tpu.memory_space<vmem>>, vector<1x32xf32>
    %160 = arith.addf %159, %154 : vector<1x32xf32>
    %161 = arith.negf %160 : vector<1x32xf32>
    %162 = math.exp %161 : vector<1x32xf32>
    %cst_111 = arith.constant 1.000000e+00 : f32
    %163 = vector.broadcast %cst_111 : f32 to vector<1x32xf32>
    %164 = arith.addf %163, %162 : vector<1x32xf32>
    %165 = arith.divf %163, %164 : vector<1x32xf32>
    %c3_112 = arith.constant 3 : index
    %c0_113 = arith.constant 0 : index
    %166 = vector.load %arg24[%c3_112, %c0_113] : memref<8x32xf32, #tpu.memory_space<vmem>>, vector<1x32xf32>
    %167 = arith.addf %166, %156 : vector<1x32xf32>
    %168 = arith.negf %167 : vector<1x32xf32>
    %169 = math.exp %168 : vector<1x32xf32>
    %cst_114 = arith.constant 1.000000e+00 : f32
    %170 = vector.broadcast %cst_114 : f32 to vector<1x32xf32>
    %171 = arith.addf %170, %169 : vector<1x32xf32>
    %172 = arith.divf %170, %171 : vector<1x32xf32>
    %c3_115 = arith.constant 3 : index
    %c0_116 = arith.constant 0 : index
    %173 = vector.load %arg25[%c3_115, %c0_116] : memref<8x32xf32, #tpu.memory_space<vmem>>, vector<1x32xf32>
    %174 = arith.mulf %165, %158 : vector<1x32xf32>
    %175 = arith.addf %173, %174 : vector<1x32xf32>
    %176 = math.tanh %175 : vector<1x32xf32>
    %cst_117 = arith.constant 1.000000e+00 : f32
    %177 = vector.broadcast %cst_117 : f32 to vector<1x32xf32>
    %178 = arith.subf %177, %172 : vector<1x32xf32>
    %179 = arith.mulf %178, %176 : vector<1x32xf32>
    %180 = arith.mulf %172, %151 : vector<1x32xf32>
    %181 = arith.addf %179, %180 : vector<1x32xf32>
    %c3_118 = arith.constant 3 : index
    %c0_119 = arith.constant 0 : index
    %182 = vector.load %arg26[%c3_118, %c0_119] : memref<8x32xf32, #tpu.memory_space<vmem>>, vector<1x32xf32>
    tpu.vector_store %arg26[%c3_118, %c0_119], %181 {strides = array<i32>} : memref<8x32xf32, #tpu.memory_space<vmem>>, vector<1x32xf32>,
    %cst_120 = arith.constant dense<0.000000e+00> : vector<1x32xf32>
    %183 = tpu.matmul %181, %51, %cst_120 {dimension_numbers = #tpu.dot_dimension_numbers<[1], [0], [0], [1], [0, 0, 1, 1], [], []>} : vector<1x32xf32>, vector<32x32xf32>, vector<1x32xf32> -> vector<1x32xf32>
    %184 = arith.addf %183, %57 : vector<1x32xf32>
    %cst_121 = arith.constant dense<0.000000e+00> : vector<1x32xf32>
    %185 = tpu.matmul %181, %53, %cst_121 {dimension_numbers = #tpu.dot_dimension_numbers<[1], [0], [0], [1], [0, 0, 1, 1], [], []>} : vector<1x32xf32>, vector<32x32xf32>, vector<1x32xf32> -> vector<1x32xf32>
    %186 = arith.addf %185, %59 : vector<1x32xf32>
    %cst_122 = arith.constant dense<0.000000e+00> : vector<1x32xf32>
    %187 = tpu.matmul %181, %55, %cst_122 {dimension_numbers = #tpu.dot_dimension_numbers<[1], [0], [0], [1], [0, 0, 1, 1], [], []>} : vector<1x32xf32>, vector<32x32xf32>, vector<1x32xf32> -> vector<1x32xf32>
    %188 = arith.addf %187, %61 : vector<1x32xf32>
    %c4 = arith.constant 4 : index
    %c0_123 = arith.constant 0 : index
    %189 = vector.load %arg23[%c4, %c0_123] : memref<8x32xf32, #tpu.memory_space<vmem>>, vector<1x32xf32>
    %190 = arith.addf %189, %184 : vector<1x32xf32>
    %191 = arith.negf %190 : vector<1x32xf32>
    %192 = math.exp %191 : vector<1x32xf32>
    %cst_124 = arith.constant 1.000000e+00 : f32
    %193 = vector.broadcast %cst_124 : f32 to vector<1x32xf32>
    %194 = arith.addf %193, %192 : vector<1x32xf32>
    %195 = arith.divf %193, %194 : vector<1x32xf32>
    %c4_125 = arith.constant 4 : index
    %c0_126 = arith.constant 0 : index
    %196 = vector.load %arg24[%c4_125, %c0_126] : memref<8x32xf32, #tpu.memory_space<vmem>>, vector<1x32xf32>
    %197 = arith.addf %196, %186 : vector<1x32xf32>
    %198 = arith.negf %197 : vector<1x32xf32>
    %199 = math.exp %198 : vector<1x32xf32>
    %cst_127 = arith.constant 1.000000e+00 : f32
    %200 = vector.broadcast %cst_127 : f32 to vector<1x32xf32>
    %201 = arith.addf %200, %199 : vector<1x32xf32>
    %202 = arith.divf %200, %201 : vector<1x32xf32>
    %c4_128 = arith.constant 4 : index
    %c0_129 = arith.constant 0 : index
    %203 = vector.load %arg25[%c4_128, %c0_129] : memref<8x32xf32, #tpu.memory_space<vmem>>, vector<1x32xf32>
    %204 = arith.mulf %195, %188 : vector<1x32xf32>
    %205 = arith.addf %203, %204 : vector<1x32xf32>
    %206 = math.tanh %205 : vector<1x32xf32>
    %cst_130 = arith.constant 1.000000e+00 : f32
    %207 = vector.broadcast %cst_130 : f32 to vector<1x32xf32>
    %208 = arith.subf %207, %202 : vector<1x32xf32>
    %209 = arith.mulf %208, %206 : vector<1x32xf32>
    %210 = arith.mulf %202, %181 : vector<1x32xf32>
    %211 = arith.addf %209, %210 : vector<1x32xf32>
    %c4_131 = arith.constant 4 : index
    %c0_132 = arith.constant 0 : index
    %212 = vector.load %arg26[%c4_131, %c0_132] : memref<8x32xf32, #tpu.memory_space<vmem>>, vector<1x32xf32>
    tpu.vector_store %arg26[%c4_131, %c0_132], %211 {strides = array<i32>} : memref<8x32xf32, #tpu.memory_space<vmem>>, vector<1x32xf32>,
    %cst_133 = arith.constant dense<0.000000e+00> : vector<1x32xf32>
    %213 = tpu.matmul %211, %51, %cst_133 {dimension_numbers = #tpu.dot_dimension_numbers<[1], [0], [0], [1], [0, 0, 1, 1], [], []>} : vector<1x32xf32>, vector<32x32xf32>, vector<1x32xf32> -> vector<1x32xf32>
    %214 = arith.addf %213, %57 : vector<1x32xf32>
    %cst_134 = arith.constant dense<0.000000e+00> : vector<1x32xf32>
    %215 = tpu.matmul %211, %53, %cst_134 {dimension_numbers = #tpu.dot_dimension_numbers<[1], [0], [0], [1], [0, 0, 1, 1], [], []>} : vector<1x32xf32>, vector<32x32xf32>, vector<1x32xf32> -> vector<1x32xf32>
    %216 = arith.addf %215, %59 : vector<1x32xf32>
    %cst_135 = arith.constant dense<0.000000e+00> : vector<1x32xf32>
    %217 = tpu.matmul %211, %55, %cst_135 {dimension_numbers = #tpu.dot_dimension_numbers<[1], [0], [0], [1], [0, 0, 1, 1], [], []>} : vector<1x32xf32>, vector<32x32xf32>, vector<1x32xf32> -> vector<1x32xf32>
    %218 = arith.addf %217, %61 : vector<1x32xf32>
    %c5 = arith.constant 5 : index
    %c0_136 = arith.constant 0 : index
    %219 = vector.load %arg23[%c5, %c0_136] : memref<8x32xf32, #tpu.memory_space<vmem>>, vector<1x32xf32>
    %220 = arith.addf %219, %214 : vector<1x32xf32>
    %221 = arith.negf %220 : vector<1x32xf32>
    %222 = math.exp %221 : vector<1x32xf32>
    %cst_137 = arith.constant 1.000000e+00 : f32
    %223 = vector.broadcast %cst_137 : f32 to vector<1x32xf32>
    %224 = arith.addf %223, %222 : vector<1x32xf32>
    %225 = arith.divf %223, %224 : vector<1x32xf32>
    %c5_138 = arith.constant 5 : index
    %c0_139 = arith.constant 0 : index
    %226 = vector.load %arg24[%c5_138, %c0_139] : memref<8x32xf32, #tpu.memory_space<vmem>>, vector<1x32xf32>
    %227 = arith.addf %226, %216 : vector<1x32xf32>
    %228 = arith.negf %227 : vector<1x32xf32>
    %229 = math.exp %228 : vector<1x32xf32>
    %cst_140 = arith.constant 1.000000e+00 : f32
    %230 = vector.broadcast %cst_140 : f32 to vector<1x32xf32>
    %231 = arith.addf %230, %229 : vector<1x32xf32>
    %232 = arith.divf %230, %231 : vector<1x32xf32>
    %c5_141 = arith.constant 5 : index
    %c0_142 = arith.constant 0 : index
    %233 = vector.load %arg25[%c5_141, %c0_142] : memref<8x32xf32, #tpu.memory_space<vmem>>, vector<1x32xf32>
    %234 = arith.mulf %225, %218 : vector<1x32xf32>
    %235 = arith.addf %233, %234 : vector<1x32xf32>
    %236 = math.tanh %235 : vector<1x32xf32>
    %cst_143 = arith.constant 1.000000e+00 : f32
    %237 = vector.broadcast %cst_143 : f32 to vector<1x32xf32>
    %238 = arith.subf %237, %232 : vector<1x32xf32>
    %239 = arith.mulf %238, %236 : vector<1x32xf32>
    %240 = arith.mulf %232, %211 : vector<1x32xf32>
    %241 = arith.addf %239, %240 : vector<1x32xf32>
    %c5_144 = arith.constant 5 : index
    %c0_145 = arith.constant 0 : index
    %242 = vector.load %arg26[%c5_144, %c0_145] : memref<8x32xf32, #tpu.memory_space<vmem>>, vector<1x32xf32>
    tpu.vector_store %arg26[%c5_144, %c0_145], %241 {strides = array<i32>} : memref<8x32xf32, #tpu.memory_space<vmem>>, vector<1x32xf32>,
    %cst_146 = arith.constant dense<0.000000e+00> : vector<1x32xf32>
    %243 = tpu.matmul %241, %51, %cst_146 {dimension_numbers = #tpu.dot_dimension_numbers<[1], [0], [0], [1], [0, 0, 1, 1], [], []>} : vector<1x32xf32>, vector<32x32xf32>, vector<1x32xf32> -> vector<1x32xf32>
    %244 = arith.addf %243, %57 : vector<1x32xf32>
    %cst_147 = arith.constant dense<0.000000e+00> : vector<1x32xf32>
    %245 = tpu.matmul %241, %53, %cst_147 {dimension_numbers = #tpu.dot_dimension_numbers<[1], [0], [0], [1], [0, 0, 1, 1], [], []>} : vector<1x32xf32>, vector<32x32xf32>, vector<1x32xf32> -> vector<1x32xf32>
    %246 = arith.addf %245, %59 : vector<1x32xf32>
    %cst_148 = arith.constant dense<0.000000e+00> : vector<1x32xf32>
    %247 = tpu.matmul %241, %55, %cst_148 {dimension_numbers = #tpu.dot_dimension_numbers<[1], [0], [0], [1], [0, 0, 1, 1], [], []>} : vector<1x32xf32>, vector<32x32xf32>, vector<1x32xf32> -> vector<1x32xf32>
    %248 = arith.addf %247, %61 : vector<1x32xf32>
    %c6 = arith.constant 6 : index
    %c0_149 = arith.constant 0 : index
    %249 = vector.load %arg23[%c6, %c0_149] : memref<8x32xf32, #tpu.memory_space<vmem>>, vector<1x32xf32>
    %250 = arith.addf %249, %244 : vector<1x32xf32>
    %251 = arith.negf %250 : vector<1x32xf32>
    %252 = math.exp %251 : vector<1x32xf32>
    %cst_150 = arith.constant 1.000000e+00 : f32
    %253 = vector.broadcast %cst_150 : f32 to vector<1x32xf32>
    %254 = arith.addf %253, %252 : vector<1x32xf32>
    %255 = arith.divf %253, %254 : vector<1x32xf32>
    %c6_151 = arith.constant 6 : index
    %c0_152 = arith.constant 0 : index
    %256 = vector.load %arg24[%c6_151, %c0_152] : memref<8x32xf32, #tpu.memory_space<vmem>>, vector<1x32xf32>
    %257 = arith.addf %256, %246 : vector<1x32xf32>
    %258 = arith.negf %257 : vector<1x32xf32>
    %259 = math.exp %258 : vector<1x32xf32>
    %cst_153 = arith.constant 1.000000e+00 : f32
    %260 = vector.broadcast %cst_153 : f32 to vector<1x32xf32>
    %261 = arith.addf %260, %259 : vector<1x32xf32>
    %262 = arith.divf %260, %261 : vector<1x32xf32>
    %c6_154 = arith.constant 6 : index
    %c0_155 = arith.constant 0 : index
    %263 = vector.load %arg25[%c6_154, %c0_155] : memref<8x32xf32, #tpu.memory_space<vmem>>, vector<1x32xf32>
    %264 = arith.mulf %255, %248 : vector<1x32xf32>
    %265 = arith.addf %263, %264 : vector<1x32xf32>
    %266 = math.tanh %265 : vector<1x32xf32>
    %cst_156 = arith.constant 1.000000e+00 : f32
    %267 = vector.broadcast %cst_156 : f32 to vector<1x32xf32>
    %268 = arith.subf %267, %262 : vector<1x32xf32>
    %269 = arith.mulf %268, %266 : vector<1x32xf32>
    %270 = arith.mulf %262, %241 : vector<1x32xf32>
    %271 = arith.addf %269, %270 : vector<1x32xf32>
    %c6_157 = arith.constant 6 : index
    %c0_158 = arith.constant 0 : index
    %272 = vector.load %arg26[%c6_157, %c0_158] : memref<8x32xf32, #tpu.memory_space<vmem>>, vector<1x32xf32>
    tpu.vector_store %arg26[%c6_157, %c0_158], %271 {strides = array<i32>} : memref<8x32xf32, #tpu.memory_space<vmem>>, vector<1x32xf32>,
    %cst_159 = arith.constant dense<0.000000e+00> : vector<1x32xf32>
    %273 = tpu.matmul %271, %51, %cst_159 {dimension_numbers = #tpu.dot_dimension_numbers<[1], [0], [0], [1], [0, 0, 1, 1], [], []>} : vector<1x32xf32>, vector<32x32xf32>, vector<1x32xf32> -> vector<1x32xf32>
    %274 = arith.addf %273, %57 : vector<1x32xf32>
    %cst_160 = arith.constant dense<0.000000e+00> : vector<1x32xf32>
    %275 = tpu.matmul %271, %53, %cst_160 {dimension_numbers = #tpu.dot_dimension_numbers<[1], [0], [0], [1], [0, 0, 1, 1], [], []>} : vector<1x32xf32>, vector<32x32xf32>, vector<1x32xf32> -> vector<1x32xf32>
    %276 = arith.addf %275, %59 : vector<1x32xf32>
    %cst_161 = arith.constant dense<0.000000e+00> : vector<1x32xf32>
    %277 = tpu.matmul %271, %55, %cst_161 {dimension_numbers = #tpu.dot_dimension_numbers<[1], [0], [0], [1], [0, 0, 1, 1], [], []>} : vector<1x32xf32>, vector<32x32xf32>, vector<1x32xf32> -> vector<1x32xf32>
    %278 = arith.addf %277, %61 : vector<1x32xf32>
    %c7 = arith.constant 7 : index
    %c0_162 = arith.constant 0 : index
    %279 = vector.load %arg23[%c7, %c0_162] : memref<8x32xf32, #tpu.memory_space<vmem>>, vector<1x32xf32>
    %280 = arith.addf %279, %274 : vector<1x32xf32>
    %281 = arith.negf %280 : vector<1x32xf32>
    %282 = math.exp %281 : vector<1x32xf32>
    %cst_163 = arith.constant 1.000000e+00 : f32
    %283 = vector.broadcast %cst_163 : f32 to vector<1x32xf32>
    %284 = arith.addf %283, %282 : vector<1x32xf32>
    %285 = arith.divf %283, %284 : vector<1x32xf32>
    %c7_164 = arith.constant 7 : index
    %c0_165 = arith.constant 0 : index
    %286 = vector.load %arg24[%c7_164, %c0_165] : memref<8x32xf32, #tpu.memory_space<vmem>>, vector<1x32xf32>
    %287 = arith.addf %286, %276 : vector<1x32xf32>
    %288 = arith.negf %287 : vector<1x32xf32>
    %289 = math.exp %288 : vector<1x32xf32>
    %cst_166 = arith.constant 1.000000e+00 : f32
    %290 = vector.broadcast %cst_166 : f32 to vector<1x32xf32>
    %291 = arith.addf %290, %289 : vector<1x32xf32>
    %292 = arith.divf %290, %291 : vector<1x32xf32>
    %c7_167 = arith.constant 7 : index
    %c0_168 = arith.constant 0 : index
    %293 = vector.load %arg25[%c7_167, %c0_168] : memref<8x32xf32, #tpu.memory_space<vmem>>, vector<1x32xf32>
    %294 = arith.mulf %285, %278 : vector<1x32xf32>
    %295 = arith.addf %293, %294 : vector<1x32xf32>
    %296 = math.tanh %295 : vector<1x32xf32>
    %cst_169 = arith.constant 1.000000e+00 : f32
    %297 = vector.broadcast %cst_169 : f32 to vector<1x32xf32>
    %298 = arith.subf %297, %292 : vector<1x32xf32>
    %299 = arith.mulf %298, %296 : vector<1x32xf32>
    %300 = arith.mulf %292, %271 : vector<1x32xf32>
    %301 = arith.addf %299, %300 : vector<1x32xf32>
    %c7_170 = arith.constant 7 : index
    %c0_171 = arith.constant 0 : index
    %302 = vector.load %arg26[%c7_170, %c0_171] : memref<8x32xf32, #tpu.memory_space<vmem>>, vector<1x32xf32>
    tpu.vector_store %arg26[%c7_170, %c0_171], %301 {strides = array<i32>} : memref<8x32xf32, #tpu.memory_space<vmem>>, vector<1x32xf32>,
    %c0_172 = arith.constant 0 : index
    %c0_173 = arith.constant 0 : index
    %303 = vector.load %arg26[%c0_172, %c0_173] : memref<8x32xf32, #tpu.memory_space<vmem>>, vector<8x32xf32>
    %c1_174 = arith.constant 1 : index
    %c0_175 = arith.constant 0 : index
    %c0_176 = arith.constant 0 : index
    %c0_177 = arith.constant 0 : index
    %304 = vector.load %arg4[%c1_174, %c0_175, %c0_176, %c0_177] : memref<2x3x32x32xf32, #tpu.memory_space<vmem>>, vector<1x1x32x32xf32>
    %305 = vector.shape_cast %304 : vector<1x1x32x32xf32> to vector<32x32xf32>
    %cst_178 = arith.constant dense<0.000000e+00> : vector<8x32xf32>
    %306 = tpu.matmul %303, %305, %cst_178 {dimension_numbers = #tpu.dot_dimension_numbers<[1], [0], [0], [1], [0, 0, 1, 1], [], []>} : vector<8x32xf32>, vector<32x32xf32>, vector<8x32xf32> -> vector<8x32xf32>
    %c1_179 = arith.constant 1 : index
    %c0_180 = arith.constant 0 : index
    %c0_181 = arith.constant 0 : index
    %c0_182 = arith.constant 0 : index
    %307 = vector.load %arg6[%c1_179, %c0_180, %c0_181, %c0_182] : memref<2x3x1x32xf32, #tpu.memory_space<vmem>>, vector<1x1x1x32xf32>
    %308 = vector.shape_cast %307 : vector<1x1x1x32xf32> to vector<1x32xf32>
    %309 = vector.broadcast %308 : vector<1x32xf32> to vector<8x32xf32>
    %310 = arith.addf %306, %309 : vector<8x32xf32>
    %c0_183 = arith.constant 0 : index
    %c0_184 = arith.constant 0 : index
    %311 = vector.load %arg23[%c0_183, %c0_184] : memref<8x32xf32, #tpu.memory_space<vmem>>, vector<8x32xf32>
    tpu.vector_store %arg23[%c0_183, %c0_184], %310 {strides = array<i32>} : memref<8x32xf32, #tpu.memory_space<vmem>>, vector<8x32xf32>,
    %c1_185 = arith.constant 1 : index
    %c1_186 = arith.constant 1 : index
    %c0_187 = arith.constant 0 : index
    %c0_188 = arith.constant 0 : index
    %312 = vector.load %arg4[%c1_185, %c1_186, %c0_187, %c0_188] : memref<2x3x32x32xf32, #tpu.memory_space<vmem>>, vector<1x1x32x32xf32>
    %313 = vector.shape_cast %312 : vector<1x1x32x32xf32> to vector<32x32xf32>
    %cst_189 = arith.constant dense<0.000000e+00> : vector<8x32xf32>
    %314 = tpu.matmul %303, %313, %cst_189 {dimension_numbers = #tpu.dot_dimension_numbers<[1], [0], [0], [1], [0, 0, 1, 1], [], []>} : vector<8x32xf32>, vector<32x32xf32>, vector<8x32xf32> -> vector<8x32xf32>
    %c1_190 = arith.constant 1 : index
    %c1_191 = arith.constant 1 : index
    %c0_192 = arith.constant 0 : index
    %c0_193 = arith.constant 0 : index
    %315 = vector.load %arg6[%c1_190, %c1_191, %c0_192, %c0_193] : memref<2x3x1x32xf32, #tpu.memory_space<vmem>>, vector<1x1x1x32xf32>
    %316 = vector.shape_cast %315 : vector<1x1x1x32xf32> to vector<1x32xf32>
    %317 = vector.broadcast %316 : vector<1x32xf32> to vector<8x32xf32>
    %318 = arith.addf %314, %317 : vector<8x32xf32>
    %c0_194 = arith.constant 0 : index
    %c0_195 = arith.constant 0 : index
    %319 = vector.load %arg24[%c0_194, %c0_195] : memref<8x32xf32, #tpu.memory_space<vmem>>, vector<8x32xf32>
    tpu.vector_store %arg24[%c0_194, %c0_195], %318 {strides = array<i32>} : memref<8x32xf32, #tpu.memory_space<vmem>>, vector<8x32xf32>,
    %c1_196 = arith.constant 1 : index
    %c2_197 = arith.constant 2 : index
    %c0_198 = arith.constant 0 : index
    %c0_199 = arith.constant 0 : index
    %320 = vector.load %arg4[%c1_196, %c2_197, %c0_198, %c0_199] : memref<2x3x32x32xf32, #tpu.memory_space<vmem>>, vector<1x1x32x32xf32>
    %321 = vector.shape_cast %320 : vector<1x1x32x32xf32> to vector<32x32xf32>
    %cst_200 = arith.constant dense<0.000000e+00> : vector<8x32xf32>
    %322 = tpu.matmul %303, %321, %cst_200 {dimension_numbers = #tpu.dot_dimension_numbers<[1], [0], [0], [1], [0, 0, 1, 1], [], []>} : vector<8x32xf32>, vector<32x32xf32>, vector<8x32xf32> -> vector<8x32xf32>
    %c1_201 = arith.constant 1 : index
    %c2_202 = arith.constant 2 : index
    %c0_203 = arith.constant 0 : index
    %c0_204 = arith.constant 0 : index
    %323 = vector.load %arg6[%c1_201, %c2_202, %c0_203, %c0_204] : memref<2x3x1x32xf32, #tpu.memory_space<vmem>>, vector<1x1x1x32xf32>
    %324 = vector.shape_cast %323 : vector<1x1x1x32xf32> to vector<1x32xf32>
    %325 = vector.broadcast %324 : vector<1x32xf32> to vector<8x32xf32>
    %326 = arith.addf %322, %325 : vector<8x32xf32>
    %c0_205 = arith.constant 0 : index
    %c0_206 = arith.constant 0 : index
    %327 = vector.load %arg25[%c0_205, %c0_206] : memref<8x32xf32, #tpu.memory_space<vmem>>, vector<8x32xf32>
    tpu.vector_store %arg25[%c0_205, %c0_206], %326 {strides = array<i32>} : memref<8x32xf32, #tpu.memory_space<vmem>>, vector<8x32xf32>,
    %c1_207 = arith.constant 1 : index
    %c0_208 = arith.constant 0 : index
    %c0_209 = arith.constant 0 : index
    %c0_210 = arith.constant 0 : index
    %328 = vector.load %arg5[%c1_207, %c0_208, %c0_209, %c0_210] : memref<2x3x32x32xf32, #tpu.memory_space<vmem>>, vector<1x1x32x32xf32>
    %329 = vector.shape_cast %328 : vector<1x1x32x32xf32> to vector<32x32xf32>
    %c1_211 = arith.constant 1 : index
    %c1_212 = arith.constant 1 : index
    %c0_213 = arith.constant 0 : index
    %c0_214 = arith.constant 0 : index
    %330 = vector.load %arg5[%c1_211, %c1_212, %c0_213, %c0_214] : memref<2x3x32x32xf32, #tpu.memory_space<vmem>>, vector<1x1x32x32xf32>
    %331 = vector.shape_cast %330 : vector<1x1x32x32xf32> to vector<32x32xf32>
    %c1_215 = arith.constant 1 : index
    %c2_216 = arith.constant 2 : index
    %c0_217 = arith.constant 0 : index
    %c0_218 = arith.constant 0 : index
    %332 = vector.load %arg5[%c1_215, %c2_216, %c0_217, %c0_218] : memref<2x3x32x32xf32, #tpu.memory_space<vmem>>, vector<1x1x32x32xf32>
    %333 = vector.shape_cast %332 : vector<1x1x32x32xf32> to vector<32x32xf32>
    %c1_219 = arith.constant 1 : index
    %c0_220 = arith.constant 0 : index
    %c0_221 = arith.constant 0 : index
    %c0_222 = arith.constant 0 : index
    %334 = vector.load %arg7[%c1_219, %c0_220, %c0_221, %c0_222] : memref<2x3x1x32xf32, #tpu.memory_space<vmem>>, vector<1x1x1x32xf32>
    %335 = vector.shape_cast %334 : vector<1x1x1x32xf32> to vector<1x32xf32>
    %c1_223 = arith.constant 1 : index
    %c1_224 = arith.constant 1 : index
    %c0_225 = arith.constant 0 : index
    %c0_226 = arith.constant 0 : index
    %336 = vector.load %arg7[%c1_223, %c1_224, %c0_225, %c0_226] : memref<2x3x1x32xf32, #tpu.memory_space<vmem>>, vector<1x1x1x32xf32>
    %337 = vector.shape_cast %336 : vector<1x1x1x32xf32> to vector<1x32xf32>
    %c1_227 = arith.constant 1 : index
    %c2_228 = arith.constant 2 : index
    %c0_229 = arith.constant 0 : index
    %c0_230 = arith.constant 0 : index
    %338 = vector.load %arg7[%c1_227, %c2_228, %c0_229, %c0_230] : memref<2x3x1x32xf32, #tpu.memory_space<vmem>>, vector<1x1x1x32xf32>
    %339 = vector.shape_cast %338 : vector<1x1x1x32xf32> to vector<1x32xf32>
    %cst_231 = arith.constant 0.000000e+00 : f32
    %340 = vector.broadcast %cst_231 : f32 to vector<1x32xf32>
    %cst_232 = arith.constant dense<0.000000e+00> : vector<1x32xf32>
    %341 = tpu.matmul %340, %329, %cst_232 {dimension_numbers = #tpu.dot_dimension_numbers<[1], [0], [0], [1], [0, 0, 1, 1], [], []>} : vector<1x32xf32>, vector<32x32xf32>, vector<1x32xf32> -> vector<1x32xf32>
    %342 = arith.addf %341, %335 : vector<1x32xf32>
    %cst_233 = arith.constant dense<0.000000e+00> : vector<1x32xf32>
    %343 = tpu.matmul %340, %331, %cst_233 {dimension_numbers = #tpu.dot_dimension_numbers<[1], [0], [0], [1], [0, 0, 1, 1], [], []>} : vector<1x32xf32>, vector<32x32xf32>, vector<1x32xf32> -> vector<1x32xf32>
    %344 = arith.addf %343, %337 : vector<1x32xf32>
    %cst_234 = arith.constant dense<0.000000e+00> : vector<1x32xf32>
    %345 = tpu.matmul %340, %333, %cst_234 {dimension_numbers = #tpu.dot_dimension_numbers<[1], [0], [0], [1], [0, 0, 1, 1], [], []>} : vector<1x32xf32>, vector<32x32xf32>, vector<1x32xf32> -> vector<1x32xf32>
    %346 = arith.addf %345, %339 : vector<1x32xf32>
    %c0_235 = arith.constant 0 : index
    %c0_236 = arith.constant 0 : index
    %347 = vector.load %arg23[%c0_235, %c0_236] : memref<8x32xf32, #tpu.memory_space<vmem>>, vector<1x32xf32>
    %348 = arith.addf %347, %342 : vector<1x32xf32>
    %349 = arith.negf %348 : vector<1x32xf32>
    %350 = math.exp %349 : vector<1x32xf32>
    %cst_237 = arith.constant 1.000000e+00 : f32
    %351 = vector.broadcast %cst_237 : f32 to vector<1x32xf32>
    %352 = arith.addf %351, %350 : vector<1x32xf32>
    %353 = arith.divf %351, %352 : vector<1x32xf32>
    %c0_238 = arith.constant 0 : index
    %c0_239 = arith.constant 0 : index
    %354 = vector.load %arg24[%c0_238, %c0_239] : memref<8x32xf32, #tpu.memory_space<vmem>>, vector<1x32xf32>
    %355 = arith.addf %354, %344 : vector<1x32xf32>
    %356 = arith.negf %355 : vector<1x32xf32>
    %357 = math.exp %356 : vector<1x32xf32>
    %cst_240 = arith.constant 1.000000e+00 : f32
    %358 = vector.broadcast %cst_240 : f32 to vector<1x32xf32>
    %359 = arith.addf %358, %357 : vector<1x32xf32>
    %360 = arith.divf %358, %359 : vector<1x32xf32>
    %c0_241 = arith.constant 0 : index
    %c0_242 = arith.constant 0 : index
    %361 = vector.load %arg25[%c0_241, %c0_242] : memref<8x32xf32, #tpu.memory_space<vmem>>, vector<1x32xf32>
    %362 = arith.mulf %353, %346 : vector<1x32xf32>
    %363 = arith.addf %361, %362 : vector<1x32xf32>
    %364 = math.tanh %363 : vector<1x32xf32>
    %cst_243 = arith.constant 1.000000e+00 : f32
    %365 = vector.broadcast %cst_243 : f32 to vector<1x32xf32>
    %366 = arith.subf %365, %360 : vector<1x32xf32>
    %367 = arith.mulf %366, %364 : vector<1x32xf32>
    %368 = arith.mulf %360, %340 : vector<1x32xf32>
    %369 = arith.addf %367, %368 : vector<1x32xf32>
    %c0_244 = arith.constant 0 : index
    %c0_245 = arith.constant 0 : index
    %370 = vector.load %arg26[%c0_244, %c0_245] : memref<8x32xf32, #tpu.memory_space<vmem>>, vector<1x32xf32>
    tpu.vector_store %arg26[%c0_244, %c0_245], %369 {strides = array<i32>} : memref<8x32xf32, #tpu.memory_space<vmem>>, vector<1x32xf32>,
    %cst_246 = arith.constant dense<0.000000e+00> : vector<1x32xf32>
    %371 = tpu.matmul %369, %329, %cst_246 {dimension_numbers = #tpu.dot_dimension_numbers<[1], [0], [0], [1], [0, 0, 1, 1], [], []>} : vector<1x32xf32>, vector<32x32xf32>, vector<1x32xf32> -> vector<1x32xf32>
    %372 = arith.addf %371, %335 : vector<1x32xf32>
    %cst_247 = arith.constant dense<0.000000e+00> : vector<1x32xf32>
    %373 = tpu.matmul %369, %331, %cst_247 {dimension_numbers = #tpu.dot_dimension_numbers<[1], [0], [0], [1], [0, 0, 1, 1], [], []>} : vector<1x32xf32>, vector<32x32xf32>, vector<1x32xf32> -> vector<1x32xf32>
    %374 = arith.addf %373, %337 : vector<1x32xf32>
    %cst_248 = arith.constant dense<0.000000e+00> : vector<1x32xf32>
    %375 = tpu.matmul %369, %333, %cst_248 {dimension_numbers = #tpu.dot_dimension_numbers<[1], [0], [0], [1], [0, 0, 1, 1], [], []>} : vector<1x32xf32>, vector<32x32xf32>, vector<1x32xf32> -> vector<1x32xf32>
    %376 = arith.addf %375, %339 : vector<1x32xf32>
    %c1_249 = arith.constant 1 : index
    %c0_250 = arith.constant 0 : index
    %377 = vector.load %arg23[%c1_249, %c0_250] : memref<8x32xf32, #tpu.memory_space<vmem>>, vector<1x32xf32>
    %378 = arith.addf %377, %372 : vector<1x32xf32>
    %379 = arith.negf %378 : vector<1x32xf32>
    %380 = math.exp %379 : vector<1x32xf32>
    %cst_251 = arith.constant 1.000000e+00 : f32
    %381 = vector.broadcast %cst_251 : f32 to vector<1x32xf32>
    %382 = arith.addf %381, %380 : vector<1x32xf32>
    %383 = arith.divf %381, %382 : vector<1x32xf32>
    %c1_252 = arith.constant 1 : index
    %c0_253 = arith.constant 0 : index
    %384 = vector.load %arg24[%c1_252, %c0_253] : memref<8x32xf32, #tpu.memory_space<vmem>>, vector<1x32xf32>
    %385 = arith.addf %384, %374 : vector<1x32xf32>
    %386 = arith.negf %385 : vector<1x32xf32>
    %387 = math.exp %386 : vector<1x32xf32>
    %cst_254 = arith.constant 1.000000e+00 : f32
    %388 = vector.broadcast %cst_254 : f32 to vector<1x32xf32>
    %389 = arith.addf %388, %387 : vector<1x32xf32>
    %390 = arith.divf %388, %389 : vector<1x32xf32>
    %c1_255 = arith.constant 1 : index
    %c0_256 = arith.constant 0 : index
    %391 = vector.load %arg25[%c1_255, %c0_256] : memref<8x32xf32, #tpu.memory_space<vmem>>, vector<1x32xf32>
    %392 = arith.mulf %383, %376 : vector<1x32xf32>
    %393 = arith.addf %391, %392 : vector<1x32xf32>
    %394 = math.tanh %393 : vector<1x32xf32>
    %cst_257 = arith.constant 1.000000e+00 : f32
    %395 = vector.broadcast %cst_257 : f32 to vector<1x32xf32>
    %396 = arith.subf %395, %390 : vector<1x32xf32>
    %397 = arith.mulf %396, %394 : vector<1x32xf32>
    %398 = arith.mulf %390, %369 : vector<1x32xf32>
    %399 = arith.addf %397, %398 : vector<1x32xf32>
    %c1_258 = arith.constant 1 : index
    %c0_259 = arith.constant 0 : index
    %400 = vector.load %arg26[%c1_258, %c0_259] : memref<8x32xf32, #tpu.memory_space<vmem>>, vector<1x32xf32>
    tpu.vector_store %arg26[%c1_258, %c0_259], %399 {strides = array<i32>} : memref<8x32xf32, #tpu.memory_space<vmem>>, vector<1x32xf32>,
    %cst_260 = arith.constant dense<0.000000e+00> : vector<1x32xf32>
    %401 = tpu.matmul %399, %329, %cst_260 {dimension_numbers = #tpu.dot_dimension_numbers<[1], [0], [0], [1], [0, 0, 1, 1], [], []>} : vector<1x32xf32>, vector<32x32xf32>, vector<1x32xf32> -> vector<1x32xf32>
    %402 = arith.addf %401, %335 : vector<1x32xf32>
    %cst_261 = arith.constant dense<0.000000e+00> : vector<1x32xf32>
    %403 = tpu.matmul %399, %331, %cst_261 {dimension_numbers = #tpu.dot_dimension_numbers<[1], [0], [0], [1], [0, 0, 1, 1], [], []>} : vector<1x32xf32>, vector<32x32xf32>, vector<1x32xf32> -> vector<1x32xf32>
    %404 = arith.addf %403, %337 : vector<1x32xf32>
    %cst_262 = arith.constant dense<0.000000e+00> : vector<1x32xf32>
    %405 = tpu.matmul %399, %333, %cst_262 {dimension_numbers = #tpu.dot_dimension_numbers<[1], [0], [0], [1], [0, 0, 1, 1], [], []>} : vector<1x32xf32>, vector<32x32xf32>, vector<1x32xf32> -> vector<1x32xf32>
    %406 = arith.addf %405, %339 : vector<1x32xf32>
    %c2_263 = arith.constant 2 : index
    %c0_264 = arith.constant 0 : index
    %407 = vector.load %arg23[%c2_263, %c0_264] : memref<8x32xf32, #tpu.memory_space<vmem>>, vector<1x32xf32>
    %408 = arith.addf %407, %402 : vector<1x32xf32>
    %409 = arith.negf %408 : vector<1x32xf32>
    %410 = math.exp %409 : vector<1x32xf32>
    %cst_265 = arith.constant 1.000000e+00 : f32
    %411 = vector.broadcast %cst_265 : f32 to vector<1x32xf32>
    %412 = arith.addf %411, %410 : vector<1x32xf32>
    %413 = arith.divf %411, %412 : vector<1x32xf32>
    %c2_266 = arith.constant 2 : index
    %c0_267 = arith.constant 0 : index
    %414 = vector.load %arg24[%c2_266, %c0_267] : memref<8x32xf32, #tpu.memory_space<vmem>>, vector<1x32xf32>
    %415 = arith.addf %414, %404 : vector<1x32xf32>
    %416 = arith.negf %415 : vector<1x32xf32>
    %417 = math.exp %416 : vector<1x32xf32>
    %cst_268 = arith.constant 1.000000e+00 : f32
    %418 = vector.broadcast %cst_268 : f32 to vector<1x32xf32>
    %419 = arith.addf %418, %417 : vector<1x32xf32>
    %420 = arith.divf %418, %419 : vector<1x32xf32>
    %c2_269 = arith.constant 2 : index
    %c0_270 = arith.constant 0 : index
    %421 = vector.load %arg25[%c2_269, %c0_270] : memref<8x32xf32, #tpu.memory_space<vmem>>, vector<1x32xf32>
    %422 = arith.mulf %413, %406 : vector<1x32xf32>
    %423 = arith.addf %421, %422 : vector<1x32xf32>
    %424 = math.tanh %423 : vector<1x32xf32>
    %cst_271 = arith.constant 1.000000e+00 : f32
    %425 = vector.broadcast %cst_271 : f32 to vector<1x32xf32>
    %426 = arith.subf %425, %420 : vector<1x32xf32>
    %427 = arith.mulf %426, %424 : vector<1x32xf32>
    %428 = arith.mulf %420, %399 : vector<1x32xf32>
    %429 = arith.addf %427, %428 : vector<1x32xf32>
    %c2_272 = arith.constant 2 : index
    %c0_273 = arith.constant 0 : index
    %430 = vector.load %arg26[%c2_272, %c0_273] : memref<8x32xf32, #tpu.memory_space<vmem>>, vector<1x32xf32>
    tpu.vector_store %arg26[%c2_272, %c0_273], %429 {strides = array<i32>} : memref<8x32xf32, #tpu.memory_space<vmem>>, vector<1x32xf32>,
    %cst_274 = arith.constant dense<0.000000e+00> : vector<1x32xf32>
    %431 = tpu.matmul %429, %329, %cst_274 {dimension_numbers = #tpu.dot_dimension_numbers<[1], [0], [0], [1], [0, 0, 1, 1], [], []>} : vector<1x32xf32>, vector<32x32xf32>, vector<1x32xf32> -> vector<1x32xf32>
    %432 = arith.addf %431, %335 : vector<1x32xf32>
    %cst_275 = arith.constant dense<0.000000e+00> : vector<1x32xf32>
    %433 = tpu.matmul %429, %331, %cst_275 {dimension_numbers = #tpu.dot_dimension_numbers<[1], [0], [0], [1], [0, 0, 1, 1], [], []>} : vector<1x32xf32>, vector<32x32xf32>, vector<1x32xf32> -> vector<1x32xf32>
    %434 = arith.addf %433, %337 : vector<1x32xf32>
    %cst_276 = arith.constant dense<0.000000e+00> : vector<1x32xf32>
    %435 = tpu.matmul %429, %333, %cst_276 {dimension_numbers = #tpu.dot_dimension_numbers<[1], [0], [0], [1], [0, 0, 1, 1], [], []>} : vector<1x32xf32>, vector<32x32xf32>, vector<1x32xf32> -> vector<1x32xf32>
    %436 = arith.addf %435, %339 : vector<1x32xf32>
    %c3_277 = arith.constant 3 : index
    %c0_278 = arith.constant 0 : index
    %437 = vector.load %arg23[%c3_277, %c0_278] : memref<8x32xf32, #tpu.memory_space<vmem>>, vector<1x32xf32>
    %438 = arith.addf %437, %432 : vector<1x32xf32>
    %439 = arith.negf %438 : vector<1x32xf32>
    %440 = math.exp %439 : vector<1x32xf32>
    %cst_279 = arith.constant 1.000000e+00 : f32
    %441 = vector.broadcast %cst_279 : f32 to vector<1x32xf32>
    %442 = arith.addf %441, %440 : vector<1x32xf32>
    %443 = arith.divf %441, %442 : vector<1x32xf32>
    %c3_280 = arith.constant 3 : index
    %c0_281 = arith.constant 0 : index
    %444 = vector.load %arg24[%c3_280, %c0_281] : memref<8x32xf32, #tpu.memory_space<vmem>>, vector<1x32xf32>
    %445 = arith.addf %444, %434 : vector<1x32xf32>
    %446 = arith.negf %445 : vector<1x32xf32>
    %447 = math.exp %446 : vector<1x32xf32>
    %cst_282 = arith.constant 1.000000e+00 : f32
    %448 = vector.broadcast %cst_282 : f32 to vector<1x32xf32>
    %449 = arith.addf %448, %447 : vector<1x32xf32>
    %450 = arith.divf %448, %449 : vector<1x32xf32>
    %c3_283 = arith.constant 3 : index
    %c0_284 = arith.constant 0 : index
    %451 = vector.load %arg25[%c3_283, %c0_284] : memref<8x32xf32, #tpu.memory_space<vmem>>, vector<1x32xf32>
    %452 = arith.mulf %443, %436 : vector<1x32xf32>
    %453 = arith.addf %451, %452 : vector<1x32xf32>
    %454 = math.tanh %453 : vector<1x32xf32>
    %cst_285 = arith.constant 1.000000e+00 : f32
    %455 = vector.broadcast %cst_285 : f32 to vector<1x32xf32>
    %456 = arith.subf %455, %450 : vector<1x32xf32>
    %457 = arith.mulf %456, %454 : vector<1x32xf32>
    %458 = arith.mulf %450, %429 : vector<1x32xf32>
    %459 = arith.addf %457, %458 : vector<1x32xf32>
    %c3_286 = arith.constant 3 : index
    %c0_287 = arith.constant 0 : index
    %460 = vector.load %arg26[%c3_286, %c0_287] : memref<8x32xf32, #tpu.memory_space<vmem>>, vector<1x32xf32>
    tpu.vector_store %arg26[%c3_286, %c0_287], %459 {strides = array<i32>} : memref<8x32xf32, #tpu.memory_space<vmem>>, vector<1x32xf32>,
    %cst_288 = arith.constant dense<0.000000e+00> : vector<1x32xf32>
    %461 = tpu.matmul %459, %329, %cst_288 {dimension_numbers = #tpu.dot_dimension_numbers<[1], [0], [0], [1], [0, 0, 1, 1], [], []>} : vector<1x32xf32>, vector<32x32xf32>, vector<1x32xf32> -> vector<1x32xf32>
    %462 = arith.addf %461, %335 : vector<1x32xf32>
    %cst_289 = arith.constant dense<0.000000e+00> : vector<1x32xf32>
    %463 = tpu.matmul %459, %331, %cst_289 {dimension_numbers = #tpu.dot_dimension_numbers<[1], [0], [0], [1], [0, 0, 1, 1], [], []>} : vector<1x32xf32>, vector<32x32xf32>, vector<1x32xf32> -> vector<1x32xf32>
    %464 = arith.addf %463, %337 : vector<1x32xf32>
    %cst_290 = arith.constant dense<0.000000e+00> : vector<1x32xf32>
    %465 = tpu.matmul %459, %333, %cst_290 {dimension_numbers = #tpu.dot_dimension_numbers<[1], [0], [0], [1], [0, 0, 1, 1], [], []>} : vector<1x32xf32>, vector<32x32xf32>, vector<1x32xf32> -> vector<1x32xf32>
    %466 = arith.addf %465, %339 : vector<1x32xf32>
    %c4_291 = arith.constant 4 : index
    %c0_292 = arith.constant 0 : index
    %467 = vector.load %arg23[%c4_291, %c0_292] : memref<8x32xf32, #tpu.memory_space<vmem>>, vector<1x32xf32>
    %468 = arith.addf %467, %462 : vector<1x32xf32>
    %469 = arith.negf %468 : vector<1x32xf32>
    %470 = math.exp %469 : vector<1x32xf32>
    %cst_293 = arith.constant 1.000000e+00 : f32
    %471 = vector.broadcast %cst_293 : f32 to vector<1x32xf32>
    %472 = arith.addf %471, %470 : vector<1x32xf32>
    %473 = arith.divf %471, %472 : vector<1x32xf32>
    %c4_294 = arith.constant 4 : index
    %c0_295 = arith.constant 0 : index
    %474 = vector.load %arg24[%c4_294, %c0_295] : memref<8x32xf32, #tpu.memory_space<vmem>>, vector<1x32xf32>
    %475 = arith.addf %474, %464 : vector<1x32xf32>
    %476 = arith.negf %475 : vector<1x32xf32>
    %477 = math.exp %476 : vector<1x32xf32>
    %cst_296 = arith.constant 1.000000e+00 : f32
    %478 = vector.broadcast %cst_296 : f32 to vector<1x32xf32>
    %479 = arith.addf %478, %477 : vector<1x32xf32>
    %480 = arith.divf %478, %479 : vector<1x32xf32>
    %c4_297 = arith.constant 4 : index
    %c0_298 = arith.constant 0 : index
    %481 = vector.load %arg25[%c4_297, %c0_298] : memref<8x32xf32, #tpu.memory_space<vmem>>, vector<1x32xf32>
    %482 = arith.mulf %473, %466 : vector<1x32xf32>
    %483 = arith.addf %481, %482 : vector<1x32xf32>
    %484 = math.tanh %483 : vector<1x32xf32>
    %cst_299 = arith.constant 1.000000e+00 : f32
    %485 = vector.broadcast %cst_299 : f32 to vector<1x32xf32>
    %486 = arith.subf %485, %480 : vector<1x32xf32>
    %487 = arith.mulf %486, %484 : vector<1x32xf32>
    %488 = arith.mulf %480, %459 : vector<1x32xf32>
    %489 = arith.addf %487, %488 : vector<1x32xf32>
    %c4_300 = arith.constant 4 : index
    %c0_301 = arith.constant 0 : index
    %490 = vector.load %arg26[%c4_300, %c0_301] : memref<8x32xf32, #tpu.memory_space<vmem>>, vector<1x32xf32>
    tpu.vector_store %arg26[%c4_300, %c0_301], %489 {strides = array<i32>} : memref<8x32xf32, #tpu.memory_space<vmem>>, vector<1x32xf32>,
    %cst_302 = arith.constant dense<0.000000e+00> : vector<1x32xf32>
    %491 = tpu.matmul %489, %329, %cst_302 {dimension_numbers = #tpu.dot_dimension_numbers<[1], [0], [0], [1], [0, 0, 1, 1], [], []>} : vector<1x32xf32>, vector<32x32xf32>, vector<1x32xf32> -> vector<1x32xf32>
    %492 = arith.addf %491, %335 : vector<1x32xf32>
    %cst_303 = arith.constant dense<0.000000e+00> : vector<1x32xf32>
    %493 = tpu.matmul %489, %331, %cst_303 {dimension_numbers = #tpu.dot_dimension_numbers<[1], [0], [0], [1], [0, 0, 1, 1], [], []>} : vector<1x32xf32>, vector<32x32xf32>, vector<1x32xf32> -> vector<1x32xf32>
    %494 = arith.addf %493, %337 : vector<1x32xf32>
    %cst_304 = arith.constant dense<0.000000e+00> : vector<1x32xf32>
    %495 = tpu.matmul %489, %333, %cst_304 {dimension_numbers = #tpu.dot_dimension_numbers<[1], [0], [0], [1], [0, 0, 1, 1], [], []>} : vector<1x32xf32>, vector<32x32xf32>, vector<1x32xf32> -> vector<1x32xf32>
    %496 = arith.addf %495, %339 : vector<1x32xf32>
    %c5_305 = arith.constant 5 : index
    %c0_306 = arith.constant 0 : index
    %497 = vector.load %arg23[%c5_305, %c0_306] : memref<8x32xf32, #tpu.memory_space<vmem>>, vector<1x32xf32>
    %498 = arith.addf %497, %492 : vector<1x32xf32>
    %499 = arith.negf %498 : vector<1x32xf32>
    %500 = math.exp %499 : vector<1x32xf32>
    %cst_307 = arith.constant 1.000000e+00 : f32
    %501 = vector.broadcast %cst_307 : f32 to vector<1x32xf32>
    %502 = arith.addf %501, %500 : vector<1x32xf32>
    %503 = arith.divf %501, %502 : vector<1x32xf32>
    %c5_308 = arith.constant 5 : index
    %c0_309 = arith.constant 0 : index
    %504 = vector.load %arg24[%c5_308, %c0_309] : memref<8x32xf32, #tpu.memory_space<vmem>>, vector<1x32xf32>
    %505 = arith.addf %504, %494 : vector<1x32xf32>
    %506 = arith.negf %505 : vector<1x32xf32>
    %507 = math.exp %506 : vector<1x32xf32>
    %cst_310 = arith.constant 1.000000e+00 : f32
    %508 = vector.broadcast %cst_310 : f32 to vector<1x32xf32>
    %509 = arith.addf %508, %507 : vector<1x32xf32>
    %510 = arith.divf %508, %509 : vector<1x32xf32>
    %c5_311 = arith.constant 5 : index
    %c0_312 = arith.constant 0 : index
    %511 = vector.load %arg25[%c5_311, %c0_312] : memref<8x32xf32, #tpu.memory_space<vmem>>, vector<1x32xf32>
    %512 = arith.mulf %503, %496 : vector<1x32xf32>
    %513 = arith.addf %511, %512 : vector<1x32xf32>
    %514 = math.tanh %513 : vector<1x32xf32>
    %cst_313 = arith.constant 1.000000e+00 : f32
    %515 = vector.broadcast %cst_313 : f32 to vector<1x32xf32>
    %516 = arith.subf %515, %510 : vector<1x32xf32>
    %517 = arith.mulf %516, %514 : vector<1x32xf32>
    %518 = arith.mulf %510, %489 : vector<1x32xf32>
    %519 = arith.addf %517, %518 : vector<1x32xf32>
    %c5_314 = arith.constant 5 : index
    %c0_315 = arith.constant 0 : index
    %520 = vector.load %arg26[%c5_314, %c0_315] : memref<8x32xf32, #tpu.memory_space<vmem>>, vector<1x32xf32>
    tpu.vector_store %arg26[%c5_314, %c0_315], %519 {strides = array<i32>} : memref<8x32xf32, #tpu.memory_space<vmem>>, vector<1x32xf32>,
    %cst_316 = arith.constant dense<0.000000e+00> : vector<1x32xf32>
    %521 = tpu.matmul %519, %329, %cst_316 {dimension_numbers = #tpu.dot_dimension_numbers<[1], [0], [0], [1], [0, 0, 1, 1], [], []>} : vector<1x32xf32>, vector<32x32xf32>, vector<1x32xf32> -> vector<1x32xf32>
    %522 = arith.addf %521, %335 : vector<1x32xf32>
    %cst_317 = arith.constant dense<0.000000e+00> : vector<1x32xf32>
    %523 = tpu.matmul %519, %331, %cst_317 {dimension_numbers = #tpu.dot_dimension_numbers<[1], [0], [0], [1], [0, 0, 1, 1], [], []>} : vector<1x32xf32>, vector<32x32xf32>, vector<1x32xf32> -> vector<1x32xf32>
    %524 = arith.addf %523, %337 : vector<1x32xf32>
    %cst_318 = arith.constant dense<0.000000e+00> : vector<1x32xf32>
    %525 = tpu.matmul %519, %333, %cst_318 {dimension_numbers = #tpu.dot_dimension_numbers<[1], [0], [0], [1], [0, 0, 1, 1], [], []>} : vector<1x32xf32>, vector<32x32xf32>, vector<1x32xf32> -> vector<1x32xf32>
    %526 = arith.addf %525, %339 : vector<1x32xf32>
    %c6_319 = arith.constant 6 : index
    %c0_320 = arith.constant 0 : index
    %527 = vector.load %arg23[%c6_319, %c0_320] : memref<8x32xf32, #tpu.memory_space<vmem>>, vector<1x32xf32>
    %528 = arith.addf %527, %522 : vector<1x32xf32>
    %529 = arith.negf %528 : vector<1x32xf32>
    %530 = math.exp %529 : vector<1x32xf32>
    %cst_321 = arith.constant 1.000000e+00 : f32
    %531 = vector.broadcast %cst_321 : f32 to vector<1x32xf32>
    %532 = arith.addf %531, %530 : vector<1x32xf32>
    %533 = arith.divf %531, %532 : vector<1x32xf32>
    %c6_322 = arith.constant 6 : index
    %c0_323 = arith.constant 0 : index
    %534 = vector.load %arg24[%c6_322, %c0_323] : memref<8x32xf32, #tpu.memory_space<vmem>>, vector<1x32xf32>
    %535 = arith.addf %534, %524 : vector<1x32xf32>
    %536 = arith.negf %535 : vector<1x32xf32>
    %537 = math.exp %536 : vector<1x32xf32>
    %cst_324 = arith.constant 1.000000e+00 : f32
    %538 = vector.broadcast %cst_324 : f32 to vector<1x32xf32>
    %539 = arith.addf %538, %537 : vector<1x32xf32>
    %540 = arith.divf %538, %539 : vector<1x32xf32>
    %c6_325 = arith.constant 6 : index
    %c0_326 = arith.constant 0 : index
    %541 = vector.load %arg25[%c6_325, %c0_326] : memref<8x32xf32, #tpu.memory_space<vmem>>, vector<1x32xf32>
    %542 = arith.mulf %533, %526 : vector<1x32xf32>
    %543 = arith.addf %541, %542 : vector<1x32xf32>
    %544 = math.tanh %543 : vector<1x32xf32>
    %cst_327 = arith.constant 1.000000e+00 : f32
    %545 = vector.broadcast %cst_327 : f32 to vector<1x32xf32>
    %546 = arith.subf %545, %540 : vector<1x32xf32>
    %547 = arith.mulf %546, %544 : vector<1x32xf32>
    %548 = arith.mulf %540, %519 : vector<1x32xf32>
    %549 = arith.addf %547, %548 : vector<1x32xf32>
    %c6_328 = arith.constant 6 : index
    %c0_329 = arith.constant 0 : index
    %550 = vector.load %arg26[%c6_328, %c0_329] : memref<8x32xf32, #tpu.memory_space<vmem>>, vector<1x32xf32>
    tpu.vector_store %arg26[%c6_328, %c0_329], %549 {strides = array<i32>} : memref<8x32xf32, #tpu.memory_space<vmem>>, vector<1x32xf32>,
    %cst_330 = arith.constant dense<0.000000e+00> : vector<1x32xf32>
    %551 = tpu.matmul %549, %329, %cst_330 {dimension_numbers = #tpu.dot_dimension_numbers<[1], [0], [0], [1], [0, 0, 1, 1], [], []>} : vector<1x32xf32>, vector<32x32xf32>, vector<1x32xf32> -> vector<1x32xf32>
    %552 = arith.addf %551, %335 : vector<1x32xf32>
    %cst_331 = arith.constant dense<0.000000e+00> : vector<1x32xf32>
    %553 = tpu.matmul %549, %331, %cst_331 {dimension_numbers = #tpu.dot_dimension_numbers<[1], [0], [0], [1], [0, 0, 1, 1], [], []>} : vector<1x32xf32>, vector<32x32xf32>, vector<1x32xf32> -> vector<1x32xf32>
    %554 = arith.addf %553, %337 : vector<1x32xf32>
    %cst_332 = arith.constant dense<0.000000e+00> : vector<1x32xf32>
    %555 = tpu.matmul %549, %333, %cst_332 {dimension_numbers = #tpu.dot_dimension_numbers<[1], [0], [0], [1], [0, 0, 1, 1], [], []>} : vector<1x32xf32>, vector<32x32xf32>, vector<1x32xf32> -> vector<1x32xf32>
    %556 = arith.addf %555, %339 : vector<1x32xf32>
    %c7_333 = arith.constant 7 : index
    %c0_334 = arith.constant 0 : index
    %557 = vector.load %arg23[%c7_333, %c0_334] : memref<8x32xf32, #tpu.memory_space<vmem>>, vector<1x32xf32>
    %558 = arith.addf %557, %552 : vector<1x32xf32>
    %559 = arith.negf %558 : vector<1x32xf32>
    %560 = math.exp %559 : vector<1x32xf32>
    %cst_335 = arith.constant 1.000000e+00 : f32
    %561 = vector.broadcast %cst_335 : f32 to vector<1x32xf32>
    %562 = arith.addf %561, %560 : vector<1x32xf32>
    %563 = arith.divf %561, %562 : vector<1x32xf32>
    %c7_336 = arith.constant 7 : index
    %c0_337 = arith.constant 0 : index
    %564 = vector.load %arg24[%c7_336, %c0_337] : memref<8x32xf32, #tpu.memory_space<vmem>>, vector<1x32xf32>
    %565 = arith.addf %564, %554 : vector<1x32xf32>
    %566 = arith.negf %565 : vector<1x32xf32>
    %567 = math.exp %566 : vector<1x32xf32>
    %cst_338 = arith.constant 1.000000e+00 : f32
    %568 = vector.broadcast %cst_338 : f32 to vector<1x32xf32>
    %569 = arith.addf %568, %567 : vector<1x32xf32>
    %570 = arith.divf %568, %569 : vector<1x32xf32>
    %c7_339 = arith.constant 7 : index
    %c0_340 = arith.constant 0 : index
    %571 = vector.load %arg25[%c7_339, %c0_340] : memref<8x32xf32, #tpu.memory_space<vmem>>, vector<1x32xf32>
    %572 = arith.mulf %563, %556 : vector<1x32xf32>
    %573 = arith.addf %571, %572 : vector<1x32xf32>
    %574 = math.tanh %573 : vector<1x32xf32>
    %cst_341 = arith.constant 1.000000e+00 : f32
    %575 = vector.broadcast %cst_341 : f32 to vector<1x32xf32>
    %576 = arith.subf %575, %570 : vector<1x32xf32>
    %577 = arith.mulf %576, %574 : vector<1x32xf32>
    %578 = arith.mulf %570, %549 : vector<1x32xf32>
    %579 = arith.addf %577, %578 : vector<1x32xf32>
    %c7_342 = arith.constant 7 : index
    %c0_343 = arith.constant 0 : index
    %580 = vector.load %arg26[%c7_342, %c0_343] : memref<8x32xf32, #tpu.memory_space<vmem>>, vector<1x32xf32>
    tpu.vector_store %arg26[%c7_342, %c0_343], %579 {strides = array<i32>} : memref<8x32xf32, #tpu.memory_space<vmem>>, vector<1x32xf32>,
    %c0_344 = arith.constant 0 : index
    %c0_345 = arith.constant 0 : index
    %581 = vector.load %arg26[%c0_344, %c0_345] : memref<8x32xf32, #tpu.memory_space<vmem>>, vector<8x32xf32>
    %582 = vector.broadcast %17 : vector<8x1xf32> to vector<8x32xf32>
    %583 = arith.mulf %581, %582 : vector<8x32xf32>
    %cst_346 = arith.constant 0.000000e+00 : f32
    %584 = vector.broadcast %cst_346 : f32 to vector<8x32xf32>
    %c0_347 = arith.constant 0 : index
    %c0_348 = arith.constant 0 : index
    %c0_349 = arith.constant 0 : index
    %c0_350 = arith.constant 0 : index
    %585 = vector.load %arg8[%c0_347, %c0_348, %c0_349, %c0_350] : memref<3x4x32x8xf32, #tpu.memory_space<vmem>>, vector<1x1x32x8xf32>
    %586 = vector.shape_cast %585 : vector<1x1x32x8xf32> to vector<32x8xf32>
    %cst_351 = arith.constant dense<0.000000e+00> : vector<8x8xf32>
    %587 = tpu.matmul %583, %586, %cst_351 {dimension_numbers = #tpu.dot_dimension_numbers<[1], [0], [0], [1], [0, 0, 1, 1], [], []>} : vector<8x32xf32>, vector<32x8xf32>, vector<8x8xf32> -> vector<8x8xf32>
    %c0_352 = arith.constant 0 : index
    %c0_353 = arith.constant 0 : index
    %c0_354 = arith.constant 0 : index
    %c0_355 = arith.constant 0 : index
    %588 = vector.load %arg9[%c0_352, %c0_353, %c0_354, %c0_355] : memref<3x4x1x8xf32, #tpu.memory_space<vmem>>, vector<1x1x1x8xf32>
    %589 = vector.shape_cast %588 : vector<1x1x1x8xf32> to vector<1x8xf32>
    %590 = vector.broadcast %589 : vector<1x8xf32> to vector<8x8xf32>
    %591 = arith.addf %587, %590 : vector<8x8xf32>
    %c1_356 = arith.constant 1 : index
    %c0_357 = arith.constant 0 : index
    %c0_358 = arith.constant 0 : index
    %c0_359 = arith.constant 0 : index
    %592 = vector.load %arg8[%c1_356, %c0_357, %c0_358, %c0_359] : memref<3x4x32x8xf32, #tpu.memory_space<vmem>>, vector<1x1x32x8xf32>
    %593 = vector.shape_cast %592 : vector<1x1x32x8xf32> to vector<32x8xf32>
    %cst_360 = arith.constant dense<0.000000e+00> : vector<8x8xf32>
    %594 = tpu.matmul %583, %593, %cst_360 {dimension_numbers = #tpu.dot_dimension_numbers<[1], [0], [0], [1], [0, 0, 1, 1], [], []>} : vector<8x32xf32>, vector<32x8xf32>, vector<8x8xf32> -> vector<8x8xf32>
    %c1_361 = arith.constant 1 : index
    %c0_362 = arith.constant 0 : index
    %c0_363 = arith.constant 0 : index
    %c0_364 = arith.constant 0 : index
    %595 = vector.load %arg9[%c1_361, %c0_362, %c0_363, %c0_364] : memref<3x4x1x8xf32, #tpu.memory_space<vmem>>, vector<1x1x1x8xf32>
    %596 = vector.shape_cast %595 : vector<1x1x1x8xf32> to vector<1x8xf32>
    %597 = vector.broadcast %596 : vector<1x8xf32> to vector<8x8xf32>
    %598 = arith.addf %594, %597 : vector<8x8xf32>
    %c2_365 = arith.constant 2 : index
    %c0_366 = arith.constant 0 : index
    %c0_367 = arith.constant 0 : index
    %c0_368 = arith.constant 0 : index
    %599 = vector.load %arg8[%c2_365, %c0_366, %c0_367, %c0_368] : memref<3x4x32x8xf32, #tpu.memory_space<vmem>>, vector<1x1x32x8xf32>
    %600 = vector.shape_cast %599 : vector<1x1x32x8xf32> to vector<32x8xf32>
    %cst_369 = arith.constant dense<0.000000e+00> : vector<8x8xf32>
    %601 = tpu.matmul %583, %600, %cst_369 {dimension_numbers = #tpu.dot_dimension_numbers<[1], [0], [0], [1], [0, 0, 1, 1], [], []>} : vector<8x32xf32>, vector<32x8xf32>, vector<8x8xf32> -> vector<8x8xf32>
    %c2_370 = arith.constant 2 : index
    %c0_371 = arith.constant 0 : index
    %c0_372 = arith.constant 0 : index
    %c0_373 = arith.constant 0 : index
    %602 = vector.load %arg9[%c2_370, %c0_371, %c0_372, %c0_373] : memref<3x4x1x8xf32, #tpu.memory_space<vmem>>, vector<1x1x1x8xf32>
    %603 = vector.shape_cast %602 : vector<1x1x1x8xf32> to vector<1x8xf32>
    %604 = vector.broadcast %603 : vector<1x8xf32> to vector<8x8xf32>
    %605 = arith.addf %601, %604 : vector<8x8xf32>
    "tpu.trace_start"() <{level = 10 : i32, message = "qd,kd->qk"}> : () -> ()
    %cst_374 = arith.constant dense<0.000000e+00> : vector<8x8xf32>
    %606 = tpu.matmul %591, %598, %cst_374 {dimension_numbers = #tpu.dot_dimension_numbers<[1], [1], [0], [0], [0, 0, 1, 0], [], []>} : vector<8x8xf32>, vector<8x8xf32>, vector<8x8xf32> -> vector<8x8xf32>
    "tpu.trace_stop"() : () -> ()
    %cst_375 = arith.constant 0.353553385 : f32
    %607 = vector.broadcast %cst_375 : f32 to vector<8x8xf32>
    %608 = arith.mulf %606, %607 : vector<8x8xf32>
    %609 = arith.addf %608, %25 : vector<8x8xf32>
    %cst_376 = arith.constant dense<0xFF800000> : vector<8xf32>
    %610 = vector.multi_reduction <maximumf>, %609, %cst_376 [1] : vector<8x8xf32> to vector<8xf32>
    %611 = vector.shape_cast %610 : vector<8xf32> to vector<8x1xf32>
    %612 = vector.broadcast %611 : vector<8x1xf32> to vector<8x8xf32>
    %613 = arith.subf %609, %612 : vector<8x8xf32>
    %614 = math.exp %613 : vector<8x8xf32>
    %cst_377 = arith.constant dense<0.000000e+00> : vector<8xf32>
    %615 = vector.multi_reduction <add>, %614, %cst_377 [1] : vector<8x8xf32> to vector<8xf32>
    %616 = vector.shape_cast %615 : vector<8xf32> to vector<8x1xf32>
    %617 = tpu.reciprocal %616 {approx = true} : vector<8x1xf32> -> vector<8x1xf32>
    %618 = vector.broadcast %617 : vector<8x1xf32> to vector<8x8xf32>
    %619 = arith.mulf %614, %618 : vector<8x8xf32>
    %cst_378 = arith.constant dense<0.000000e+00> : vector<8x8xf32>
    %620 = tpu.matmul %619, %605, %cst_378 {dimension_numbers = #tpu.dot_dimension_numbers<[1], [0], [0], [1], [0, 0, 1, 1], [], []>} : vector<8x8xf32>, vector<8x8xf32>, vector<8x8xf32> -> vector<8x8xf32>
    %c0_379 = arith.constant 0 : index
    %c0_380 = arith.constant 0 : index
    %c0_381 = arith.constant 0 : index
    %621 = vector.load %arg10[%c0_379, %c0_380, %c0_381] : memref<4x8x32xf32, #tpu.memory_space<vmem>>, vector<1x8x32xf32>
    %622 = vector.shape_cast %621 : vector<1x8x32xf32> to vector<8x32xf32>
    %cst_382 = arith.constant dense<0.000000e+00> : vector<8x32xf32>
    %623 = tpu.matmul %620, %622, %cst_382 {dimension_numbers = #tpu.dot_dimension_numbers<[1], [0], [0], [1], [0, 0, 1, 1], [], []>} : vector<8x8xf32>, vector<8x32xf32>, vector<8x32xf32> -> vector<8x32xf32>
    %624 = arith.addf %584, %623 : vector<8x32xf32>
    %c0_383 = arith.constant 0 : index
    %c1_384 = arith.constant 1 : index
    %c0_385 = arith.constant 0 : index
    %c0_386 = arith.constant 0 : index
    %625 = vector.load %arg8[%c0_383, %c1_384, %c0_385, %c0_386] : memref<3x4x32x8xf32, #tpu.memory_space<vmem>>, vector<1x1x32x8xf32>
    %626 = vector.shape_cast %625 : vector<1x1x32x8xf32> to vector<32x8xf32>
    %cst_387 = arith.constant dense<0.000000e+00> : vector<8x8xf32>
    %627 = tpu.matmul %583, %626, %cst_387 {dimension_numbers = #tpu.dot_dimension_numbers<[1], [0], [0], [1], [0, 0, 1, 1], [], []>} : vector<8x32xf32>, vector<32x8xf32>, vector<8x8xf32> -> vector<8x8xf32>
    %c0_388 = arith.constant 0 : index
    %c1_389 = arith.constant 1 : index
    %c0_390 = arith.constant 0 : index
    %c0_391 = arith.constant 0 : index
    %628 = vector.load %arg9[%c0_388, %c1_389, %c0_390, %c0_391] : memref<3x4x1x8xf32, #tpu.memory_space<vmem>>, vector<1x1x1x8xf32>
    %629 = vector.shape_cast %628 : vector<1x1x1x8xf32> to vector<1x8xf32>
    %630 = vector.broadcast %629 : vector<1x8xf32> to vector<8x8xf32>
    %631 = arith.addf %627, %630 : vector<8x8xf32>
    %c1_392 = arith.constant 1 : index
    %c1_393 = arith.constant 1 : index
    %c0_394 = arith.constant 0 : index
    %c0_395 = arith.constant 0 : index
    %632 = vector.load %arg8[%c1_392, %c1_393, %c0_394, %c0_395] : memref<3x4x32x8xf32, #tpu.memory_space<vmem>>, vector<1x1x32x8xf32>
    %633 = vector.shape_cast %632 : vector<1x1x32x8xf32> to vector<32x8xf32>
    %cst_396 = arith.constant dense<0.000000e+00> : vector<8x8xf32>
    %634 = tpu.matmul %583, %633, %cst_396 {dimension_numbers = #tpu.dot_dimension_numbers<[1], [0], [0], [1], [0, 0, 1, 1], [], []>} : vector<8x32xf32>, vector<32x8xf32>, vector<8x8xf32> -> vector<8x8xf32>
    %c1_397 = arith.constant 1 : index
    %c1_398 = arith.constant 1 : index
    %c0_399 = arith.constant 0 : index
    %c0_400 = arith.constant 0 : index
    %635 = vector.load %arg9[%c1_397, %c1_398, %c0_399, %c0_400] : memref<3x4x1x8xf32, #tpu.memory_space<vmem>>, vector<1x1x1x8xf32>
    %636 = vector.shape_cast %635 : vector<1x1x1x8xf32> to vector<1x8xf32>
    %637 = vector.broadcast %636 : vector<1x8xf32> to vector<8x8xf32>
    %638 = arith.addf %634, %637 : vector<8x8xf32>
    %c2_401 = arith.constant 2 : index
    %c1_402 = arith.constant 1 : index
    %c0_403 = arith.constant 0 : index
    %c0_404 = arith.constant 0 : index
    %639 = vector.load %arg8[%c2_401, %c1_402, %c0_403, %c0_404] : memref<3x4x32x8xf32, #tpu.memory_space<vmem>>, vector<1x1x32x8xf32>
    %640 = vector.shape_cast %639 : vector<1x1x32x8xf32> to vector<32x8xf32>
    %cst_405 = arith.constant dense<0.000000e+00> : vector<8x8xf32>
    %641 = tpu.matmul %583, %640, %cst_405 {dimension_numbers = #tpu.dot_dimension_numbers<[1], [0], [0], [1], [0, 0, 1, 1], [], []>} : vector<8x32xf32>, vector<32x8xf32>, vector<8x8xf32> -> vector<8x8xf32>
    %c2_406 = arith.constant 2 : index
    %c1_407 = arith.constant 1 : index
    %c0_408 = arith.constant 0 : index
    %c0_409 = arith.constant 0 : index
    %642 = vector.load %arg9[%c2_406, %c1_407, %c0_408, %c0_409] : memref<3x4x1x8xf32, #tpu.memory_space<vmem>>, vector<1x1x1x8xf32>
    %643 = vector.shape_cast %642 : vector<1x1x1x8xf32> to vector<1x8xf32>
    %644 = vector.broadcast %643 : vector<1x8xf32> to vector<8x8xf32>
    %645 = arith.addf %641, %644 : vector<8x8xf32>
    "tpu.trace_start"() <{level = 10 : i32, message = "qd,kd->qk"}> : () -> ()
    %cst_410 = arith.constant dense<0.000000e+00> : vector<8x8xf32>
    %646 = tpu.matmul %631, %638, %cst_410 {dimension_numbers = #tpu.dot_dimension_numbers<[1], [1], [0], [0], [0, 0, 1, 0], [], []>} : vector<8x8xf32>, vector<8x8xf32>, vector<8x8xf32> -> vector<8x8xf32>
    "tpu.trace_stop"() : () -> ()
    %cst_411 = arith.constant 0.353553385 : f32
    %647 = vector.broadcast %cst_411 : f32 to vector<8x8xf32>
    %648 = arith.mulf %646, %647 : vector<8x8xf32>
    %649 = arith.addf %648, %25 : vector<8x8xf32>
    %cst_412 = arith.constant dense<0xFF800000> : vector<8xf32>
    %650 = vector.multi_reduction <maximumf>, %649, %cst_412 [1] : vector<8x8xf32> to vector<8xf32>
    %651 = vector.shape_cast %650 : vector<8xf32> to vector<8x1xf32>
    %652 = vector.broadcast %651 : vector<8x1xf32> to vector<8x8xf32>
    %653 = arith.subf %649, %652 : vector<8x8xf32>
    %654 = math.exp %653 : vector<8x8xf32>
    %cst_413 = arith.constant dense<0.000000e+00> : vector<8xf32>
    %655 = vector.multi_reduction <add>, %654, %cst_413 [1] : vector<8x8xf32> to vector<8xf32>
    %656 = vector.shape_cast %655 : vector<8xf32> to vector<8x1xf32>
    %657 = tpu.reciprocal %656 {approx = true} : vector<8x1xf32> -> vector<8x1xf32>
    %658 = vector.broadcast %657 : vector<8x1xf32> to vector<8x8xf32>
    %659 = arith.mulf %654, %658 : vector<8x8xf32>
    %cst_414 = arith.constant dense<0.000000e+00> : vector<8x8xf32>
    %660 = tpu.matmul %659, %645, %cst_414 {dimension_numbers = #tpu.dot_dimension_numbers<[1], [0], [0], [1], [0, 0, 1, 1], [], []>} : vector<8x8xf32>, vector<8x8xf32>, vector<8x8xf32> -> vector<8x8xf32>
    %c1_415 = arith.constant 1 : index
    %c0_416 = arith.constant 0 : index
    %c0_417 = arith.constant 0 : index
    %661 = vector.load %arg10[%c1_415, %c0_416, %c0_417] : memref<4x8x32xf32, #tpu.memory_space<vmem>>, vector<1x8x32xf32>
    %662 = vector.shape_cast %661 : vector<1x8x32xf32> to vector<8x32xf32>
    %cst_418 = arith.constant dense<0.000000e+00> : vector<8x32xf32>
    %663 = tpu.matmul %660, %662, %cst_418 {dimension_numbers = #tpu.dot_dimension_numbers<[1], [0], [0], [1], [0, 0, 1, 1], [], []>} : vector<8x8xf32>, vector<8x32xf32>, vector<8x32xf32> -> vector<8x32xf32>
    %664 = arith.addf %624, %663 : vector<8x32xf32>
    %c0_419 = arith.constant 0 : index
    %c2_420 = arith.constant 2 : index
    %c0_421 = arith.constant 0 : index
    %c0_422 = arith.constant 0 : index
    %665 = vector.load %arg8[%c0_419, %c2_420, %c0_421, %c0_422] : memref<3x4x32x8xf32, #tpu.memory_space<vmem>>, vector<1x1x32x8xf32>
    %666 = vector.shape_cast %665 : vector<1x1x32x8xf32> to vector<32x8xf32>
    %cst_423 = arith.constant dense<0.000000e+00> : vector<8x8xf32>
    %667 = tpu.matmul %583, %666, %cst_423 {dimension_numbers = #tpu.dot_dimension_numbers<[1], [0], [0], [1], [0, 0, 1, 1], [], []>} : vector<8x32xf32>, vector<32x8xf32>, vector<8x8xf32> -> vector<8x8xf32>
    %c0_424 = arith.constant 0 : index
    %c2_425 = arith.constant 2 : index
    %c0_426 = arith.constant 0 : index
    %c0_427 = arith.constant 0 : index
    %668 = vector.load %arg9[%c0_424, %c2_425, %c0_426, %c0_427] : memref<3x4x1x8xf32, #tpu.memory_space<vmem>>, vector<1x1x1x8xf32>
    %669 = vector.shape_cast %668 : vector<1x1x1x8xf32> to vector<1x8xf32>
    %670 = vector.broadcast %669 : vector<1x8xf32> to vector<8x8xf32>
    %671 = arith.addf %667, %670 : vector<8x8xf32>
    %c1_428 = arith.constant 1 : index
    %c2_429 = arith.constant 2 : index
    %c0_430 = arith.constant 0 : index
    %c0_431 = arith.constant 0 : index
    %672 = vector.load %arg8[%c1_428, %c2_429, %c0_430, %c0_431] : memref<3x4x32x8xf32, #tpu.memory_space<vmem>>, vector<1x1x32x8xf32>
    %673 = vector.shape_cast %672 : vector<1x1x32x8xf32> to vector<32x8xf32>
    %cst_432 = arith.constant dense<0.000000e+00> : vector<8x8xf32>
    %674 = tpu.matmul %583, %673, %cst_432 {dimension_numbers = #tpu.dot_dimension_numbers<[1], [0], [0], [1], [0, 0, 1, 1], [], []>} : vector<8x32xf32>, vector<32x8xf32>, vector<8x8xf32> -> vector<8x8xf32>
    %c1_433 = arith.constant 1 : index
    %c2_434 = arith.constant 2 : index
    %c0_435 = arith.constant 0 : index
    %c0_436 = arith.constant 0 : index
    %675 = vector.load %arg9[%c1_433, %c2_434, %c0_435, %c0_436] : memref<3x4x1x8xf32, #tpu.memory_space<vmem>>, vector<1x1x1x8xf32>
    %676 = vector.shape_cast %675 : vector<1x1x1x8xf32> to vector<1x8xf32>
    %677 = vector.broadcast %676 : vector<1x8xf32> to vector<8x8xf32>
    %678 = arith.addf %674, %677 : vector<8x8xf32>
    %c2_437 = arith.constant 2 : index
    %c2_438 = arith.constant 2 : index
    %c0_439 = arith.constant 0 : index
    %c0_440 = arith.constant 0 : index
    %679 = vector.load %arg8[%c2_437, %c2_438, %c0_439, %c0_440] : memref<3x4x32x8xf32, #tpu.memory_space<vmem>>, vector<1x1x32x8xf32>
    %680 = vector.shape_cast %679 : vector<1x1x32x8xf32> to vector<32x8xf32>
    %cst_441 = arith.constant dense<0.000000e+00> : vector<8x8xf32>
    %681 = tpu.matmul %583, %680, %cst_441 {dimension_numbers = #tpu.dot_dimension_numbers<[1], [0], [0], [1], [0, 0, 1, 1], [], []>} : vector<8x32xf32>, vector<32x8xf32>, vector<8x8xf32> -> vector<8x8xf32>
    %c2_442 = arith.constant 2 : index
    %c2_443 = arith.constant 2 : index
    %c0_444 = arith.constant 0 : index
    %c0_445 = arith.constant 0 : index
    %682 = vector.load %arg9[%c2_442, %c2_443, %c0_444, %c0_445] : memref<3x4x1x8xf32, #tpu.memory_space<vmem>>, vector<1x1x1x8xf32>
    %683 = vector.shape_cast %682 : vector<1x1x1x8xf32> to vector<1x8xf32>
    %684 = vector.broadcast %683 : vector<1x8xf32> to vector<8x8xf32>
    %685 = arith.addf %681, %684 : vector<8x8xf32>
    "tpu.trace_start"() <{level = 10 : i32, message = "qd,kd->qk"}> : () -> ()
    %cst_446 = arith.constant dense<0.000000e+00> : vector<8x8xf32>
    %686 = tpu.matmul %671, %678, %cst_446 {dimension_numbers = #tpu.dot_dimension_numbers<[1], [1], [0], [0], [0, 0, 1, 0], [], []>} : vector<8x8xf32>, vector<8x8xf32>, vector<8x8xf32> -> vector<8x8xf32>
    "tpu.trace_stop"() : () -> ()
    %cst_447 = arith.constant 0.353553385 : f32
    %687 = vector.broadcast %cst_447 : f32 to vector<8x8xf32>
    %688 = arith.mulf %686, %687 : vector<8x8xf32>
    %689 = arith.addf %688, %25 : vector<8x8xf32>
    %cst_448 = arith.constant dense<0xFF800000> : vector<8xf32>
    %690 = vector.multi_reduction <maximumf>, %689, %cst_448 [1] : vector<8x8xf32> to vector<8xf32>
    %691 = vector.shape_cast %690 : vector<8xf32> to vector<8x1xf32>
    %692 = vector.broadcast %691 : vector<8x1xf32> to vector<8x8xf32>
    %693 = arith.subf %689, %692 : vector<8x8xf32>
    %694 = math.exp %693 : vector<8x8xf32>
    %cst_449 = arith.constant dense<0.000000e+00> : vector<8xf32>
    %695 = vector.multi_reduction <add>, %694, %cst_449 [1] : vector<8x8xf32> to vector<8xf32>
    %696 = vector.shape_cast %695 : vector<8xf32> to vector<8x1xf32>
    %697 = tpu.reciprocal %696 {approx = true} : vector<8x1xf32> -> vector<8x1xf32>
    %698 = vector.broadcast %697 : vector<8x1xf32> to vector<8x8xf32>
    %699 = arith.mulf %694, %698 : vector<8x8xf32>
    %cst_450 = arith.constant dense<0.000000e+00> : vector<8x8xf32>
    %700 = tpu.matmul %699, %685, %cst_450 {dimension_numbers = #tpu.dot_dimension_numbers<[1], [0], [0], [1], [0, 0, 1, 1], [], []>} : vector<8x8xf32>, vector<8x8xf32>, vector<8x8xf32> -> vector<8x8xf32>
    %c2_451 = arith.constant 2 : index
    %c0_452 = arith.constant 0 : index
    %c0_453 = arith.constant 0 : index
    %701 = vector.load %arg10[%c2_451, %c0_452, %c0_453] : memref<4x8x32xf32, #tpu.memory_space<vmem>>, vector<1x8x32xf32>
    %702 = vector.shape_cast %701 : vector<1x8x32xf32> to vector<8x32xf32>
    %cst_454 = arith.constant dense<0.000000e+00> : vector<8x32xf32>
    %703 = tpu.matmul %700, %702, %cst_454 {dimension_numbers = #tpu.dot_dimension_numbers<[1], [0], [0], [1], [0, 0, 1, 1], [], []>} : vector<8x8xf32>, vector<8x32xf32>, vector<8x32xf32> -> vector<8x32xf32>
    %704 = arith.addf %664, %703 : vector<8x32xf32>
    %c0_455 = arith.constant 0 : index
    %c3_456 = arith.constant 3 : index
    %c0_457 = arith.constant 0 : index
    %c0_458 = arith.constant 0 : index
    %705 = vector.load %arg8[%c0_455, %c3_456, %c0_457, %c0_458] : memref<3x4x32x8xf32, #tpu.memory_space<vmem>>, vector<1x1x32x8xf32>
    %706 = vector.shape_cast %705 : vector<1x1x32x8xf32> to vector<32x8xf32>
    %cst_459 = arith.constant dense<0.000000e+00> : vector<8x8xf32>
    %707 = tpu.matmul %583, %706, %cst_459 {dimension_numbers = #tpu.dot_dimension_numbers<[1], [0], [0], [1], [0, 0, 1, 1], [], []>} : vector<8x32xf32>, vector<32x8xf32>, vector<8x8xf32> -> vector<8x8xf32>
    %c0_460 = arith.constant 0 : index
    %c3_461 = arith.constant 3 : index
    %c0_462 = arith.constant 0 : index
    %c0_463 = arith.constant 0 : index
    %708 = vector.load %arg9[%c0_460, %c3_461, %c0_462, %c0_463] : memref<3x4x1x8xf32, #tpu.memory_space<vmem>>, vector<1x1x1x8xf32>
    %709 = vector.shape_cast %708 : vector<1x1x1x8xf32> to vector<1x8xf32>
    %710 = vector.broadcast %709 : vector<1x8xf32> to vector<8x8xf32>
    %711 = arith.addf %707, %710 : vector<8x8xf32>
    %c1_464 = arith.constant 1 : index
    %c3_465 = arith.constant 3 : index
    %c0_466 = arith.constant 0 : index
    %c0_467 = arith.constant 0 : index
    %712 = vector.load %arg8[%c1_464, %c3_465, %c0_466, %c0_467] : memref<3x4x32x8xf32, #tpu.memory_space<vmem>>, vector<1x1x32x8xf32>
    %713 = vector.shape_cast %712 : vector<1x1x32x8xf32> to vector<32x8xf32>
    %cst_468 = arith.constant dense<0.000000e+00> : vector<8x8xf32>
    %714 = tpu.matmul %583, %713, %cst_468 {dimension_numbers = #tpu.dot_dimension_numbers<[1], [0], [0], [1], [0, 0, 1, 1], [], []>} : vector<8x32xf32>, vector<32x8xf32>, vector<8x8xf32> -> vector<8x8xf32>
    %c1_469 = arith.constant 1 : index
    %c3_470 = arith.constant 3 : index
    %c0_471 = arith.constant 0 : index
    %c0_472 = arith.constant 0 : index
    %715 = vector.load %arg9[%c1_469, %c3_470, %c0_471, %c0_472] : memref<3x4x1x8xf32, #tpu.memory_space<vmem>>, vector<1x1x1x8xf32>
    %716 = vector.shape_cast %715 : vector<1x1x1x8xf32> to vector<1x8xf32>
    %717 = vector.broadcast %716 : vector<1x8xf32> to vector<8x8xf32>
    %718 = arith.addf %714, %717 : vector<8x8xf32>
    %c2_473 = arith.constant 2 : index
    %c3_474 = arith.constant 3 : index
    %c0_475 = arith.constant 0 : index
    %c0_476 = arith.constant 0 : index
    %719 = vector.load %arg8[%c2_473, %c3_474, %c0_475, %c0_476] : memref<3x4x32x8xf32, #tpu.memory_space<vmem>>, vector<1x1x32x8xf32>
    %720 = vector.shape_cast %719 : vector<1x1x32x8xf32> to vector<32x8xf32>
    %cst_477 = arith.constant dense<0.000000e+00> : vector<8x8xf32>
    %721 = tpu.matmul %583, %720, %cst_477 {dimension_numbers = #tpu.dot_dimension_numbers<[1], [0], [0], [1], [0, 0, 1, 1], [], []>} : vector<8x32xf32>, vector<32x8xf32>, vector<8x8xf32> -> vector<8x8xf32>
    %c2_478 = arith.constant 2 : index
    %c3_479 = arith.constant 3 : index
    %c0_480 = arith.constant 0 : index
    %c0_481 = arith.constant 0 : index
    %722 = vector.load %arg9[%c2_478, %c3_479, %c0_480, %c0_481] : memref<3x4x1x8xf32, #tpu.memory_space<vmem>>, vector<1x1x1x8xf32>
    %723 = vector.shape_cast %722 : vector<1x1x1x8xf32> to vector<1x8xf32>
    %724 = vector.broadcast %723 : vector<1x8xf32> to vector<8x8xf32>
    %725 = arith.addf %721, %724 : vector<8x8xf32>
    "tpu.trace_start"() <{level = 10 : i32, message = "qd,kd->qk"}> : () -> ()
    %cst_482 = arith.constant dense<0.000000e+00> : vector<8x8xf32>
    %726 = tpu.matmul %711, %718, %cst_482 {dimension_numbers = #tpu.dot_dimension_numbers<[1], [1], [0], [0], [0, 0, 1, 0], [], []>} : vector<8x8xf32>, vector<8x8xf32>, vector<8x8xf32> -> vector<8x8xf32>
    "tpu.trace_stop"() : () -> ()
    %cst_483 = arith.constant 0.353553385 : f32
    %727 = vector.broadcast %cst_483 : f32 to vector<8x8xf32>
    %728 = arith.mulf %726, %727 : vector<8x8xf32>
    %729 = arith.addf %728, %25 : vector<8x8xf32>
    %cst_484 = arith.constant dense<0xFF800000> : vector<8xf32>
    %730 = vector.multi_reduction <maximumf>, %729, %cst_484 [1] : vector<8x8xf32> to vector<8xf32>
    %731 = vector.shape_cast %730 : vector<8xf32> to vector<8x1xf32>
    %732 = vector.broadcast %731 : vector<8x1xf32> to vector<8x8xf32>
    %733 = arith.subf %729, %732 : vector<8x8xf32>
    %734 = math.exp %733 : vector<8x8xf32>
    %cst_485 = arith.constant dense<0.000000e+00> : vector<8xf32>
    %735 = vector.multi_reduction <add>, %734, %cst_485 [1] : vector<8x8xf32> to vector<8xf32>
    %736 = vector.shape_cast %735 : vector<8xf32> to vector<8x1xf32>
    %737 = tpu.reciprocal %736 {approx = true} : vector<8x1xf32> -> vector<8x1xf32>
    %738 = vector.broadcast %737 : vector<8x1xf32> to vector<8x8xf32>
    %739 = arith.mulf %734, %738 : vector<8x8xf32>
    %cst_486 = arith.constant dense<0.000000e+00> : vector<8x8xf32>
    %740 = tpu.matmul %739, %725, %cst_486 {dimension_numbers = #tpu.dot_dimension_numbers<[1], [0], [0], [1], [0, 0, 1, 1], [], []>} : vector<8x8xf32>, vector<8x8xf32>, vector<8x8xf32> -> vector<8x8xf32>
    %c3_487 = arith.constant 3 : index
    %c0_488 = arith.constant 0 : index
    %c0_489 = arith.constant 0 : index
    %741 = vector.load %arg10[%c3_487, %c0_488, %c0_489] : memref<4x8x32xf32, #tpu.memory_space<vmem>>, vector<1x8x32xf32>
    %742 = vector.shape_cast %741 : vector<1x8x32xf32> to vector<8x32xf32>
    %cst_490 = arith.constant dense<0.000000e+00> : vector<8x32xf32>
    %743 = tpu.matmul %740, %742, %cst_490 {dimension_numbers = #tpu.dot_dimension_numbers<[1], [0], [0], [1], [0, 0, 1, 1], [], []>} : vector<8x8xf32>, vector<8x32xf32>, vector<8x32xf32> -> vector<8x32xf32>
    %744 = arith.addf %704, %743 : vector<8x32xf32>
    %c0_491 = arith.constant 0 : index
    %c0_492 = arith.constant 0 : index
    %745 = vector.load %arg11[%c0_491, %c0_492] : memref<1x32xf32, #tpu.memory_space<vmem>>, vector<1x32xf32>
    %746 = vector.broadcast %745 : vector<1x32xf32> to vector<8x32xf32>
    %747 = arith.addf %744, %746 : vector<8x32xf32>
    %748 = arith.addf %583, %747 : vector<8x32xf32>
    %c0_493 = arith.constant 0 : index
    %c0_494 = arith.constant 0 : index
    %749 = vector.load %arg12[%c0_493, %c0_494] : memref<1x32xf32, #tpu.memory_space<vmem>>, vector<1x32xf32>
    %c0_495 = arith.constant 0 : index
    %c0_496 = arith.constant 0 : index
    %750 = vector.load %arg13[%c0_495, %c0_496] : memref<1x32xf32, #tpu.memory_space<vmem>>, vector<1x32xf32>
    %cst_497 = arith.constant dense<0.000000e+00> : vector<8xf32>
    %751 = vector.multi_reduction <add>, %748, %cst_497 [1] : vector<8x32xf32> to vector<8xf32>
    %752 = vector.shape_cast %751 : vector<8xf32> to vector<8x1xf32>
    %cst_498 = arith.constant 3.200000e+01 : f32
    %753 = vector.broadcast %cst_498 : f32 to vector<8x1xf32>
    %754 = arith.divf %752, %753 : vector<8x1xf32>
    %755 = vector.broadcast %754 : vector<8x1xf32> to vector<8x32xf32>
    %756 = arith.subf %748, %755 : vector<8x32xf32>
    %757 = arith.mulf %756, %756 : vector<8x32xf32>
    %cst_499 = arith.constant dense<0.000000e+00> : vector<8xf32>
    %758 = vector.multi_reduction <add>, %757, %cst_499 [1] : vector<8x32xf32> to vector<8xf32>
    %759 = vector.shape_cast %758 : vector<8xf32> to vector<8x1xf32>
    %cst_500 = arith.constant 3.200000e+01 : f32
    %760 = vector.broadcast %cst_500 : f32 to vector<8x1xf32>
    %761 = arith.divf %759, %760 : vector<8x1xf32>
    %762 = vector.broadcast %754 : vector<8x1xf32> to vector<8x32xf32>
    %763 = arith.subf %748, %762 : vector<8x32xf32>
    %cst_501 = arith.constant 9.99999974E-6 : f32
    %764 = vector.broadcast %cst_501 : f32 to vector<8x1xf32>
    %765 = arith.addf %761, %764 : vector<8x1xf32>
    %766 = math.rsqrt %765 : vector<8x1xf32>
    %767 = vector.broadcast %766 : vector<8x1xf32> to vector<8x32xf32>
    %768 = arith.mulf %763, %767 : vector<8x32xf32>
    %769 = vector.broadcast %749 : vector<1x32xf32> to vector<8x32xf32>
    %770 = arith.mulf %768, %769 : vector<8x32xf32>
    %771 = vector.broadcast %750 : vector<1x32xf32> to vector<8x32xf32>
    %772 = arith.addf %770, %771 : vector<8x32xf32>
    %c0_502 = arith.constant 0 : index
    %c0_503 = arith.constant 0 : index
    %773 = vector.load %arg14[%c0_502, %c0_503] : memref<32x64xf32, #tpu.memory_space<vmem>>, vector<32x64xf32>
    %cst_504 = arith.constant dense<0.000000e+00> : vector<8x64xf32>
    %774 = tpu.matmul %772, %773, %cst_504 {dimension_numbers = #tpu.dot_dimension_numbers<[1], [0], [0], [1], [0, 0, 1, 1], [], []>} : vector<8x32xf32>, vector<32x64xf32>, vector<8x64xf32> -> vector<8x64xf32>
    %c0_505 = arith.constant 0 : index
    %c0_506 = arith.constant 0 : index
    %775 = vector.load %arg15[%c0_505, %c0_506] : memref<1x64xf32, #tpu.memory_space<vmem>>, vector<1x64xf32>
    %776 = vector.broadcast %775 : vector<1x64xf32> to vector<8x64xf32>
    %777 = arith.addf %774, %776 : vector<8x64xf32>
    %cst_507 = arith.constant 5.000000e-01 : f32
    %778 = vector.broadcast %cst_507 : f32 to vector<8x64xf32>
    %779 = arith.mulf %778, %777 : vector<8x64xf32>
    %cst_508 = arith.constant 0.707106769 : f32
    %780 = vector.broadcast %cst_508 : f32 to vector<8x64xf32>
    %781 = arith.mulf %777, %780 : vector<8x64xf32>
    %cst_509 = arith.constant 0.000000e+00 : f32
    %782 = vector.broadcast %cst_509 : f32 to vector<8x64xf32>
    %783 = arith.cmpf oge, %781, %782 : vector<8x64xf32>
    %cst_510 = arith.constant 1.000000e+00 : f32
    %cst_511 = arith.constant -1.000000e+00 : f32
    %784 = vector.broadcast %cst_510 : f32 to vector<8x64xf32>
    %785 = vector.broadcast %cst_511 : f32 to vector<8x64xf32>
    %786 = arith.select %783, %784, %785 : vector<8x64xi1>, vector<8x64xf32>
    %787 = math.absf %781 : vector<8x64xf32>
    %cst_512 = arith.constant 0.327591091 : f32
    %788 = vector.broadcast %cst_512 : f32 to vector<8x64xf32>
    %789 = arith.mulf %788, %787 : vector<8x64xf32>
    %cst_513 = arith.constant 1.000000e+00 : f32
    %790 = vector.broadcast %cst_513 : f32 to vector<8x64xf32>
    %791 = arith.addf %790, %789 : vector<8x64xf32>
    %cst_514 = arith.constant 1.000000e+00 : f32
    %792 = vector.broadcast %cst_514 : f32 to vector<8x64xf32>
    %793 = arith.divf %792, %791 : vector<8x64xf32>
    %cst_515 = arith.constant 1.06140542 : f32
    %794 = vector.broadcast %cst_515 : f32 to vector<8x64xf32>
    %795 = arith.mulf %794, %793 : vector<8x64xf32>
    %cst_516 = arith.constant -1.45315206 : f32
    %796 = vector.broadcast %cst_516 : f32 to vector<8x64xf32>
    %797 = arith.addf %795, %796 : vector<8x64xf32>
    %798 = arith.mulf %797, %793 : vector<8x64xf32>
    %cst_517 = arith.constant 1.42141378 : f32
    %799 = vector.broadcast %cst_517 : f32 to vector<8x64xf32>
    %800 = arith.addf %798, %799 : vector<8x64xf32>
    %801 = arith.mulf %800, %793 : vector<8x64xf32>
    %cst_518 = arith.constant -0.284496725 : f32
    %802 = vector.broadcast %cst_518 : f32 to vector<8x64xf32>
    %803 = arith.addf %801, %802 : vector<8x64xf32>
    %804 = arith.mulf %803, %793 : vector<8x64xf32>
    %cst_519 = arith.constant 0.254829586 : f32
    %805 = vector.broadcast %cst_519 : f32 to vector<8x64xf32>
    %806 = arith.addf %804, %805 : vector<8x64xf32>
    %807 = arith.mulf %806, %793 : vector<8x64xf32>
    %cst_520 = arith.constant 0.000000e+00 : f32
    %808 = vector.broadcast %cst_520 : f32 to vector<8x64xf32>
    %809 = arith.subf %808, %787 : vector<8x64xf32>
    %810 = arith.mulf %809, %787 : vector<8x64xf32>
    %811 = math.exp %810 : vector<8x64xf32>
    %812 = arith.mulf %807, %811 : vector<8x64xf32>
    %cst_521 = arith.constant 1.000000e+00 : f32
    %813 = vector.broadcast %cst_521 : f32 to vector<8x64xf32>
    %814 = arith.subf %813, %812 : vector<8x64xf32>
    %815 = arith.mulf %786, %814 : vector<8x64xf32>
    %cst_522 = arith.constant 1.000000e+00 : f32
    %816 = vector.broadcast %cst_522 : f32 to vector<8x64xf32>
    %817 = arith.addf %816, %815 : vector<8x64xf32>
    %818 = arith.mulf %779, %817 : vector<8x64xf32>
    %c0_523 = arith.constant 0 : index
    %c0_524 = arith.constant 0 : index
    %819 = vector.load %arg16[%c0_523, %c0_524] : memref<64x32xf32, #tpu.memory_space<vmem>>, vector<64x32xf32>
    %cst_525 = arith.constant dense<0.000000e+00> : vector<8x32xf32>
    %820 = tpu.matmul %818, %819, %cst_525 {dimension_numbers = #tpu.dot_dimension_numbers<[1], [0], [0], [1], [0, 0, 1, 1], [], []>} : vector<8x64xf32>, vector<64x32xf32>, vector<8x32xf32> -> vector<8x32xf32>
    %c0_526 = arith.constant 0 : index
    %c0_527 = arith.constant 0 : index
    %821 = vector.load %arg17[%c0_526, %c0_527] : memref<1x32xf32, #tpu.memory_space<vmem>>, vector<1x32xf32>
    %822 = vector.broadcast %821 : vector<1x32xf32> to vector<8x32xf32>
    %823 = arith.addf %820, %822 : vector<8x32xf32>
    %c0_528 = arith.constant 0 : index
    %c0_529 = arith.constant 0 : index
    %824 = vector.load %arg18[%c0_528, %c0_529] : memref<1x32xf32, #tpu.memory_space<vmem>>, vector<1x32xf32>
    %c0_530 = arith.constant 0 : index
    %c0_531 = arith.constant 0 : index
    %825 = vector.load %arg19[%c0_530, %c0_531] : memref<1x32xf32, #tpu.memory_space<vmem>>, vector<1x32xf32>
    %cst_532 = arith.constant dense<0.000000e+00> : vector<8xf32>
    %826 = vector.multi_reduction <add>, %823, %cst_532 [1] : vector<8x32xf32> to vector<8xf32>
    %827 = vector.shape_cast %826 : vector<8xf32> to vector<8x1xf32>
    %cst_533 = arith.constant 3.200000e+01 : f32
    %828 = vector.broadcast %cst_533 : f32 to vector<8x1xf32>
    %829 = arith.divf %827, %828 : vector<8x1xf32>
    %830 = vector.broadcast %829 : vector<8x1xf32> to vector<8x32xf32>
    %831 = arith.subf %823, %830 : vector<8x32xf32>
    %832 = arith.mulf %831, %831 : vector<8x32xf32>
    %cst_534 = arith.constant dense<0.000000e+00> : vector<8xf32>
    %833 = vector.multi_reduction <add>, %832, %cst_534 [1] : vector<8x32xf32> to vector<8xf32>
    %834 = vector.shape_cast %833 : vector<8xf32> to vector<8x1xf32>
    %cst_535 = arith.constant 3.200000e+01 : f32
    %835 = vector.broadcast %cst_535 : f32 to vector<8x1xf32>
    %836 = arith.divf %834, %835 : vector<8x1xf32>
    %837 = vector.broadcast %829 : vector<8x1xf32> to vector<8x32xf32>
    %838 = arith.subf %823, %837 : vector<8x32xf32>
    %cst_536 = arith.constant 9.99999974E-6 : f32
    %839 = vector.broadcast %cst_536 : f32 to vector<8x1xf32>
    %840 = arith.addf %836, %839 : vector<8x1xf32>
    %841 = math.rsqrt %840 : vector<8x1xf32>
    %842 = vector.broadcast %841 : vector<8x1xf32> to vector<8x32xf32>
    %843 = arith.mulf %838, %842 : vector<8x32xf32>
    %844 = vector.broadcast %824 : vector<1x32xf32> to vector<8x32xf32>
    %845 = arith.mulf %843, %844 : vector<8x32xf32>
    %846 = vector.broadcast %825 : vector<1x32xf32> to vector<8x32xf32>
    %847 = arith.addf %845, %846 : vector<8x32xf32>
    %c0_537 = arith.constant 0 : index
    %c0_538 = arith.constant 0 : index
    %848 = vector.load %arg20[%c0_537, %c0_538] : memref<32x128xf32, #tpu.memory_space<vmem>>, vector<32x128xf32>
    %cst_539 = arith.constant dense<0.000000e+00> : vector<8x128xf32>
    %849 = tpu.matmul %847, %848, %cst_539 {dimension_numbers = #tpu.dot_dimension_numbers<[1], [0], [0], [1], [0, 0, 1, 1], [], []>} : vector<8x32xf32>, vector<32x128xf32>, vector<8x128xf32> -> vector<8x128xf32>
    %c0_540 = arith.constant 0 : index
    %c0_541 = arith.constant 0 : index
    %850 = vector.load %arg21[%c0_540, %c0_541] : memref<1x128xf32, #tpu.memory_space<vmem>>, vector<1x128xf32>
    %851 = vector.broadcast %850 : vector<1x128xf32> to vector<8x128xf32>
    %852 = arith.addf %849, %851 : vector<8x128xf32>
    %c0_542 = arith.constant 0 : index
    %c0_543 = arith.constant 0 : index
    %c0_544 = arith.constant 0 : index
    %853 = vector.load %arg22[%c0_542, %c0_543, %c0_544] : memref<1x8x128xf32, #tpu.memory_space<vmem>>, vector<1x8x128xf32>
    %854 = vector.shape_cast %853 : vector<1x8x128xf32> to vector<8x128xf32>
    %855 = vector.shape_cast %852 : vector<8x128xf32> to vector<1x8x128xf32>
    tpu.vector_store %arg22[%c0_542, %c0_543, %c0_544], %855 {strides = array<i32>} : memref<1x8x128xf32, #tpu.memory_space<vmem>>, vector<1x8x128xf32>,
    return
  }
  func.func @transform_0(%arg0: i32) -> (i32, i32, i32) {
    %c0_i32 = arith.constant 0 : i32
    %c0_i32_0 = arith.constant 0 : i32
    %c0_i32_1 = arith.constant 0 : i32
    return %arg0, %c0_i32, %c0_i32_0 : i32, i32, i32
  }
  func.func @transform_1(%arg0: i32) -> (i32, i32, i32) {
    %c0_i32 = arith.constant 0 : i32
    %c0_i32_0 = arith.constant 0 : i32
    %c0_i32_1 = arith.constant 0 : i32
    return %arg0, %c0_i32, %c0_i32_0 : i32, i32, i32
  }
  func.func @transform_2(%arg0: i32) -> (i32, i32) {
    %c0_i32 = arith.constant 0 : i32
    %c0_i32_0 = arith.constant 0 : i32
    %c0_i32_1 = arith.constant 0 : i32
    return %c0_i32, %c0_i32_0 : i32, i32
  }
  func.func @transform_3(%arg0: i32) -> (i32, i32, i32, i32) {
    %c0_i32 = arith.constant 0 : i32
    %c0_i32_0 = arith.constant 0 : i32
    %c0_i32_1 = arith.constant 0 : i32
    %c0_i32_2 = arith.constant 0 : i32
    %c0_i32_3 = arith.constant 0 : i32
    return %c0_i32, %c0_i32_0, %c0_i32_1, %c0_i32_2 : i32, i32, i32, i32
  }
  func.func @transform_4(%arg0: i32) -> (i32, i32, i32, i32) {
    %c0_i32 = arith.constant 0 : i32
    %c0_i32_0 = arith.constant 0 : i32
    %c0_i32_1 = arith.constant 0 : i32
    %c0_i32_2 = arith.constant 0 : i32
    %c0_i32_3 = arith.constant 0 : i32
    return %c0_i32, %c0_i32_0, %c0_i32_1, %c0_i32_2 : i32, i32, i32, i32
  }
  func.func @transform_5(%arg0: i32) -> (i32, i32, i32, i32) {
    %c0_i32 = arith.constant 0 : i32
    %c0_i32_0 = arith.constant 0 : i32
    %c0_i32_1 = arith.constant 0 : i32
    %c0_i32_2 = arith.constant 0 : i32
    %c0_i32_3 = arith.constant 0 : i32
    return %c0_i32, %c0_i32_0, %c0_i32_1, %c0_i32_2 : i32, i32, i32, i32
  }
  func.func @transform_6(%arg0: i32) -> (i32, i32, i32, i32) {
    %c0_i32 = arith.constant 0 : i32
    %c0_i32_0 = arith.constant 0 : i32
    %c0_i32_1 = arith.constant 0 : i32
    %c0_i32_2 = arith.constant 0 : i32
    %c0_i32_3 = arith.constant 0 : i32
    return %c0_i32, %c0_i32_0, %c0_i32_1, %c0_i32_2 : i32, i32, i32, i32
  }
  func.func @transform_7(%arg0: i32) -> (i32, i32, i32, i32) {
    %c0_i32 = arith.constant 0 : i32
    %c0_i32_0 = arith.constant 0 : i32
    %c0_i32_1 = arith.constant 0 : i32
    %c0_i32_2 = arith.constant 0 : i32
    %c0_i32_3 = arith.constant 0 : i32
    return %c0_i32, %c0_i32_0, %c0_i32_1, %c0_i32_2 : i32, i32, i32, i32
  }
  func.func @transform_8(%arg0: i32) -> (i32, i32, i32, i32) {
    %c0_i32 = arith.constant 0 : i32
    %c0_i32_0 = arith.constant 0 : i32
    %c0_i32_1 = arith.constant 0 : i32
    %c0_i32_2 = arith.constant 0 : i32
    %c0_i32_3 = arith.constant 0 : i32
    return %c0_i32, %c0_i32_0, %c0_i32_1, %c0_i32_2 : i32, i32, i32, i32
  }
  func.func @transform_9(%arg0: i32) -> (i32, i32, i32) {
    %c0_i32 = arith.constant 0 : i32
    %c0_i32_0 = arith.constant 0 : i32
    %c0_i32_1 = arith.constant 0 : i32
    %c0_i32_2 = arith.constant 0 : i32
    return %c0_i32, %c0_i32_0, %c0_i32_1 : i32, i32, i32
  }
  func.func @transform_10(%arg0: i32) -> (i32, i32) {
    %c0_i32 = arith.constant 0 : i32
    %c0_i32_0 = arith.constant 0 : i32
    %c0_i32_1 = arith.constant 0 : i32
    return %c0_i32, %c0_i32_0 : i32, i32
  }
  func.func @transform_11(%arg0: i32) -> (i32, i32) {
    %c0_i32 = arith.constant 0 : i32
    %c0_i32_0 = arith.constant 0 : i32
    %c0_i32_1 = arith.constant 0 : i32
    return %c0_i32, %c0_i32_0 : i32, i32
  }
  func.func @transform_12(%arg0: i32) -> (i32, i32) {
    %c0_i32 = arith.constant 0 : i32
    %c0_i32_0 = arith.constant 0 : i32
    %c0_i32_1 = arith.constant 0 : i32
    return %c0_i32, %c0_i32_0 : i32, i32
  }
  func.func @transform_13(%arg0: i32) -> (i32, i32) {
    %c0_i32 = arith.constant 0 : i32
    %c0_i32_0 = arith.constant 0 : i32
    %c0_i32_1 = arith.constant 0 : i32
    return %c0_i32, %c0_i32_0 : i32, i32
  }
  func.func @transform_14(%arg0: i32) -> (i32, i32) {
    %c0_i32 = arith.constant 0 : i32
    %c0_i32_0 = arith.constant 0 : i32
    %c0_i32_1 = arith.constant 0 : i32
    return %c0_i32, %c0_i32_0 : i32, i32
  }
  func.func @transform_15(%arg0: i32) -> (i32, i32) {
    %c0_i32 = arith.constant 0 : i32
    %c0_i32_0 = arith.constant 0 : i32
    %c0_i32_1 = arith.constant 0 : i32
    return %c0_i32, %c0_i32_0 : i32, i32
  }
  func.func @transform_16(%arg0: i32) -> (i32, i32) {
    %c0_i32 = arith.constant 0 : i32
    %c0_i32_0 = arith.constant 0 : i32
    %c0_i32_1 = arith.constant 0 : i32
    return %c0_i32, %c0_i32_0 : i32, i32
  }
  func.func @transform_17(%arg0: i32) -> (i32, i32) {
    %c0_i32 = arith.constant 0 : i32
    %c0_i32_0 = arith.constant 0 : i32
    %c0_i32_1 = arith.constant 0 : i32
    return %c0_i32, %c0_i32_0 : i32, i32
  }
  func.func @transform_18(%arg0: i32) -> (i32, i32) {
    %c0_i32 = arith.constant 0 : i32
    %c0_i32_0 = arith.constant 0 : i32
    %c0_i32_1 = arith.constant 0 : i32
    return %c0_i32, %c0_i32_0 : i32, i32
  }
  func.func @transform_19(%arg0: i32) -> (i32, i32) {
    %c0_i32 = arith.constant 0 : i32
    %c0_i32_0 = arith.constant 0 : i32
    %c0_i32_1 = arith.constant 0 : i32
    return %c0_i32, %c0_i32_0 : i32, i32
  }
  func.func @transform_20(%arg0: i32) -> (i32, i32) {
    %c0_i32 = arith.constant 0 : i32
    %c0_i32_0 = arith.constant 0 : i32
    %c0_i32_1 = arith.constant 0 : i32
    return %c0_i32, %c0_i32_0 : i32, i32
  }
  func.func @transform_21(%arg0: i32) -> (i32, i32, i32) {
    %c0_i32 = arith.constant 0 : i32
    %c0_i32_0 = arith.constant 0 : i32
    %c0_i32_1 = arith.constant 0 : i32
    return %arg0, %c0_i32, %c0_i32_0 : i32, i32, i32
  }
}

</mosaic_0001>

<bundles_post_ra>
// kernel: _lambda_.1
= control target key start
LH: loop header
LB: loop body
LE: loop exit
PB: predicated region body
PF: predicated region fallthrough
CT: control target
= control target key end

     0   :  { %s11212_s0 = inlined_call_operand.vmem [shape: s32[2,1,8], index: 0, kind: input, shape index: {}]   ;;  %s11213_s1 = inlined_call_operand.vmem [shape: f32[2,8,32], index: 1, kind: input, shape index: {}]   ;;  %s11214_s2 = inlined_call_operand.vmem [shape: f32[8,32], index: 2, kind: input, shape index: {}]   ;;  %s11215_s3 = inlined_call_operand.hbm [shape: f32[2,3,32,32], index: 3, kind: input, shape index: {}]   ;;  %s11216_s4 = inlined_call_operand.vmem [shape: f32[2,3,32,32], index: 4, kind: input, shape index: {}]   ;;  %s11217_s5 = inlined_call_operand.vmem [shape: f32[2,3,1,32], index: 5, kind: input, shape index: {}]   ;;  %s11218_s6 = inlined_call_operand.vmem [shape: f32[2,3,1,32], index: 6, kind: input, shape index: {}]   ;;  %s11219_s7 = inlined_call_operand.hbm [shape: f32[3,4,32,8], index: 7, kind: input, shape index: {}]   ;;  %s11220_s8 = inlined_call_operand.vmem [shape: f32[3,4,1,8], index: 8, kind: input, shape index: {}]   ;;  %s11221_s9 = inlined_call_operand.hbm [shape: f32[4,8,32], index: 9, kind: input, shape index: {}]   ;;  %s11222_s10 = inlined_call_operand.vmem [shape: f32[1,32], index: 10, kind: input, shape index: {}, may-alias: {10,12,18}]   ;;  %s11223_s11 = inlined_call_operand.vmem [shape: f32[1,32], index: 11, kind: input, shape index: {}, may-alias: {11,17}]   ;;  %s11224_s12 = inlined_call_operand.vmem [shape: f32[1,32], index: 12, kind: input, shape index: {}, may-alias: {10,12,18}]   ;;  %s11225_s13 = inlined_call_operand.hbm [shape: f32[32,64], index: 13, kind: input, shape index: {}]   ;;  %s11226_s14 = inlined_call_operand.vmem [shape: f32[1,64], index: 14, kind: input, shape index: {}]   ;;  %s11227_s15 = inlined_call_operand.hbm [shape: f32[64,32], index: 15, kind: input, shape index: {}]   ;;  %s11228_s16 = inlined_call_operand.vmem [shape: f32[1,32], index: 16, kind: input, shape index: {}]   ;;  %s11229_s17 = inlined_call_operand.vmem [shape: f32[1,32], index: 17, kind: input, shape index: {}, may-alias: {11,17}]   ;;  %s11230_s18 = inlined_call_operand.vmem [shape: f32[1,32], index: 18, kind: input, shape index: {}, may-alias: {10,12,18}]   ;;  %s11231_s19 = inlined_call_operand.hbm [shape: f32[32,128], index: 19, kind: input, shape index: {}]   ;;  %s11232_s20 = inlined_call_operand.vmem [shape: f32[1,128], index: 20, kind: input, shape index: {}]   ;;  %s11233_s21 = inlined_call_operand.hbm [shape: f32[2,8,128], index: 21, kind: output, shape index: {}]  }
   0x1   :  { %11249 = sst [smem:[#allocation30_spill]] %s11212_s0 }
   0x2   :  { %11250 = sst [smem:[#allocation31_spill]] %s11213_s1 }
   0x3   :  { %11251 = sst [smem:[#allocation32_spill]] %s11214_s2 }
   0x4   :  { %11252 = sst [smem:[#allocation33_spill]] %s11215_s3 }
   0x5   :  { %11253 = sst [smem:[#allocation34_spill]] %s11216_s4 }
   0x6   :  { %11254 = sst [smem:[#allocation35_spill]] %s11217_s5 }
   0x7   :  { %11255 = sst [smem:[#allocation36_spill]] %s11219_s7 }
   0x8   :  { %11256 = sst [smem:[#allocation37_spill]] %s11225_s13 }
   0x9   :  { %11257 = sst [smem:[#allocation38_spill]] %s11229_s17 }
   0xa   :  { %11258 = sst [smem:[#allocation39_spill]] %s11230_s18 }
   0xb   :  { %11259 = sst [smem:[#allocation40_spill]] %s11232_s20 }
   0xc   :  { %11260 = sst [smem:[#allocation41_spill]] %s11233_s21 }
   0xd   :  { %26 = vsyncpa [#allocation7], 0 }
   0xe   :  { %27 = vsyncpa [#allocation10], 0 }
   0xf   :  { %28 = vsyncpa [#allocation13], 0 }
  0x10   :  { %29 = vsyncpa [#allocation16], 0 }
  0x11   :  { %30 = vsyncpa [#allocation8], 0 }
  0x12   :  { %32 = vsyncpa [#allocation8 + $0x1], 0  ;;  %s10081_s2 = smov 0   ;;  %s10083_s25 = smov 0  }
  0x13   :  { %s10085_s26 = smov 0   ;;  %s10087_s27 = smov 0  }
  0x14 LB: > { %11261 = sst [smem:[#allocation23_spill]] %s9942_s2  ;;  %s10102_s3 = sadd.s32 4294967295, %s9954_s27   ;;  %s9954_s27 = sphi %s10087_s27, %s11303_s27   ;;  %s9950_s26 = sphi %s10085_s26, %s11305_s26   ;;  %s9946_s25 = sphi %s10083_s25, %s11307_s25   ;;  %s9942_s2 = sphi %s10081_s2, %s11306_s2  }
  0x15   : > { %11262 = sst [smem:[#allocation24_spill]] %s9950_s26  ;;  %s7595_s28 = sadd.s32 4294967294, %s9954_s27  }
  0x16   : > { %11263 = sst [smem:[#allocation25_spill]] %s9954_s27  ;;  %s10106_s29 = sadd.s32 1, %s9954_s27  }
  0x17   : > { %11264 = sst [smem:[#allocation26_spill]] %s10106_s29  ;;  %s496_s0 = sadd.s32 1, %s9950_s26 }
  0x18   : > { %s493_s4 = ssub.s32 %s9954_s27, %s10106_s29  ;;  %p506_p0 = scmp.ne.s32.totalorder %s9950_s26, %s9946_s25 }
  0x19   : > { %p494_p1 = scmp.eq.s32.totalorder %s493_s4, 0  ;;  %p507_p2 = scmp.eq.s32.totalorder %s10102_s3, 1 }
  0x1a   : > { %p512_p3 = scmp.ne.s32.totalorder %s9946_s25, %s9942_s2  ;;  %p513_p4 = scmp.eq.s32.totalorder %s7595_s28, 1 }
  0x1b   : > { %s10117_s30 = scalar_select %p494_p1, %s9950_s26, %s496_s0  }
  0x1c   : > { %p10119_p5 = por %p507_p2, %p506_p0  ;;  %p10123_p6 = por %p513_p4, %p512_p3 }
  0x1d   : > { %11265 = sst [smem:[#allocation27_spill]] %s10117_s30  ;;  %p7596_p7 = scmp.ge.s32.totalorder %s9954_s27, 1 }
  0x1e   : > { %s11266_s5 = scalar_select %p10119_p5, 1, 0 }
  0x1f   : > { %s11268_s22 = scalar_select %p10123_p6, 1, 0 }
  0x20   : > { %11267 = sst [smem:[#allocation28_spill]] %s11266_s5  ;;  %p520_p8 = scmp.lt.s32.totalorder %s9954_s27, 3 }
  0x21   : > { %11269 = sst [smem:[#allocation29_spill]] %s11268_s22  ;;  %p11244_p9 = scmp.eq.s32.totalorder %s10102_s3, 0 }
  0x22   : > { %p10130_p10 = pnand %p7596_p7, %p520_p8  ;;  %s9956_s1 = smov [#allocation9]  }
  0x23   : > { %s557_s24 = sshll.u32 %s9956_s1, 4  ;;  %s9957_s0 = smov [#allocation12]   ;;  %s10136_s24 = int_to_ptr.vmem [resolvable:$true] %s557_s24 }
  0x24   : > { %s11270_s23 = scalar_select %p10130_p10, 1, 0 }
  0x25   : > { %p9442_p11 = pneg %p10130_p10  ;;  %s595_s4 = sshll.u32 %s9957_s0, 4  ;;  %s10144_s4 = int_to_ptr.vmem [resolvable:$true] %s595_s4 }
  0x26   : > { %s9958_s30 = smov [#allocation6]   ;;  %s11272_s7 = sld [smem:[#allocation36_spill]] }
  0x27   : > { %p10140_p12 = pnand %p11244_p9, %p9442_p11  ;;  %s10146_s26 = sshll.u32 %s9958_s30, 4  ;;  %s536_s26 = int_to_ptr.vmem [resolvable:$true] %s10146_s26 }
  0x29   : > { %p10156_p0 = pneg %p10140_p12 }
  0x2c   : > { %s9708_s2 = scalar_lea.hbm %s11272_s7, 6144 }
  0x2d   : > { %p9709_p13 = scmp.ne.s32.totalorder %s11272_s7, %s9708_s2  ;;  %p9715_p3 = scmp.lt.u32.totalorder %s9708_s2, %s11272_s7 }
  0x2f   : > { %p9711_p1 = pnand %p10156_p0, %p9709_p13 }
  0x31   : > { %p9712_p2 = pneg %p9711_p1 }
  0x33   : > { %p9717_p4 = pnand %p9715_p3, %p9712_p2 }
  0x35   : > { %9720 = shalt.err (!%p9717_p4)
}
  0x36   : > { %s9721_s27 = scalar_lea.vmem %s10136_s24, 6144  ;;  %p9729_p9 = scmp.lt.s32.totalorder %s10136_s24, %s10136_s24 }
  0x37   : > { %p9722_p7 = scmp.ne.s32.totalorder %s10136_s24, %s9721_s27  ;;  %p9730_p6 = scmp.lt.s32.totalorder %s9721_s27, %s9721_s27 }
  0x39   : > { %p9724_p8 = pnand %p9722_p7, %p10156_p0  ;;  %p9731_p13 = por %p9730_p6, %p9729_p9 }
  0x3b   : > { %p9725_p11 = pneg %p9724_p8 }
  0x3d   : > { %p9732_p1 = pnand %p9731_p13, %p9725_p11 }
  0x3f   : > { %9735 = shalt.err (!%p9732_p1)
}
  0x40   : > { %s9959_s29 = smov 128   ;;  %s9960_s2 = smov 8  }
  0x41   : > { %9448 = dma.hbm_to_vmem [thread:$0]  (!%p10140_p12), %s11272_s7, 6144, %s10136_s24, [#allocation10], %s9959_s29, %s9959_s29, %s9960_s2  }
  0x42   : > { %s11274_s13 = sld [smem:[#allocation37_spill]] }
  0x48   : > { %s9736_s27 = scalar_lea.hbm %s11274_s13, 512 }
  0x49   : > { %p9737_p6 = scmp.ne.s32.totalorder %s11274_s13, %s9736_s27  ;;  %p9743_p3 = scmp.lt.u32.totalorder %s9736_s27, %s11274_s13 }
  0x4b   : > { %p9739_p9 = pnand %p9737_p6, %p10156_p0 }
  0x4d   : > { %p9740_p2 = pneg %p9739_p9 }
  0x4f   : > { %p9745_p4 = pnand %p9743_p3, %p9740_p2 }
  0x51   : > { %9748 = shalt.err (!%p9745_p4)
}
  0x52   : > { %s9749_s24 = scalar_lea.vmem %s10144_s4, 512  ;;  %p9757_p13 = scmp.lt.s32.totalorder %s10144_s4, %s10144_s4 }
  0x53   : > { %p9750_p7 = scmp.ne.s32.totalorder %s10144_s4, %s9749_s24  ;;  %p9758_p1 = scmp.lt.s32.totalorder %s9749_s24, %s9749_s24 }
  0x55   : > { %p9752_p8 = pnand %p9750_p7, %p10156_p0  ;;  %p9759_p6 = por %p9758_p1, %p9757_p13 }
  0x57   : > { %p9753_p11 = pneg %p9752_p8 }
  0x59   : > { %p9760_p9 = pnand %p9759_p6, %p9753_p11 }
  0x5b   : > { %9763 = shalt.err (!%p9760_p9)
}
  0x5c   : > { %9454 = dma.hbm_to_vmem [thread:$0]  (!%p10140_p12), %s11274_s13, 512, %s10144_s4, [#allocation13], %s9959_s29, %s9959_s29, %s9960_s2  }
  0x5d   : > { %s11275_s22 = sld [smem:[#allocation33_spill]] }
  0x63   : > { %s9764_s1 = scalar_lea.hbm %s11275_s22, 3072 }
  0x64   : > { %p9765_p2 = scmp.ne.s32.totalorder %s11275_s22, %s9764_s1  ;;  %p9771_p7 = scmp.lt.u32.totalorder %s9764_s1, %s11275_s22 }
  0x66   : > { %p9767_p3 = pnand %p9765_p2, %p10156_p0 }
  0x68   : > { %p9768_p4 = pneg %p9767_p3 }
  0x6a   : > { %p9773_p8 = pnand %p9771_p7, %p9768_p4 }
  0x6c   : > { %9776 = shalt.err (!%p9773_p8)
}
  0x6d   : > { %s9777_s17 = scalar_lea.vmem %s536_s26, 3072  ;;  %p9785_p6 = scmp.lt.s32.totalorder %s536_s26, %s536_s26 }
  0x6e   : > { %p9778_p11 = scmp.ne.s32.totalorder %s536_s26, %s9777_s17  ;;  %p9786_p9 = scmp.lt.s32.totalorder %s9777_s17, %s9777_s17 }
  0x70   : > { %p9780_p13 = pnand %p9778_p11, %p10156_p0  ;;  %p9787_p5 = por %p9786_p9, %p9785_p6 }
  0x72   : > { %p9781_p1 = pneg %p9780_p13 }
  0x74   : > { %p9788_p10 = pnand %p9787_p5, %p9781_p1 }
  0x76   : > { %9791 = shalt.err (!%p9788_p10)
}
  0x77   : > { %9445 = dma.hbm_to_vmem [thread:$0]  (!%p10140_p12), %s11275_s22, 3072, %s536_s26, [#allocation7], %s9959_s29, %s9959_s29, %s9960_s2  }
  0x78   : > { %s9961_s20 = smov [#allocation11]   ;;  %s9962_s1 = smov [#allocation14]  }
  0x79   : > { %s573_s5 = sshll.u32 %s9961_s20, 4  ;;  %s611_s0 = sshll.u32 %s9962_s1, 4  ;;  %s574_s5 = int_to_ptr.vmem [resolvable:$true] %s573_s5  ;;  %s612_s0 = int_to_ptr.vmem [resolvable:$true] %s611_s0 }
  0x7a   : > { %s9792_s24 = scalar_lea.hbm %s11221_s9, 512 }
  0x7b   : > { %p9793_p5 = scmp.ne.s32.totalorder %s11221_s9, %s9792_s24  ;;  %p9799_p3 = scmp.lt.u32.totalorder %s9792_s24, %s11221_s9 }
  0x7d   : > { %p9795_p10 = pnand %p9793_p5, %p10156_p0 }
  0x7f   : > { %p9796_p2 = pneg %p9795_p10 }
  0x81   : > { %p9801_p4 = pnand %p9799_p3, %p9796_p2 }
  0x83   : > { %9804 = shalt.err (!%p9801_p4)
}
  0x84   : > { %s9805_s26 = scalar_lea.vmem %s574_s5, 512  ;;  %p9813_p13 = scmp.lt.s32.totalorder %s574_s5, %s574_s5 }
  0x85   : > { %p9806_p7 = scmp.ne.s32.totalorder %s574_s5, %s9805_s26  ;;  %p9814_p1 = scmp.lt.s32.totalorder %s9805_s26, %s9805_s26 }
  0x87   : > { %p9808_p8 = pnand %p9806_p7, %p10156_p0  ;;  %p9815_p6 = por %p9814_p1, %p9813_p13 }
  0x89   : > { %p9809_p11 = pneg %p9808_p8 }
  0x8b   : > { %p9816_p9 = pnand %p9815_p6, %p9809_p11 }
  0x8d   : > { %9819 = shalt.err (!%p9816_p9)
}
  0x8e   : > { %9451 = dma.hbm_to_vmem [thread:$0]  (!%p10140_p12), %s11221_s9, 512, %s574_s5, [#allocation10], %s9959_s29, %s9959_s29, %s9960_s2  }
  0x8f   : > { %s9820_s1 = scalar_lea.hbm %s11227_s15, 1024 }
  0x90   : > { %p9821_p5 = scmp.ne.s32.totalorder %s11227_s15, %s9820_s1  ;;  %p9827_p3 = scmp.lt.u32.totalorder %s9820_s1, %s11227_s15 }
  0x92   : > { %p9823_p10 = pnand %p9821_p5, %p10156_p0 }
  0x94   : > { %p9824_p2 = pneg %p9823_p10 }
  0x96   : > { %p9829_p4 = pnand %p9827_p3, %p9824_p2 }
  0x98   : > { %9832 = shalt.err (!%p9829_p4)
}
  0x99   : > { %s9833_s4 = scalar_lea.vmem %s612_s0, 1024  ;;  %p9841_p13 = scmp.lt.s32.totalorder %s612_s0, %s612_s0 }
  0x9a   : > { %p9834_p7 = scmp.ne.s32.totalorder %s612_s0, %s9833_s4  ;;  %p9842_p1 = scmp.lt.s32.totalorder %s9833_s4, %s9833_s4 }
  0x9c   : > { %p9836_p8 = pnand %p9834_p7, %p10156_p0  ;;  %p9843_p6 = por %p9842_p1, %p9841_p13 }
  0x9e   : > { %p9837_p11 = pneg %p9836_p8 }
  0xa0   : > { %p9844_p9 = pnand %p9843_p6, %p9837_p11 }
  0xa2   : > { %9847 = shalt.err (!%p9844_p9)
}
  0xa3   : > { %9457 = dma.hbm_to_vmem [thread:$0]  (!%p10140_p12), %s11227_s15, 1024, %s612_s0, [#allocation13], %s9959_s29, %s9959_s29, %s9960_s2  }
  0xa4   : > { %s9963_s7 = smov [#allocation15]   ;;  %s9848_s1 = scalar_lea.hbm %s11231_s19, 512 }
  0xa5   : > { %s633_s13 = sshll.u32 %s9963_s7, 4  ;;  %p9849_p5 = scmp.ne.s32.totalorder %s11231_s19, %s9848_s1  ;;  %s634_s13 = int_to_ptr.vmem [resolvable:$true] %s633_s13 }
  0xa6   : > { %p9855_p3 = scmp.lt.u32.totalorder %s9848_s1, %s11231_s19 }
  0xa7   : > { %p9851_p10 = pnand %p9849_p5, %p10156_p0 }
  0xa9   : > { %p9852_p2 = pneg %p9851_p10 }
  0xab   : > { %p9857_p4 = pnand %p9855_p3, %p9852_p2 }
  0xad   : > { %9860 = shalt.err (!%p9857_p4)
}
  0xae   : > { %s9861_s0 = scalar_lea.vmem %s634_s13, 512  ;;  %p9869_p13 = scmp.lt.s32.totalorder %s634_s13, %s634_s13 }
  0xaf   : > { %p9862_p7 = scmp.ne.s32.totalorder %s634_s13, %s9861_s0  ;;  %p9870_p1 = scmp.lt.s32.totalorder %s9861_s0, %s9861_s0 }
  0xb1   : > { %p9864_p8 = pnand %p9862_p7, %p10156_p0  ;;  %p9871_p6 = por %p9870_p1, %p9869_p13 }
  0xb3   : > { %p9865_p11 = pneg %p9864_p8 }
  0xb5   : > { %p9872_p9 = pnand %p9871_p6, %p9865_p11 }
  0xb7   : > { %9875 = shalt.err (!%p9872_p9)
}
  0xb8   : > { %9460 = dma.hbm_to_vmem [thread:$0]  (!%p10140_p12), %s11231_s19, 512, %s634_s13, [#allocation16], %s9959_s29, %s9959_s29, %s9960_s2  }
  0xb9   : > { %p11276_p5 = scmp.ne.s32.totalorder %s11270_s23, 0 }
  0xba   : > { %p11277_p0 = scmp.eq.s32.totalorder (!%p11276_p5), %s10102_s3, 0 }
  0xbb   : > { %665 = sbr.rel (%p11276_p5) target bundleno = 9617 (0x2591), region = 104 }
  0xc2   : > { %9921 = dma.done.wait (%p11277_p0), [#allocation7], 3072   ;;  %p11278_p10 = pmov %p11277_p0 }
  0xc3   : > { %p11279_p2 = pmov %p11277_p0 }
  0xc4   : > { %9923 = vsyncadd (%p11278_p10), [#allocation7], 4294964224 }
  0xc5   : > { %9925 = dma.done.wait (%p11279_p2), [#allocation10], 6656   ;;  %p11280_p3 = pmov %p11277_p0 }
  0xc6   : > { %p11281_p4 = pmov %p11277_p0 }
  0xc7   : > { %9927 = vsyncadd (%p11280_p3), [#allocation10], 4294960640 }
  0xc8   : > { %9929 = dma.done.wait (%p11281_p4), [#allocation13], 1536   ;;  %p11282_p12 = pmov %p11277_p0 }
  0xc9   : > { %p11283_p7 = pmov %p11277_p0 }
  0xca   : > { %9931 = vsyncadd (%p11282_p12), [#allocation13], 4294965760 }
  0xcb   : > { %9933 = dma.done.wait (%p11283_p7), [#allocation16], 512   ;;  %p11284_p8 = pmov %p11277_p0 }
  0xcc   : > { %p747_p11 = scmp.lt.s32.totalorder %s10102_s3, 1  ;;  %v9964_v0 = vmov 0.0|0.0   ;;  %vm9965_vm0 = vmmov 0   ;;  %v9966_v1 = vmov 0.0   ;;  %v795_v2 = vld [vmem:[#allocation6] sm:$0xff]  ;;  %v796_v3 = vld [vmem:[#allocation6 + $0x8] sm:$0xff] }
  0xcd   : > { %9935 = vsyncadd (%p11284_p8), [#allocation16], 4294966784  ;;  %8996 = vmatprep.subr.bf16.mxu0 %v9964_v0  ;;  %9002 = vmatprep.subr.bf16.mxu1 %v9964_v0  ;;  %v882_v4 = vld [vmem:[#allocation6 + $0x20] sm:$0xff]  ;;  %s11285_s2 = sld [smem:[#allocation31_spill]]  ;;  %v8997_v5 = vpack.c.bf16 %v796_v3, %v795_v2  ;;  %v883_v6 = vld [vmem:[#allocation6 + $0x28] sm:$0xff]  ;;  %s11286_s18 = sld [smem:[#allocation32_spill]] }
  0xce   : > { %8177 = vmatprep.mubr.msk.f32.mxu0 %vm9965_vm0, %v9966_v1  ;;  %8188 = vmatprep.mubr.msk.f32.mxu1 %vm9965_vm0, %v9966_v1  ;;  %s10317_s21 = scalar_select %p747_p11, %s10102_s3, 1  ;;  %v797_v7 = vld [vmem:[#allocation6 + $0x10] sm:$0xff]  ;;  %v798_v8 = vld [vmem:[#allocation6 + $0x18] sm:$0xff]  ;;  %v9003_v9 = vpack.c.bf16 %v883_v6, %v882_v4  ;;  %v966_v16 = vld [vmem:[#allocation6 + $0x40] sm:$0xff]  ;;  %vm806_vm1 = vcmask 261120   ;;  %vm1305_vm2 = vcmask 253952  }
  0xcf   : > { %v884_v10 = vld [vmem:[#allocation6 + $0x30] sm:$0xff]  ;;  %v885_v11 = vld [vmem:[#allocation6 + $0x38] sm:$0xff]  ;;  %8998 = vmatpush3.bf16.msra.mxu0 %v8997_v5  ;;  %v9000_v12 = vpack.c.bf16 %v798_v8, %v797_v7  ;;  %v967_v17 = vld [vmem:[#allocation6 + $0x48] sm:$0xff]  ;;  %s11287_s30 = sld [smem:[#allocation34_spill]]  ;;  %s11288_s29 = sld [smem:[#allocation35_spill]]  ;;  %vm760_vm3 = vcmask 57344  }
  0xd0   : > { %s7612_s23 = sshll.u32 %s10317_s21, 3  ;;  %9004 = vmatpush3.bf16.msra.mxu1 %v9003_v9  ;;  %8999 = vmatprep.subr.bf16.mxu0 %v9964_v0  ;;  %v9006_v15 = vpack.c.bf16 %v885_v11, %v884_v10  ;;  %v9009_v21 = vpack.c.bf16 %v967_v17, %v966_v16  ;;  %v968_v23 = vld [vmem:[#allocation6 + $0x50] sm:$0xff]  ;;  %v969_v24 = vld [vmem:[#allocation6 + $0x58] sm:$0xff]  ;;  %v10432_v50 = vld [vmem:[%s11218_s6] sm:$0x1]  ;;  %s11289_s13 = sld [smem:[#allocation30_spill]] }
  0xd1   : > { %9005 = vmatprep.subr.bf16.mxu1 %v9964_v0  ;;  %v9012_v27 = vpack.c.bf16 %v969_v24, %v968_v23  ;;  %v10439_v60 = vld [vmem:[%s11218_s6 + $0x1] sm:$0x1]  ;;  %v10445_v10 = vld [vmem:[%s11218_s6 + $0x2] sm:$0x1]  ;;  %vm5403_vm10 = vcmask 64512   ;;  %vm7265_vm12 = vcmask 523264  }
  0xd2   : > { %s11292_s24 = sld [smem:[#allocation38_spill]]  ;;  %s11293_s4 = sld [smem:[#allocation39_spill]] }
  0xd3   : > { %s753_s26 = scalar_lea.vmem %s11285_s2, %s7612_s23  ;;  %v755_v14 = vld [vmem:[%s11286_s18] sm:$0xff]  ;;  %9001 = vmatpush3.bf16.msra.mxu0 %v9000_v12  ;;  %s11294_s5 = sld [smem:[#allocation28_spill]] }
  0xd4   : > { %v754_v13 = vld [vmem:[%s753_s26] sm:$0xff]  ;;  %9007 = vmatpush3.bf16.msra.mxu1 %v9006_v15  ;;  %9008 = vmatprep.subr.bf16.mxu0 %v9964_v0  ;;  %s744_s23 = sand.u32 1, %s9946_s25   ;;  %s11295_s7 = sld [smem:[#allocation40_spill]] }
  0xd5   : > { %v1049_v18 = vld [vmem:[%s11287_s30] sm:$0xff]  ;;  %v1050_v19 = vld [vmem:[%s11287_s30 + $0x8] sm:$0xff]  ;;  %v756_v20 = vadd.f32 %v755_v14, %v754_v13  ;;  %9014 = vmatprep.subr.bf16.mxu1 %v9964_v0  ;;  %v1051_v25 = vld [vmem:[%s11287_s30 + $0x10] sm:$0xff]  ;;  %s7611_s28 = sshll.u32 %s744_s23, 3  ;;  %s11296_s27 = sld [smem:[#allocation41_spill]] }
  0xd6   : > { %v10335_v22 = vpack.c.bf16 %v1050_v19, %v1049_v18  ;;  %v1052_v26 = vld [vmem:[%s11287_s30 + $0x18] sm:$0xff]  ;;  %v7622_v29 = vld [vmem:[%s11287_s30 + $0x20] sm:$0xff]  ;;  %v7623_v30 = vld [vmem:[%s11287_s30 + $0x28] sm:$0xff]  ;;  %s749_s18 = scalar_lea.vmem %s11289_s13, %s10317_s21  ;;  %s7793_s13 = sshll.u32 %s10102_s3, 7 }
  0xd7   : > { %8178 = vmatmul.mubr.msk.f32.vlgmr.msra.gmra.mrb[0].mxu0 %vm806_vm1, %v756_v20  ;;  %8189 = vmatmul.mubr.msk.f32.vlgmr.msra.gmra.mrb[0].mxu1 %vm806_vm1, %v756_v20  ;;  %v10348_v28 = vpack.c.bf16 %v1052_v26, %v1051_v25  ;;  %v7626_v31 = vld [vmem:[%s11287_s30 + $0x40] sm:$0xff]  ;;  %v7627_v32 = vld [vmem:[%s11287_s30 + $0x48] sm:$0xff]  ;;  %v10367_v33 = vpack.c.bf16 %v7623_v30, %v7622_v29  ;;  %v7624_v34 = vld [vmem:[%s11287_s30 + $0x30] sm:$0xff]  ;;  %s7454_s0 = scalar_lea.sflag [#allocation8], %s744_s23  ;;  %s9970_s3 = smov [#allocation17]  }
  0xd8   : > { %9010 = vmatpush3.bf16.msra.mxu0 %v9009_v21  ;;  %9016 = vmatpush3.bf16.msra.mxu1 %v10335_v22  ;;  %v7625_v35 = vld [vmem:[%s11287_s30 + $0x38] sm:$0xff]  ;;  %v10378_v36 = vpack.c.bf16 %v7627_v32, %v7626_v31  ;;  %v7628_v37 = vld [vmem:[%s11287_s30 + $0x50] sm:$0xff]  ;;  %v7614_v41 = vld [vmem:[%s11288_s29] ss:$0 sm:$0xff] }
  0xd9   : > { %9011 = vmatprep.subr.bf16.mxu0 %v9964_v0  ;;  %9017 = vmatprep.subr.bf16.mxu1 %v9964_v0  ;;  %v7629_v38 = vld [vmem:[%s11287_s30 + $0x58] sm:$0xff]  ;;  %v10389_v39 = vpack.c.bf16 %v7625_v35, %v7624_v34  ;;  %v7617_v42 = vld [vmem:[%s11288_s29 + $0x1] ss:$0 sm:$0xff]  ;;  %v7620_v49 = vld [vmem:[%s11288_s29 + $0x2] ss:$0 sm:$0xff]  ;;  %p11298_p1 = scmp.ne.s32.totalorder %s11294_s5, 0 }
  0xda   : > { %8210 = vmatprep.mubr.msk.f32.mxu1 %vm9965_vm0, %v9966_v1  ;;  %8199 = vmatprep.mubr.msk.f32.mxu0 %vm9965_vm0, %v9966_v1  ;;  %v10395_v40 = vpack.c.bf16 %v7629_v38, %v7628_v37 }
  0xdb   : > { %s11170_s17 = scalar_lea.hbm %s11296_s27, %s7793_s13 }
  0xdc   : > { %9013 = vmatpush3.bf16.msra.mxu0 %v9012_v27  ;;  %9019 = vmatpush3.bf16.msra.mxu1 %v10348_v28 }
  0xdd   : > { %9020 = vmatprep.subr.bf16.mxu0 %v9964_v0  ;;  %9026 = vmatprep.subr.bf16.mxu1 %v9964_v0 }
  0xdf   : > { %8200 = vmatmul.mubr.msk.f32.vlgmr.msra.gmra.mrb[2].mxu0 %vm806_vm1, %v756_v20  ;;  %8211 = vmatmul.mubr.f32.vlgmr.msra.gmra.mrb[2].mxu1 %v9966_v1 }
  0xe0   : > { %9022 = vmatpush3.bf16.msra.mxu0 %v10367_v33  ;;  %8221 = vmatprep.mubr.msk.f32.mxu0 %vm9965_vm0, %v9966_v1 }
  0xe1   : > { %9023 = vmatprep.subr.bf16.mxu0 %v9964_v0  ;;  %9028 = vmatpush3.bf16.msra.mxu1 %v10378_v36 }
  0xe2   : > { %8232 = vmatprep.mubr.msk.f32.mxu1 %vm9965_vm0, %v9966_v1  ;;  %9029 = vmatprep.subr.bf16.mxu1 %v9964_v0 }
  0xe4   : > { %9025 = vmatpush3.bf16.msra.mxu0 %v10389_v39 }
  0xe5   : > { %9032 = vmatprep.subr.bf16.mxu0 %v9964_v0  ;;  %9031 = vmatpush3.bf16.msra.mxu1 %v10395_v40 }
  0xe6   : > { %9038 = vmatprep.subr.bf16.mxu1 %v9964_v0 }
  0xe7   : > { %8222 = vmatmul.mubr.f32.vlgmr.msra.gmra.mrb[4].mxu0 %v9966_v1 }
  0xe8   : > { %9034 = vmatpush3.bf16.msra.mxu0 %v10335_v22  ;;  %8243 = vmatprep.mubr.msk.f32.mxu0 %vm9965_vm0, %v9966_v1 }
  0xe9   : > { %8233 = vmatmul.mubr.f32.vlgmr.msra.gmra.mrb[4].mxu1 %v9966_v1  ;;  %9035 = vmatprep.subr.bf16.mxu0 %v9964_v0 }
  0xea   : > { %9040 = vmatpush3.bf16.msra.mxu1 %v10367_v33  ;;  %8254 = vmatprep.mubr.msk.f32.mxu1 %vm9965_vm0, %v9966_v1 }
  0xeb   : > { %9041 = vmatprep.subr.bf16.mxu1 %v9964_v0 }
  0xec   : > { %9037 = vmatpush3.bf16.msra.mxu0 %v10348_v28 }
  0xed   : > { %9044 = vmatprep.subr.bf16.mxu0 %v9964_v0 }
  0xee   : > { %9043 = vmatpush3.bf16.msra.mxu1 %v10389_v39 }
  0xef   : > { %9050 = vmatprep.subr.bf16.mxu1 %v9964_v0 }
 0x1aa   : > { %v876_v43 = vpop.f32.mrb[0].mxu0  ;;  %v960_v45 = vpop.f32.mrb[0].mxu1 }
 0x1ab   : > { %v877_v44 = vadd.f32 %v7614_v41, %v876_v43  ;;  %v8179_v46 = vpop.f32.mrb[1].mxu0  ;;  %v961_v47 = vadd.f32 %v7617_v42, %v960_v45  ;;  %v8190_v48 = vpop.f32.mrb[1].mxu1 }
 0x1ad   : > { %880 = vst.msk [vmem:[#allocation2] sm:$0xff] %vm806_vm1, %v877_v44  ;;  %964 = vst.msk [vmem:[#allocation3] sm:$0xff] %vm806_vm1, %v961_v47 }
 0x1b2   : > { %v1044_v51 = vpop.f32.mrb[2].mxu0  ;;  %v1137_v52 = vpop.f32.mrb[2].mxu1 }
 0x1b3   : > { %v1045_v53 = vadd.f32 %v7620_v49, %v1044_v51  ;;  %v8201_v54 = vpop.f32.mrb[3].mxu0  ;;  %v1138_v55 = vadd.f32 %v1137_v52, %v10432_v50  ;;  %v8212_v57 = vpop.f32.mrb[3].mxu1 }
 0x1b4   : > { %v1281_v56 = vld [vmem:[#allocation2] sm:$0x1]  ;;  %v1289_v2 = vld [vmem:[#allocation3] sm:$0x1]  ;;  %v1520_v30 = vld [vmem:[#allocation2 + $0x1] sm:$0x1] }
 0x1b5   : > { %1048 = vst.msk [vmem:[#allocation4] sm:$0xff] %vm806_vm1, %v1045_v53  ;;  %v1282_v58 = vadd.f32 %v1281_v56, %v1138_v55  ;;  %v1528_v35 = vld [vmem:[#allocation3 + $0x1] sm:$0x1] }
 0x1b7   : > { %v7632_v59 = vmul.f32 -1.442695, %v1282_v58 }
 0x1b9   : > { %9524 = vpow2.f32 %v7632_v59 }
 0x1ba   : > { %v1207_v61 = vpop.f32.mrb[4].mxu0 }
 0x1bb   : > { %v1208_v62 = vadd.f32 %v10439_v60, %v1207_v61  ;;  %v8223_v63 = vpop.f32.mrb[5].mxu0 }
 0x1bc   : > { %v1277_v3 = vpop.f32.mrb[4].mxu1  ;;  %v1297_v15 = vld [vmem:[#allocation4] sm:$0x1]  ;;  %v1536_v51 = vld [vmem:[#allocation4 + $0x1] sm:$0x1] }
 0x1bd   : > { %v1290_v4 = vadd.f32 %v1289_v2, %v1208_v62  ;;  %v8234_v5 = vpop.f32.mrb[5].mxu1  ;;  %v1278_v12 = vadd.f32 %v10445_v10, %v1277_v3  ;;  %v1758_v3 = vld [vmem:[#allocation2 + $0x2] sm:$0x1] }
 0x1bf   : > { %v7633_v6 = vmul.f32 -1.442695, %v1290_v4 }
 0x1c1   : > { %9526 = vpow2.f32 %v7633_v6 }
 0x1c3   : > { %v9525_v7 = vpop.eup %9524 }
 0x1c4   : > { %v1286_v8 = vadd.f32 1.0, %v9525_v7  ;;  %v1766_v7 = vld [vmem:[#allocation3 + $0x2] sm:$0x1] }
 0x1c6   : > { %9528 = vrcp.f32 %v1286_v8 }
 0x1cb   : > { %v9527_v9 = vpop.eup %9526 }
 0x1cc   : > { %v1294_v11 = vadd.f32 1.0, %v9527_v9 }
 0x1ce   : > { %9530 = vrcp.f32 %v1294_v11 }
 0x1d0   : > { %v9529_v13 = vpop.eup %9528 }
 0x1d1   : > { %v1298_v14 = vmul.f32 %v9529_v13, %v1278_v12 }
 0x1d3   : > { %v1299_v16 = vadd.f32 %v1298_v14, %v1297_v15 }
 0x1d5   : > { %9532 = vtanh.f32 %v1299_v16 }
 0x1d8   : > { %v9531_v17 = vpop.eup %9530 }
 0x1d9   : > { %v1301_v18 = vsub.f32 1.0, %v9531_v17  ;;  %v1303_v21 = vmul.f32 0.0, %v9531_v17 }
 0x1df   : > { %v9533_v19 = vpop.eup %9532 }
 0x1e0   : > { %v1302_v20 = vmul.f32 %v9533_v19, %v1301_v18 }
 0x1e2   : > { %v1304_v23 = vadd.f32 %v1303_v21, %v1302_v20  ;;  %v1774_v20 = vld [vmem:[#allocation4 + $0x2] sm:$0x1] }
 0x1e4   : > { %1306 = vst.msk [vmem:[#allocation5] sm:$0x1] %vm1305_vm2, %v1304_v23  ;;  %8244 = vmatmul.mubr.msk.f32.vlgmr.msra.gmra.mrb[6].mxu0 %vm806_vm1, %v1304_v23  ;;  %8255 = vmatmul.mubr.msk.f32.vlgmr.msra.gmra.mrb[6].mxu1 %vm806_vm1, %v1304_v23 }
 0x1e5   : > { %9046 = vmatpush3.bf16.msra.mxu0 %v10378_v36  ;;  %8265 = vmatprep.mubr.msk.f32.mxu0 %vm9965_vm0, %v9966_v1 }
 0x1e6   : > { %9047 = vmatprep.subr.bf16.mxu0 %v9964_v0  ;;  %9052 = vmatpush3.bf16.msra.mxu1 %v10335_v22 }
 0x1e7   : > { %9053 = vmatprep.subr.bf16.mxu1 %v9964_v0  ;;  %8276 = vmatprep.mubr.msk.f32.mxu1 %vm9965_vm0, %v9966_v1 }
 0x1e9   : > { %9049 = vmatpush3.bf16.msra.mxu0 %v10395_v40 }
 0x1ea   : > { %9056 = vmatprep.subr.bf16.mxu0 %v9964_v0  ;;  %9055 = vmatpush3.bf16.msra.mxu1 %v10348_v28 }
 0x1eb   : > { %9062 = vmatprep.subr.bf16.mxu1 %v9964_v0 }
 0x1ec   : > { %8266 = vmatmul.mubr.msk.f32.vlgmr.msra.gmra.mrb[8].mxu0 %vm806_vm1, %v1304_v23 }
 0x1ed   : > { %9058 = vmatpush3.bf16.msra.mxu0 %v10367_v33  ;;  %8287 = vmatprep.mubr.msk.f32.mxu0 %vm9965_vm0, %v9966_v1 }
 0x1ee   : > { %9059 = vmatprep.subr.bf16.mxu0 %v9964_v0 }
 0x1f1   : > { %9061 = vmatpush3.bf16.msra.mxu0 %v10389_v39 }
 0x1f2   : > { %9068 = vmatprep.subr.bf16.mxu0 %v9964_v0 }
 0x2b7   : > { %v1376_v24 = vpop.f32.mrb[6].mxu0  ;;  %v1446_v25 = vpop.f32.mrb[6].mxu1 }
 0x2b8   : > { %v1377_v26 = vadd.f32 %v1376_v24, %v10432_v50  ;;  %v8245_v27 = vpop.f32.mrb[7].mxu0  ;;  %v8256_v29 = vpop.f32.mrb[7].mxu1  ;;  %v1447_v31 = vadd.f32 %v10439_v60, %v1446_v25 }
 0x2ba   : > { %v1521_v32 = vadd.f32 %v1520_v30, %v1377_v26  ;;  %v1529_v37 = vadd.f32 %v1528_v35, %v1447_v31 }
 0x2bc   : > { %v7637_v34 = vmul.f32 -1.442695, %v1521_v32  ;;  %v7638_v42 = vmul.f32 -1.442695, %v1529_v37  ;;  %v1996_v37 = vld [vmem:[#allocation2 + $0x3] sm:$0x1] }
 0x2be   : > { %9534 = vpow2.f32 %v7637_v34 }
 0x2bf   : > { %v1516_v38 = vpop.f32.mrb[8].mxu0  ;;  %9536 = vpow2.f32 %v7638_v42 }
 0x2c0   : > { %v8267_v41 = vpop.f32.mrb[9].mxu0  ;;  %v1517_v47 = vadd.f32 %v10445_v10, %v1516_v38 }
 0x2c8   : > { %v9535_v43 = vpop.eup %9534 }
 0x2c9   : > { %v1525_v44 = vadd.f32 1.0, %v9535_v43  ;;  %v9537_v45 = vpop.eup %9536  ;;  %v2004_v43 = vld [vmem:[#allocation3 + $0x3] sm:$0x1] }
 0x2ca   : > { %v1533_v46 = vadd.f32 1.0, %v9537_v45 }
 0x2cb   : > { %9538 = vrcp.f32 %v1525_v44 }
 0x2cc   : > { %9540 = vrcp.f32 %v1533_v46 }
 0x2d5   : > { %v9539_v48 = vpop.eup %9538 }
 0x2d6   : > { %v1537_v49 = vmul.f32 %v9539_v48, %v1517_v47  ;;  %v9541_v53 = vpop.eup %9540 }
 0x2d7   : > { %v1540_v54 = vsub.f32 1.0, %v9541_v53  ;;  %v1542_v57 = vmul.f32 %v9541_v53, %v1304_v23 }
 0x2d8   : > { %v1538_v52 = vadd.f32 %v1537_v49, %v1536_v51 }
 0x2da   : > { %9542 = vtanh.f32 %v1538_v52 }
 0x2e4   : > { %v9543_v55 = vpop.eup %9542 }
 0x2e5   : > { %v1541_v56 = vmul.f32 %v9543_v55, %v1540_v54 }
 0x2e7   : > { %v1543_v58 = vadd.f32 %v1542_v57, %v1541_v56  ;;  %v2012_v56 = vld [vmem:[#allocation4 + $0x3] sm:$0x1] }
 0x2e9   : > { %1544 = vst.msk [vmem:[#allocation5 + $0x1] sm:$0x1] %vm1305_vm2, %v1543_v58  ;;  %8277 = vmatmul.mubr.msk.f32.vlgmr.msra.gmra.mrb[8].mxu1 %vm806_vm1, %v1543_v58  ;;  %8288 = vmatmul.mubr.msk.f32.vlgmr.msra.gmra.mrb[10].mxu0 %vm806_vm1, %v1543_v58 }
 0x2ea   : > { %9064 = vmatpush3.bf16.msra.mxu1 %v10378_v36  ;;  %8298 = vmatprep.mubr.msk.f32.mxu1 %vm9965_vm0, %v9966_v1 }
 0x2eb   : > { %9065 = vmatprep.subr.bf16.mxu1 %v9964_v0  ;;  %9070 = vmatpush3.bf16.msra.mxu0 %v10335_v22 }
 0x2ec   : > { %9071 = vmatprep.subr.bf16.mxu0 %v9964_v0  ;;  %8309 = vmatprep.mubr.msk.f32.mxu0 %vm9965_vm0, %v9966_v1 }
 0x2ee   : > { %9067 = vmatpush3.bf16.msra.mxu1 %v10395_v40 }
 0x2ef   : > { %9074 = vmatprep.subr.bf16.mxu1 %v9964_v0  ;;  %9073 = vmatpush3.bf16.msra.mxu0 %v10348_v28 }
 0x2f0   : > { %9080 = vmatprep.subr.bf16.mxu0 %v9964_v0 }
 0x2f1   : > { %8299 = vmatmul.mubr.msk.f32.vlgmr.msra.gmra.mrb[10].mxu1 %vm806_vm1, %v1543_v58 }
 0x2f2   : > { %9076 = vmatpush3.bf16.msra.mxu1 %v10367_v33  ;;  %8320 = vmatprep.mubr.msk.f32.mxu1 %vm9965_vm0, %v9966_v1 }
 0x2f3   : > { %9077 = vmatprep.subr.bf16.mxu1 %v9964_v0 }
 0x2f6   : > { %9079 = vmatpush3.bf16.msra.mxu1 %v10389_v39 }
 0x2f7   : > { %9086 = vmatprep.subr.bf16.mxu1 %v9964_v0 }
 0x3bc   : > { %v1614_v59 = vpop.f32.mrb[8].mxu1  ;;  %v1684_v61 = vpop.f32.mrb[10].mxu0 }
 0x3bd   : > { %v1615_v62 = vadd.f32 %v1614_v59, %v10432_v50  ;;  %v8278_v63 = vpop.f32.mrb[9].mxu1  ;;  %v8289_v2 = vpop.f32.mrb[11].mxu0  ;;  %v1685_v4 = vadd.f32 %v10439_v60, %v1684_v61 }
 0x3bf   : > { %v1759_v5 = vadd.f32 %v1758_v3, %v1615_v62  ;;  %v1767_v8 = vadd.f32 %v1766_v7, %v1685_v4 }
 0x3c1   : > { %v7642_v6 = vmul.f32 -1.442695, %v1759_v5  ;;  %v7643_v12 = vmul.f32 -1.442695, %v1767_v8  ;;  %v2234_v8 = vld [vmem:[#allocation2 + $0x4] sm:$0x1] }
 0x3c3   : > { %9544 = vpow2.f32 %v7642_v6 }
 0x3c4   : > { %v1754_v9 = vpop.f32.mrb[10].mxu1  ;;  %9546 = vpow2.f32 %v7643_v12 }
 0x3c5   : > { %v8300_v11 = vpop.f32.mrb[11].mxu1  ;;  %v1755_v17 = vadd.f32 %v10445_v10, %v1754_v9 }
 0x3cd   : > { %v9545_v13 = vpop.eup %9544 }
 0x3ce   : > { %v1763_v14 = vadd.f32 1.0, %v9545_v13  ;;  %v9547_v15 = vpop.eup %9546  ;;  %v2242_v13 = vld [vmem:[#allocation3 + $0x4] sm:$0x1] }
 0x3cf   : > { %v1771_v16 = vadd.f32 1.0, %v9547_v15 }
 0x3d0   : > { %9548 = vrcp.f32 %v1763_v14 }
 0x3d1   : > { %9550 = vrcp.f32 %v1771_v16 }
 0x3da   : > { %v9549_v18 = vpop.eup %9548 }
 0x3db   : > { %v1775_v19 = vmul.f32 %v9549_v18, %v1755_v17  ;;  %v9551_v23 = vpop.eup %9550 }
 0x3dc   : > { %v1778_v24 = vsub.f32 1.0, %v9551_v23  ;;  %v1780_v27 = vmul.f32 %v9551_v23, %v1543_v58 }
 0x3dd   : > { %v1776_v21 = vadd.f32 %v1775_v19, %v1774_v20 }
 0x3df   : > { %9552 = vtanh.f32 %v1776_v21 }
 0x3e9   : > { %v9553_v25 = vpop.eup %9552 }
 0x3ea   : > { %v1779_v26 = vmul.f32 %v9553_v25, %v1778_v24 }
 0x3ec   : > { %v1781_v29 = vadd.f32 %v1780_v27, %v1779_v26  ;;  %v2250_v26 = vld [vmem:[#allocation4 + $0x4] sm:$0x1] }
 0x3ee   : > { %1782 = vst.msk [vmem:[#allocation5 + $0x2] sm:$0x1] %vm1305_vm2, %v1781_v29  ;;  %8310 = vmatmul.mubr.msk.f32.vlgmr.msra.gmra.mrb[12].mxu0 %vm806_vm1, %v1781_v29  ;;  %8321 = vmatmul.mubr.msk.f32.vlgmr.msra.gmra.mrb[12].mxu1 %vm806_vm1, %v1781_v29 }
 0x3ef   : > { %9082 = vmatpush3.bf16.msra.mxu0 %v10378_v36  ;;  %8331 = vmatprep.mubr.msk.f32.mxu0 %vm9965_vm0, %v9966_v1 }
 0x3f0   : > { %9083 = vmatprep.subr.bf16.mxu0 %v9964_v0  ;;  %9088 = vmatpush3.bf16.msra.mxu1 %v10335_v22 }
 0x3f1   : > { %9089 = vmatprep.subr.bf16.mxu1 %v9964_v0  ;;  %8342 = vmatprep.mubr.msk.f32.mxu1 %vm9965_vm0, %v9966_v1 }
 0x3f3   : > { %9085 = vmatpush3.bf16.msra.mxu0 %v10395_v40 }
 0x3f4   : > { %9092 = vmatprep.subr.bf16.mxu0 %v9964_v0  ;;  %9091 = vmatpush3.bf16.msra.mxu1 %v10348_v28 }
 0x3f5   : > { %9098 = vmatprep.subr.bf16.mxu1 %v9964_v0 }
 0x3f6   : > { %8332 = vmatmul.mubr.msk.f32.vlgmr.msra.gmra.mrb[14].mxu0 %vm806_vm1, %v1781_v29 }
 0x3f7   : > { %9094 = vmatpush3.bf16.msra.mxu0 %v10367_v33  ;;  %8353 = vmatprep.mubr.msk.f32.mxu0 %vm9965_vm0, %v9966_v1 }
 0x3f8   : > { %9095 = vmatprep.subr.bf16.mxu0 %v9964_v0 }
 0x3fb   : > { %9097 = vmatpush3.bf16.msra.mxu0 %v10389_v39 }
 0x3fc   : > { %9104 = vmatprep.subr.bf16.mxu0 %v9964_v0 }
 0x4c1   : > { %v1852_v30 = vpop.f32.mrb[12].mxu0  ;;  %v1922_v31 = vpop.f32.mrb[12].mxu1 }
 0x4c2   : > { %v1853_v32 = vadd.f32 %v1852_v30, %v10432_v50  ;;  %v8311_v34 = vpop.f32.mrb[13].mxu0  ;;  %v8322_v35 = vpop.f32.mrb[13].mxu1  ;;  %v1923_v38 = vadd.f32 %v10439_v60, %v1922_v31 }
 0x4c4   : > { %v1997_v41 = vadd.f32 %v1996_v37, %v1853_v32  ;;  %v2005_v44 = vadd.f32 %v2004_v43, %v1923_v38 }
 0x4c6   : > { %v7647_v42 = vmul.f32 -1.442695, %v1997_v41  ;;  %v7648_v47 = vmul.f32 -1.442695, %v2005_v44  ;;  %v2472_v44 = vld [vmem:[#allocation2 + $0x5] sm:$0x1] }
 0x4c8   : > { %9554 = vpow2.f32 %v7647_v42 }
 0x4c9   : > { %v1992_v45 = vpop.f32.mrb[14].mxu0  ;;  %9556 = vpow2.f32 %v7648_v47 }
 0x4ca   : > { %v8333_v46 = vpop.f32.mrb[15].mxu0  ;;  %v1993_v53 = vadd.f32 %v10445_v10, %v1992_v45 }
 0x4d2   : > { %v9555_v48 = vpop.eup %9554 }
 0x4d3   : > { %v2001_v49 = vadd.f32 1.0, %v9555_v48  ;;  %v9557_v51 = vpop.eup %9556  ;;  %v2480_v48 = vld [vmem:[#allocation3 + $0x5] sm:$0x1] }
 0x4d4   : > { %v2009_v52 = vadd.f32 1.0, %v9557_v51 }
 0x4d5   : > { %9558 = vrcp.f32 %v2001_v49 }
 0x4d6   : > { %9560 = vrcp.f32 %v2009_v52 }
 0x4df   : > { %v9559_v54 = vpop.eup %9558 }
 0x4e0   : > { %v2013_v55 = vmul.f32 %v9559_v54, %v1993_v53  ;;  %v9561_v58 = vpop.eup %9560 }
 0x4e1   : > { %v2016_v59 = vsub.f32 1.0, %v9561_v58  ;;  %v2018_v63 = vmul.f32 %v9561_v58, %v1781_v29 }
 0x4e2   : > { %v2014_v57 = vadd.f32 %v2013_v55, %v2012_v56 }
 0x4e4   : > { %9562 = vtanh.f32 %v2014_v57 }
 0x4ee   : > { %v9563_v61 = vpop.eup %9562 }
 0x4ef   : > { %v2017_v62 = vmul.f32 %v9563_v61, %v2016_v59 }
 0x4f1   : > { %v2019_v2 = vadd.f32 %v2018_v63, %v2017_v62  ;;  %v2488_v62 = vld [vmem:[#allocation4 + $0x5] sm:$0x1] }
 0x4f3   : > { %2020 = vst.msk [vmem:[#allocation5 + $0x3] sm:$0x1] %vm1305_vm2, %v2019_v2  ;;  %8343 = vmatmul.mubr.msk.f32.vlgmr.msra.gmra.mrb[14].mxu1 %vm806_vm1, %v2019_v2  ;;  %8354 = vmatmul.mubr.msk.f32.vlgmr.msra.gmra.mrb[16].mxu0 %vm806_vm1, %v2019_v2 }
 0x4f4   : > { %9100 = vmatpush3.bf16.msra.mxu1 %v10378_v36  ;;  %8364 = vmatprep.mubr.msk.f32.mxu1 %vm9965_vm0, %v9966_v1 }
 0x4f5   : > { %9101 = vmatprep.subr.bf16.mxu1 %v9964_v0  ;;  %9106 = vmatpush3.bf16.msra.mxu0 %v10335_v22 }
 0x4f6   : > { %9107 = vmatprep.subr.bf16.mxu0 %v9964_v0  ;;  %8375 = vmatprep.mubr.msk.f32.mxu0 %vm9965_vm0, %v9966_v1 }
 0x4f8   : > { %9103 = vmatpush3.bf16.msra.mxu1 %v10395_v40 }
 0x4f9   : > { %9110 = vmatprep.subr.bf16.mxu1 %v9964_v0  ;;  %9109 = vmatpush3.bf16.msra.mxu0 %v10348_v28 }
 0x4fa   : > { %9116 = vmatprep.subr.bf16.mxu0 %v9964_v0 }
 0x4fb   : > { %8365 = vmatmul.mubr.msk.f32.vlgmr.msra.gmra.mrb[16].mxu1 %vm806_vm1, %v2019_v2 }
 0x4fc   : > { %9112 = vmatpush3.bf16.msra.mxu1 %v10367_v33  ;;  %8386 = vmatprep.mubr.msk.f32.mxu1 %vm9965_vm0, %v9966_v1 }
 0x4fd   : > { %9113 = vmatprep.subr.bf16.mxu1 %v9964_v0 }
 0x500   : > { %9115 = vmatpush3.bf16.msra.mxu1 %v10389_v39 }
 0x501   : > { %9122 = vmatprep.subr.bf16.mxu1 %v9964_v0 }
 0x5c6   : > { %v2090_v3 = vpop.f32.mrb[14].mxu1  ;;  %v2160_v4 = vpop.f32.mrb[16].mxu0 }
 0x5c7   : > { %v2091_v5 = vadd.f32 %v2090_v3, %v10432_v50  ;;  %v8344_v6 = vpop.f32.mrb[15].mxu1  ;;  %v8355_v7 = vpop.f32.mrb[17].mxu0  ;;  %v2161_v9 = vadd.f32 %v10439_v60, %v2160_v4 }
 0x5c9   : > { %v2235_v11 = vadd.f32 %v2234_v8, %v2091_v5  ;;  %v2243_v14 = vadd.f32 %v2242_v13, %v2161_v9 }
 0x5cb   : > { %v7652_v12 = vmul.f32 -1.442695, %v2235_v11  ;;  %v7653_v17 = vmul.f32 -1.442695, %v2243_v14 }
 0x5cd   : > { %9564 = vpow2.f32 %v7652_v12  ;;  %v2710_v12 = vld [vmem:[#allocation2 + $0x6] sm:$0x1] }
 0x5ce   : > { %v2230_v15 = vpop.f32.mrb[16].mxu1  ;;  %9566 = vpow2.f32 %v7653_v17 }
 0x5cf   : > { %v8366_v16 = vpop.f32.mrb[17].mxu1  ;;  %v2231_v23 = vadd.f32 %v10445_v10, %v2230_v15  ;;  %v2718_v15 = vld [vmem:[#allocation3 + $0x6] sm:$0x1] }
 0x5d7   : > { %v9565_v18 = vpop.eup %9564 }
 0x5d8   : > { %v2239_v19 = vadd.f32 1.0, %v9565_v18  ;;  %v9567_v20 = vpop.eup %9566 }
 0x5d9   : > { %v2247_v21 = vadd.f32 1.0, %v9567_v20 }
 0x5da   : > { %9568 = vrcp.f32 %v2239_v19 }
 0x5db   : > { %9570 = vrcp.f32 %v2247_v21 }
 0x5e4   : > { %v9569_v24 = vpop.eup %9568 }
 0x5e5   : > { %v2251_v25 = vmul.f32 %v9569_v24, %v2231_v23  ;;  %v9571_v29 = vpop.eup %9570 }
 0x5e6   : > { %v2254_v30 = vsub.f32 1.0, %v9571_v29  ;;  %v2256_v34 = vmul.f32 %v9571_v29, %v2019_v2 }
 0x5e7   : > { %v2252_v27 = vadd.f32 %v2251_v25, %v2250_v26 }
 0x5e9   : > { %9572 = vtanh.f32 %v2252_v27  ;;  %v2726_v27 = vld [vmem:[#allocation4 + $0x6] sm:$0x1] }
 0x5f3   : > { %v9573_v31 = vpop.eup %9572 }
 0x5f4   : > { %v2255_v32 = vmul.f32 %v9573_v31, %v2254_v30 }
 0x5f6   : > { %v2257_v35 = vadd.f32 %v2256_v34, %v2255_v32 }
 0x5f8   : > { %2258 = vst.msk [vmem:[#allocation5 + $0x4] sm:$0x1] %vm1305_vm2, %v2257_v35  ;;  %8376 = vmatmul.mubr.msk.f32.vlgmr.msra.gmra.mrb[18].mxu0 %vm806_vm1, %v2257_v35  ;;  %8387 = vmatmul.mubr.msk.f32.vlgmr.msra.gmra.mrb[18].mxu1 %vm806_vm1, %v2257_v35 }
 0x5f9   : > { %9118 = vmatpush3.bf16.msra.mxu0 %v10378_v36  ;;  %8397 = vmatprep.mubr.msk.f32.mxu0 %vm9965_vm0, %v9966_v1 }
 0x5fa   : > { %9119 = vmatprep.subr.bf16.mxu0 %v9964_v0  ;;  %9124 = vmatpush3.bf16.msra.mxu1 %v10335_v22 }
 0x5fb   : > { %9125 = vmatprep.subr.bf16.mxu1 %v9964_v0  ;;  %8408 = vmatprep.mubr.msk.f32.mxu1 %vm9965_vm0, %v9966_v1 }
 0x5fd   : > { %9121 = vmatpush3.bf16.msra.mxu0 %v10395_v40 }
 0x5fe   : > { %9128 = vmatprep.subr.bf16.mxu0 %v9964_v0  ;;  %9127 = vmatpush3.bf16.msra.mxu1 %v10348_v28 }
 0x5ff   : > { %9134 = vmatprep.subr.bf16.mxu1 %v9964_v0 }
 0x600   : > { %8398 = vmatmul.mubr.msk.f32.vlgmr.msra.gmra.mrb[20].mxu0 %vm806_vm1, %v2257_v35 }
 0x601   : > { %9130 = vmatpush3.bf16.msra.mxu0 %v10367_v33  ;;  %8419 = vmatprep.mubr.msk.f32.mxu0 %vm9965_vm0, %v9966_v1 }
 0x602   : > { %9131 = vmatprep.subr.bf16.mxu0 %v9964_v0 }
 0x605   : > { %9133 = vmatpush3.bf16.msra.mxu0 %v10389_v39 }
 0x606   : > { %9140 = vmatprep.subr.bf16.mxu0 %v9964_v0 }
 0x6cb   : > { %v2328_v37 = vpop.f32.mrb[18].mxu0  ;;  %v2398_v38 = vpop.f32.mrb[18].mxu1 }
 0x6cc   : > { %v2329_v41 = vadd.f32 %v2328_v37, %v10432_v50  ;;  %v8377_v42 = vpop.f32.mrb[19].mxu0  ;;  %v8388_v43 = vpop.f32.mrb[19].mxu1  ;;  %v2399_v45 = vadd.f32 %v10439_v60, %v2398_v38  ;;  %v2975_v38 = vld [vmem:[#allocation6 + $0x60] sm:$0xff] }
 0x6cd   : > { %v3063_v43 = vld [vmem:[#allocation6 + $0x88] sm:$0xff] }
 0x6ce   : > { %v2473_v46 = vadd.f32 %v2472_v44, %v2329_v41  ;;  %v2481_v49 = vadd.f32 %v2480_v48, %v2399_v45  ;;  %v3062_v41 = vld [vmem:[#allocation6 + $0x80] sm:$0xff]  ;;  %v2977_v44 = vld [vmem:[#allocation6 + $0x70] sm:$0xff]  ;;  %v2978_v45 = vld [vmem:[#allocation6 + $0x78] sm:$0xff] }
 0x6cf   : > { %v3065_v48 = vld [vmem:[#allocation6 + $0x98] sm:$0xff] }
 0x6d0   : > { %v7657_v47 = vmul.f32 -1.442695, %v2473_v46  ;;  %v7658_v53 = vmul.f32 -1.442695, %v2481_v49  ;;  %v9165_v46 = vpack.c.bf16 %v3063_v43, %v3062_v41  ;;  %v7670_v43 = vld [vmem:[%s11288_s29 + $0x3] ss:$0 sm:$0xff] }
 0x6d2   : > { %9574 = vpow2.f32 %v7657_v47  ;;  %v3064_v47 = vld [vmem:[#allocation6 + $0x90] sm:$0xff] }
 0x6d3   : > { %v2468_v51 = vpop.f32.mrb[20].mxu0  ;;  %9576 = vpow2.f32 %v7658_v53  ;;  %v9168_v49 = vpack.c.bf16 %v3065_v48, %v3064_v47 }
 0x6d4   : > { %v8399_v52 = vpop.f32.mrb[21].mxu0  ;;  %v2469_v58 = vadd.f32 %v10445_v10, %v2468_v51 }
 0x6dc   : > { %v9575_v54 = vpop.eup %9574 }
 0x6dd   : > { %v2477_v55 = vadd.f32 1.0, %v9575_v54  ;;  %v9577_v56 = vpop.eup %9576 }
 0x6de   : > { %v2485_v57 = vadd.f32 1.0, %v9577_v56  ;;  %v2948_v56 = vld [vmem:[#allocation2 + $0x7] sm:$0x1] }
 0x6df   : > { %9578 = vrcp.f32 %v2477_v55 }
 0x6e0   : > { %9580 = vrcp.f32 %v2485_v57 }
 0x6e9   : > { %v9579_v59 = vpop.eup %9578 }
 0x6ea   : > { %v2489_v61 = vmul.f32 %v9579_v59, %v2469_v58  ;;  %v9581_v2 = vpop.eup %9580 }
 0x6eb   : > { %v2492_v3 = vsub.f32 1.0, %v9581_v2  ;;  %v2494_v6 = vmul.f32 %v9581_v2, %v2257_v35 }
 0x6ec   : > { %v2490_v63 = vadd.f32 %v2489_v61, %v2488_v62  ;;  %v2956_v61 = vld [vmem:[#allocation3 + $0x7] sm:$0x1] }
 0x6ee   : > { %9582 = vtanh.f32 %v2490_v63 }
 0x6f8   : > { %v9583_v4 = vpop.eup %9582 }
 0x6f9   : > { %v2493_v5 = vmul.f32 %v9583_v4, %v2492_v3 }
 0x6fb   : > { %v2495_v7 = vadd.f32 %v2494_v6, %v2493_v5 }
 0x6fd   : > { %2496 = vst.msk [vmem:[#allocation5 + $0x5] sm:$0x1] %vm1305_vm2, %v2495_v7  ;;  %8409 = vmatmul.mubr.msk.f32.vlgmr.msra.gmra.mrb[20].mxu1 %vm806_vm1, %v2495_v7  ;;  %8420 = vmatmul.mubr.msk.f32.vlgmr.msra.gmra.mrb[22].mxu0 %vm806_vm1, %v2495_v7 }
 0x6fe   : > { %9136 = vmatpush3.bf16.msra.mxu1 %v10378_v36  ;;  %8430 = vmatprep.mubr.msk.f32.mxu1 %vm9965_vm0, %v9966_v1 }
 0x6ff   : > { %9137 = vmatprep.subr.bf16.mxu1 %v9964_v0  ;;  %9142 = vmatpush3.bf16.msra.mxu0 %v10335_v22 }
 0x700   : > { %9143 = vmatprep.subr.bf16.mxu0 %v9964_v0  ;;  %8441 = vmatprep.mubr.msk.f32.mxu0 %vm9965_vm0, %v9966_v1 }
 0x702   : > { %9139 = vmatpush3.bf16.msra.mxu1 %v10395_v40 }
 0x703   : > { %9146 = vmatprep.subr.bf16.mxu1 %v9964_v0  ;;  %9145 = vmatpush3.bf16.msra.mxu0 %v10348_v28 }
 0x704   : > { %9152 = vmatprep.subr.bf16.mxu0 %v9964_v0 }
 0x705   : > { %8431 = vmatmul.mubr.msk.f32.vlgmr.msra.gmra.mrb[22].mxu1 %vm806_vm1, %v2495_v7 }
 0x706   : > { %9148 = vmatpush3.bf16.msra.mxu1 %v10367_v33  ;;  %8452 = vmatprep.mubr.msk.f32.mxu1 %vm9965_vm0, %v9966_v1 }
 0x707   : > { %9149 = vmatprep.subr.bf16.mxu1 %v9964_v0 }
 0x70a   : > { %9151 = vmatpush3.bf16.msra.mxu1 %v10389_v39 }
 0x70b   : > { %9158 = vmatprep.subr.bf16.mxu1 %v9964_v0 }
 0x7d0   : > { %v2566_v22 = vpop.f32.mrb[20].mxu1  ;;  %v2636_v8 = vpop.f32.mrb[22].mxu0 }
 0x7d1   : > { %v2567_v9 = vadd.f32 %v2566_v22, %v10432_v50  ;;  %v8410_v28 = vpop.f32.mrb[21].mxu1  ;;  %v8421_v11 = vpop.f32.mrb[23].mxu0  ;;  %v2637_v13 = vadd.f32 %v10439_v60, %v2636_v8 }
 0x7d3   : > { %v2711_v14 = vadd.f32 %v2710_v12, %v2567_v9  ;;  %v2719_v16 = vadd.f32 %v2718_v15, %v2637_v13  ;;  %v3146_v15 = vld [vmem:[#allocation6 + $0xa0] sm:$0xff] }
 0x7d5   : > { %v7662_v33 = vmul.f32 -1.442695, %v2711_v14  ;;  %v7663_v19 = vmul.f32 -1.442695, %v2719_v16  ;;  %v3147_v16 = vld [vmem:[#allocation6 + $0xa8] sm:$0xff] }
 0x7d7   : > { %9584 = vpow2.f32 %v7662_v33 }
 0x7d8   : > { %v2706_v17 = vpop.f32.mrb[22].mxu1  ;;  %9586 = vpow2.f32 %v7663_v19 }
 0x7d9   : > { %v8432_v18 = vpop.f32.mrb[23].mxu1  ;;  %v2707_v24 = vadd.f32 %v10445_v10, %v2706_v17  ;;  %v7679_v17 = vld [vmem:[%s11287_s30 + $0x68] sm:$0xff] }
 0x7da   : > { %v9171_v18 = vpack.c.bf16 %v3147_v16, %v3146_v15 }
 0x7e1   : > { %v9585_v39 = vpop.eup %9584 }
 0x7e2   : > { %v2715_v20 = vadd.f32 1.0, %v9585_v39  ;;  %v9587_v21 = vpop.eup %9586  ;;  %v3148_v39 = vld [vmem:[#allocation6 + $0xb0] sm:$0xff] }
 0x7e3   : > { %v2723_v23 = vadd.f32 1.0, %v9587_v21  ;;  %v7680_v21 = vld [vmem:[%s11287_s30 + $0x70] sm:$0xff] }
 0x7e4   : > { %9588 = vrcp.f32 %v2715_v20  ;;  %v3149_v20 = vld [vmem:[#allocation6 + $0xb8] sm:$0xff] }
 0x7e5   : > { %9590 = vrcp.f32 %v2723_v23  ;;  %v7681_v23 = vld [vmem:[%s11287_s30 + $0x78] sm:$0xff] }
 0x7ee   : > { %v9589_v25 = vpop.eup %9588 }
 0x7ef   : > { %v2727_v26 = vmul.f32 %v9589_v25, %v2707_v24  ;;  %v9591_v30 = vpop.eup %9590  ;;  %v9174_v25 = vpack.c.bf16 %v3149_v20, %v3148_v39 }
 0x7f0   : > { %v2730_v31 = vsub.f32 1.0, %v9591_v30  ;;  %v2732_v35 = vmul.f32 %v9591_v30, %v2495_v7  ;;  %v7686_v30 = vld [vmem:[%s11287_s30 + $0xa0] sm:$0xff] }
 0x7f1   : > { %v2728_v29 = vadd.f32 %v2727_v26, %v2726_v27  ;;  %v10644_v26 = vpack.c.bf16 %v7681_v23, %v7680_v21  ;;  %v7682_v27 = vld [vmem:[%s11287_s30 + $0x80] sm:$0xff] }
 0x7f3   : > { %9592 = vtanh.f32 %v2728_v29  ;;  %v7683_v29 = vld [vmem:[%s11287_s30 + $0x88] sm:$0xff] }
 0x7fd   : > { %v9593_v32 = vpop.eup %9592 }
 0x7fe   : > { %v2731_v34 = vmul.f32 %v9593_v32, %v2730_v31  ;;  %v7687_v31 = vld [vmem:[%s11287_s30 + $0xa8] sm:$0xff]  ;;  %v10665_v32 = vpack.c.bf16 %v7683_v29, %v7682_v27 }
 0x800   : > { %v10598_v37 = vadd.f32 %v2732_v35, %v2731_v34  ;;  %v7684_v34 = vld [vmem:[%s11287_s30 + $0x90] sm:$0xff]  ;;  %v7685_v35 = vld [vmem:[%s11287_s30 + $0x98] sm:$0xff] }
 0x801   : > { %v10686_v41 = vpack.c.bf16 %v7685_v35, %v7684_v34 }
 0x802   : > { %2734 = vst.msk [vmem:[#allocation5 + $0x6] sm:$0x1] %vm1305_vm2, %v10598_v37  ;;  %8442 = vmatmul.mubr.msk.f32.vlgmr.msra.gmra.mrb[24].mxu0 %vm806_vm1, %v10598_v37  ;;  %8453 = vmatmul.mubr.msk.f32.vlgmr.msra.gmra.mrb[24].mxu1 %vm806_vm1, %v10598_v37 }
 0x803   : > { %9154 = vmatpush3.bf16.msra.mxu0 %v10378_v36  ;;  %8463 = vmatprep.mubr.msk.f32.mxu0 %vm9965_vm0, %v9966_v1  ;;  %v2976_v36 = vld [vmem:[#allocation6 + $0x68] sm:$0xff] }
 0x804   : > { %9155 = vmatprep.subr.bf16.mxu0 %v9964_v0  ;;  %8474 = vmatprep.mubr.msk.f32.mxu1 %vm9965_vm0, %v9966_v1  ;;  %v9159_v42 = vpack.c.bf16 %v2976_v36, %v2975_v38  ;;  %v7688_v38 = vld [vmem:[%s11287_s30 + $0xb0] sm:$0xff]  ;;  %v7689_v36 = vld [vmem:[%s11287_s30 + $0xb8] sm:$0xff] }
 0x806   : > { %9160 = vmatpush3.bf16.msra.mxu1 %v9159_v42  ;;  %v10692_v42 = vpack.c.bf16 %v7689_v36, %v7688_v38 }
 0x807   : > { %9157 = vmatpush3.bf16.msra.mxu0 %v10395_v40  ;;  %v9162_v40 = vpack.c.bf16 %v2978_v45, %v2977_v44  ;;  %9161 = vmatprep.subr.bf16.mxu1 %v9964_v0  ;;  %v7673_v44 = vld [vmem:[%s11288_s29 + $0x4] ss:$0 sm:$0xff] }
 0x808   : > { %9164 = vmatprep.subr.bf16.mxu0 %v9964_v0 }
 0x80a   : > { %8464 = vmatmul.mubr.msk.f32.vlgmr.msra.gmra.mrb[26].mxu0 %vm806_vm1, %v10598_v37  ;;  %9163 = vmatpush3.bf16.msra.mxu1 %v9162_v40 }
 0x80b   : > { %8485 = vmatprep.mubr.msk.f32.mxu0 %vm9965_vm0, %v9966_v1  ;;  %9166 = vmatpush3.bf16.msra.mxu0 %v9165_v46 }
 0x80c   : > { %9167 = vmatprep.subr.bf16.mxu0 %v9964_v0  ;;  %9170 = vmatprep.subr.bf16.mxu1 %v9964_v0 }
 0x80f   : > { %9169 = vmatpush3.bf16.msra.mxu0 %v9168_v49 }
 0x810   : > { %9176 = vmatprep.subr.bf16.mxu0 %v9964_v0 }
 0x8d5   : > { %v2804_v51 = vpop.f32.mrb[24].mxu0  ;;  %v2874_v52 = vpop.f32.mrb[24].mxu1 }
 0x8d6   : > { %v2805_v53 = vadd.f32 %v2804_v51, %v10432_v50  ;;  %v8443_v54 = vpop.f32.mrb[25].mxu0  ;;  %v8454_v55 = vpop.f32.mrb[25].mxu1  ;;  %v2875_v57 = vadd.f32 %v10439_v60, %v2874_v52  ;;  %v2964_v60 = vld [vmem:[#allocation4 + $0x7] sm:$0x1]  ;;  %v7676_v51 = vld [vmem:[%s11288_s29 + $0x5] ss:$0 sm:$0xff] }
 0x8d7   : > { %v10729_v52 = vld [vmem:[%s11218_s6 + $0x3] sm:$0x1] }
 0x8d8   : > { %v2949_v58 = vadd.f32 %v2948_v56, %v2805_v53  ;;  %v2957_v62 = vadd.f32 %v2956_v61, %v2875_v57 }
 0x8da   : > { %v7667_v59 = vmul.f32 -1.442695, %v2949_v58  ;;  %v7668_v3 = vmul.f32 -1.442695, %v2957_v62 }
 0x8dc   : > { %9594 = vpow2.f32 %v7667_v59 }
 0x8dd   : > { %v2944_v63 = vpop.f32.mrb[26].mxu0  ;;  %9596 = vpow2.f32 %v7668_v3 }
 0x8de   : > { %v8465_v2 = vpop.f32.mrb[27].mxu0  ;;  %v2945_v50 = vadd.f32 %v10445_v10, %v2944_v63  ;;  %v7678_v10 = vld [vmem:[%s11287_s30 + $0x60] sm:$0xff] }
 0x8df   : > { %v10633_v19 = vpack.c.bf16 %v7679_v17, %v7678_v10  ;;  %v10736_v63 = vld [vmem:[%s11218_s6 + $0x4] sm:$0x1] }
 0x8e6   : > { %v9595_v4 = vpop.eup %9594 }
 0x8e7   : > { %v2953_v5 = vadd.f32 1.0, %v9595_v4  ;;  %v9597_v6 = vpop.eup %9596 }
 0x8e8   : > { %v2961_v7 = vadd.f32 1.0, %v9597_v6 }
 0x8e9   : > { %9598 = vrcp.f32 %v2953_v5 }
 0x8ea   : > { %9600 = vrcp.f32 %v2961_v7 }
 0x8f3   : > { %v9599_v22 = vpop.eup %9598 }
 0x8f4   : > { %v2965_v8 = vmul.f32 %v9599_v22, %v2945_v50  ;;  %v9601_v28 = vpop.eup %9600 }
 0x8f5   : > { %v2968_v11 = vsub.f32 1.0, %v9601_v28  ;;  %v2970_v13 = vmul.f32 %v9601_v28, %v10598_v37  ;;  %v10675_v37 = vpack.c.bf16 %v7687_v31, %v7686_v30 }
 0x8f6   : > { %v2966_v9 = vadd.f32 %v2965_v8, %v2964_v60 }
 0x8f8   : > { %9602 = vtanh.f32 %v2966_v9  ;;  %v10742_v9 = vld [vmem:[%s11218_s6 + $0x5] sm:$0x1] }
 0x902   : > { %v9603_v12 = vpop.eup %9602 }
 0x903   : > { %v2969_v14 = vmul.f32 %v9603_v12, %v2968_v11 }
 0x905   : > { %v2971_v33 = vadd.f32 %v2970_v13, %v2969_v14 }
 0x907   : > { %2972 = vst.msk [vmem:[#allocation5 + $0x7] sm:$0x1] %vm1305_vm2, %v2971_v33 }
 0x90e   : > { %v2973_v24 = vld [vmem:[#allocation5] sm:$0xff] }
 0x90f   : > { %8475 = vmatmul.mubr.msk.f32.vlgmr.msra.gmra.mrb[26].mxu1 %vm806_vm1, %v2973_v24  ;;  %8486 = vmatmul.mubr.msk.f32.vlgmr.msra.gmra.mrb[28].mxu0 %vm806_vm1, %v2973_v24 }
 0x910   : > { %9172 = vmatpush3.bf16.msra.mxu1 %v9171_v18  ;;  %9178 = vmatpush3.bf16.msra.mxu0 %v10633_v19 }
 0x911   : > { %9173 = vmatprep.subr.bf16.mxu1 %v9964_v0  ;;  %9179 = vmatprep.subr.bf16.mxu0 %v9964_v0 }
 0x912   : > { %8496 = vmatprep.mubr.msk.f32.mxu1 %vm9965_vm0, %v9966_v1  ;;  %8507 = vmatprep.mubr.msk.f32.mxu0 %vm9965_vm0, %v9966_v1 }
 0x914   : > { %9175 = vmatpush3.bf16.msra.mxu1 %v9174_v25  ;;  %9181 = vmatpush3.bf16.msra.mxu0 %v10644_v26 }
 0x915   : > { %9182 = vmatprep.subr.bf16.mxu1 %v9964_v0  ;;  %9188 = vmatprep.subr.bf16.mxu0 %v9964_v0 }
 0x917   : > { %8497 = vmatmul.mubr.msk.f32.vlgmr.msra.gmra.mrb[28].mxu1 %vm806_vm1, %v2973_v24  ;;  %8508 = vmatmul.mubr.f32.vlgmr.msra.gmra.mrb[30].mxu0 %v9966_v1 }
 0x918   : > { %9184 = vmatpush3.bf16.msra.mxu1 %v10665_v32  ;;  %8518 = vmatprep.mubr.msk.f32.mxu1 %vm9965_vm0, %v9966_v1 }
 0x919   : > { %9185 = vmatprep.subr.bf16.mxu1 %v9964_v0  ;;  %9190 = vmatpush3.bf16.msra.mxu0 %v10675_v37 }
 0x91a   : > { %9191 = vmatprep.subr.bf16.mxu0 %v9964_v0  ;;  %8529 = vmatprep.mubr.msk.f32.mxu0 %vm9965_vm0, %v9966_v1 }
 0x91c   : > { %9187 = vmatpush3.bf16.msra.mxu1 %v10686_v41 }
 0x91d   : > { %9193 = vmatpush3.bf16.msra.mxu0 %v10692_v42  ;;  %9194 = vmatprep.subr.bf16.mxu1 %v9964_v0 }
 0x91e   : > { %9200 = vmatprep.subr.bf16.mxu0 %v9964_v0 }
 0x91f   : > { %8519 = vmatmul.mubr.f32.vlgmr.msra.gmra.mrb[30].mxu1 %v9966_v1 }
 0x920   : > { %8530 = vmatmul.mubr.f32.vlgmr.msra.gmra.mrb[32].mxu0 %v9966_v1  ;;  %9196 = vmatpush3.bf16.msra.mxu1 %v10633_v19 }
 0x921   : > { %9202 = vmatpush3.bf16.msra.mxu0 %v10665_v32  ;;  %9197 = vmatprep.subr.bf16.mxu1 %v9964_v0 }
 0x922   : > { %9203 = vmatprep.subr.bf16.mxu0 %v9964_v0  ;;  %8540 = vmatprep.mubr.msk.f32.mxu1 %vm9965_vm0, %v9966_v1 }
 0x923   : > { %8551 = vmatprep.mubr.msk.f32.mxu0 %vm9965_vm0, %v9966_v1 }
 0x924   : > { %9199 = vmatpush3.bf16.msra.mxu1 %v10644_v26 }
 0x925   : > { %9205 = vmatpush3.bf16.msra.mxu0 %v10686_v41  ;;  %9206 = vmatprep.subr.bf16.mxu1 %v9964_v0 }
 0x926   : > { %9212 = vmatprep.subr.bf16.mxu0 %v9964_v0 }
 0x9e2   : > { %v3056_v45 = vpop.f32.mrb[26].mxu1  ;;  %v3140_v46 = vpop.f32.mrb[28].mxu0 }
 0x9e3   : > { %v3057_v47 = vadd.f32 %v7670_v43, %v3056_v45  ;;  %v3141_v48 = vadd.f32 %v7673_v44, %v3140_v46  ;;  %v8476_v40 = vpop.f32.mrb[27].mxu1  ;;  %v8487_v49 = vpop.f32.mrb[29].mxu0 }
 0x9e5   : > { %3060 = vst.msk [vmem:[#allocation2] sm:$0xff] %vm806_vm1, %v3057_v47  ;;  %3144 = vst.msk [vmem:[#allocation3] sm:$0xff] %vm806_vm1, %v3141_v48 }
 0x9ea   : > { %v3224_v53 = vpop.f32.mrb[28].mxu1  ;;  %v3316_v54 = vpop.f32.mrb[30].mxu0 }
 0x9eb   : > { %v3225_v55 = vadd.f32 %v7676_v51, %v3224_v53  ;;  %v3317_v56 = vadd.f32 %v10729_v52, %v3316_v54  ;;  %v8498_v57 = vpop.f32.mrb[29].mxu1  ;;  %v8509_v58 = vpop.f32.mrb[31].mxu0 }
 0x9ec   : > { %v3460_v59 = vld [vmem:[#allocation2] sm:$0x1]  ;;  %v3468_v6 = vld [vmem:[#allocation3] sm:$0x1]  ;;  %v3698_v29 = vld [vmem:[#allocation2 + $0x1] sm:$0x1] }
 0x9ed   : > { %3228 = vst.msk [vmem:[#allocation4] sm:$0xff] %vm806_vm1, %v3225_v55  ;;  %v3461_v61 = vadd.f32 %v3460_v59, %v3317_v56  ;;  %v3706_v35 = vld [vmem:[#allocation3 + $0x1] sm:$0x1] }
 0x9ef   : > { %v7693_v62 = vmul.f32 -1.442695, %v3461_v61 }
 0x9f1   : > { %9604 = vpow2.f32 %v7693_v62 }
 0x9f2   : > { %v3386_v2 = vpop.f32.mrb[30].mxu1 }
 0x9f3   : > { %v3387_v3 = vadd.f32 %v10736_v63, %v3386_v2  ;;  %v8520_v4 = vpop.f32.mrb[31].mxu1  ;;  %v3456_v5 = vpop.f32.mrb[32].mxu0 }
 0x9f4   : > { %v8531_v7 = vpop.f32.mrb[33].mxu0  ;;  %v3457_v12 = vadd.f32 %v10742_v9, %v3456_v5  ;;  %v3476_v33 = vld [vmem:[#allocation4] sm:$0x1]  ;;  %v3714_v53 = vld [vmem:[#allocation4 + $0x1] sm:$0x1] }
 0x9f5   : > { %v3469_v50 = vadd.f32 %v3468_v6, %v3387_v3  ;;  %v3936_v6 = vld [vmem:[#allocation2 + $0x2] sm:$0x1] }
 0x9f7   : > { %v7694_v22 = vmul.f32 -1.442695, %v3469_v50 }
 0x9f9   : > { %9606 = vpow2.f32 %v7694_v22 }
 0x9fb   : > { %v9605_v8 = vpop.eup %9604 }
 0x9fc   : > { %v3465_v60 = vadd.f32 1.0, %v9605_v8  ;;  %v3944_v8 = vld [vmem:[#allocation3 + $0x2] sm:$0x1] }
 0x9fe   : > { %9608 = vrcp.f32 %v3465_v60 }
 0xa03   : > { %v9607_v28 = vpop.eup %9606 }
 0xa04   : > { %v3473_v11 = vadd.f32 1.0, %v9607_v28 }
 0xa06   : > { %9610 = vrcp.f32 %v3473_v11 }
 0xa08   : > { %v9609_v13 = vpop.eup %9608 }
 0xa09   : > { %v3477_v14 = vmul.f32 %v9609_v13, %v3457_v12 }
 0xa0b   : > { %v3478_v15 = vadd.f32 %v3477_v14, %v3476_v33 }
 0xa0d   : > { %9612 = vtanh.f32 %v3478_v15 }
 0xa10   : > { %v9611_v16 = vpop.eup %9610 }
 0xa11   : > { %v3480_v10 = vsub.f32 1.0, %v9611_v16  ;;  %v3482_v39 = vmul.f32 0.0, %v9611_v16 }
 0xa17   : > { %v9613_v17 = vpop.eup %9612 }
 0xa18   : > { %v3481_v18 = vmul.f32 %v9613_v17, %v3480_v10 }
 0xa1a   : > { %v3483_v20 = vadd.f32 %v3482_v39, %v3481_v18  ;;  %v3952_v18 = vld [vmem:[#allocation4 + $0x2] sm:$0x1] }
 0xa1c   : > { %3484 = vst.msk [vmem:[#allocation5] sm:$0x1] %vm1305_vm2, %v3483_v20  ;;  %8541 = vmatmul.mubr.msk.f32.vlgmr.msra.gmra.mrb[32].mxu1 %vm806_vm1, %v3483_v20  ;;  %8552 = vmatmul.mubr.msk.f32.vlgmr.msra.gmra.mrb[34].mxu0 %vm806_vm1, %v3483_v20 }
 0xa1d   : > { %9208 = vmatpush3.bf16.msra.mxu1 %v10675_v37  ;;  %8562 = vmatprep.mubr.msk.f32.mxu1 %vm9965_vm0, %v9966_v1 }
 0xa1e   : > { %9209 = vmatprep.subr.bf16.mxu1 %v9964_v0  ;;  %9214 = vmatpush3.bf16.msra.mxu0 %v10633_v19 }
 0xa1f   : > { %9215 = vmatprep.subr.bf16.mxu0 %v9964_v0  ;;  %8573 = vmatprep.mubr.msk.f32.mxu0 %vm9965_vm0, %v9966_v1 }
 0xa21   : > { %9211 = vmatpush3.bf16.msra.mxu1 %v10692_v42 }
 0xa22   : > { %9218 = vmatprep.subr.bf16.mxu1 %v9964_v0  ;;  %9217 = vmatpush3.bf16.msra.mxu0 %v10644_v26 }
 0xa23   : > { %9224 = vmatprep.subr.bf16.mxu0 %v9964_v0 }
 0xa24   : > { %8563 = vmatmul.mubr.msk.f32.vlgmr.msra.gmra.mrb[34].mxu1 %vm806_vm1, %v3483_v20 }
 0xa25   : > { %9220 = vmatpush3.bf16.msra.mxu1 %v10665_v32  ;;  %8584 = vmatprep.mubr.msk.f32.mxu1 %vm9965_vm0, %v9966_v1 }
 0xa26   : > { %9221 = vmatprep.subr.bf16.mxu1 %v9964_v0 }
 0xa29   : > { %9223 = vmatpush3.bf16.msra.mxu1 %v10686_v41 }
 0xa2a   : > { %9230 = vmatprep.subr.bf16.mxu1 %v9964_v0 }
 0xaef   : > { %v3554_v21 = vpop.f32.mrb[32].mxu1  ;;  %v3624_v23 = vpop.f32.mrb[34].mxu0 }
 0xaf0   : > { %v3555_v24 = vadd.f32 %v10729_v52, %v3554_v21  ;;  %v8542_v25 = vpop.f32.mrb[33].mxu1  ;;  %v8553_v27 = vpop.f32.mrb[35].mxu0  ;;  %v3625_v30 = vadd.f32 %v10736_v63, %v3624_v23 }
 0xaf2   : > { %v3699_v31 = vadd.f32 %v3698_v29, %v3555_v24  ;;  %v3707_v38 = vadd.f32 %v3706_v35, %v3625_v30 }
 0xaf4   : > { %v7698_v34 = vmul.f32 -1.442695, %v3699_v31  ;;  %v7699_v44 = vmul.f32 -1.442695, %v3707_v38  ;;  %v4174_v38 = vld [vmem:[#allocation2 + $0x3] sm:$0x1] }
 0xaf6   : > { %9614 = vpow2.f32 %v7698_v34 }
 0xaf7   : > { %v3694_v36 = vpop.f32.mrb[34].mxu1  ;;  %9616 = vpow2.f32 %v7699_v44 }
 0xaf8   : > { %v8564_v43 = vpop.f32.mrb[35].mxu1  ;;  %v3695_v40 = vadd.f32 %v10742_v9, %v3694_v36 }
 0xb00   : > { %v9615_v45 = vpop.eup %9614 }
 0xb01   : > { %v3703_v46 = vadd.f32 1.0, %v9615_v45  ;;  %v9617_v47 = vpop.eup %9616  ;;  %v4182_v45 = vld [vmem:[#allocation3 + $0x3] sm:$0x1] }
 0xb02   : > { %v3711_v48 = vadd.f32 1.0, %v9617_v47 }
 0xb03   : > { %9618 = vrcp.f32 %v3703_v46 }
 0xb04   : > { %9620 = vrcp.f32 %v3711_v48 }
 0xb0d   : > { %v9619_v49 = vpop.eup %9618 }
 0xb0e   : > { %v3715_v51 = vmul.f32 %v9619_v49, %v3695_v40  ;;  %v9621_v55 = vpop.eup %9620 }
 0xb0f   : > { %v3718_v56 = vsub.f32 1.0, %v9621_v55  ;;  %v3720_v59 = vmul.f32 %v9621_v55, %v3483_v20 }
 0xb10   : > { %v3716_v54 = vadd.f32 %v3715_v51, %v3714_v53 }
 0xb12   : > { %9622 = vtanh.f32 %v3716_v54 }
 0xb1c   : > { %v9623_v57 = vpop.eup %9622 }
 0xb1d   : > { %v3719_v58 = vmul.f32 %v9623_v57, %v3718_v56 }
 0xb1f   : > { %v3721_v61 = vadd.f32 %v3720_v59, %v3719_v58  ;;  %v4190_v58 = vld [vmem:[#allocation4 + $0x3] sm:$0x1] }
 0xb21   : > { %3722 = vst.msk [vmem:[#allocation5 + $0x1] sm:$0x1] %vm1305_vm2, %v3721_v61  ;;  %8574 = vmatmul.mubr.msk.f32.vlgmr.msra.gmra.mrb[36].mxu0 %vm806_vm1, %v3721_v61  ;;  %8585 = vmatmul.mubr.msk.f32.vlgmr.msra.gmra.mrb[36].mxu1 %vm806_vm1, %v3721_v61 }
 0xb22   : > { %9226 = vmatpush3.bf16.msra.mxu0 %v10675_v37  ;;  %8595 = vmatprep.mubr.msk.f32.mxu0 %vm9965_vm0, %v9966_v1 }
 0xb23   : > { %9227 = vmatprep.subr.bf16.mxu0 %v9964_v0  ;;  %9232 = vmatpush3.bf16.msra.mxu1 %v10633_v19 }
 0xb24   : > { %9233 = vmatprep.subr.bf16.mxu1 %v9964_v0  ;;  %8606 = vmatprep.mubr.msk.f32.mxu1 %vm9965_vm0, %v9966_v1 }
 0xb26   : > { %9229 = vmatpush3.bf16.msra.mxu0 %v10692_v42 }
 0xb27   : > { %9236 = vmatprep.subr.bf16.mxu0 %v9964_v0  ;;  %9235 = vmatpush3.bf16.msra.mxu1 %v10644_v26 }
 0xb28   : > { %9242 = vmatprep.subr.bf16.mxu1 %v9964_v0 }
 0xb29   : > { %8596 = vmatmul.mubr.msk.f32.vlgmr.msra.gmra.mrb[38].mxu0 %vm806_vm1, %v3721_v61 }
 0xb2a   : > { %9238 = vmatpush3.bf16.msra.mxu0 %v10665_v32  ;;  %8617 = vmatprep.mubr.msk.f32.mxu0 %vm9965_vm0, %v9966_v1 }
 0xb2b   : > { %9239 = vmatprep.subr.bf16.mxu0 %v9964_v0 }
 0xb2e   : > { %9241 = vmatpush3.bf16.msra.mxu0 %v10686_v41 }
 0xb2f   : > { %9248 = vmatprep.subr.bf16.mxu0 %v9964_v0 }
 0xbf4   : > { %v3792_v62 = vpop.f32.mrb[36].mxu0  ;;  %v3862_v2 = vpop.f32.mrb[36].mxu1 }
 0xbf5   : > { %v3793_v3 = vadd.f32 %v10729_v52, %v3792_v62  ;;  %v8575_v4 = vpop.f32.mrb[37].mxu0  ;;  %v8586_v5 = vpop.f32.mrb[37].mxu1  ;;  %v3863_v7 = vadd.f32 %v10736_v63, %v3862_v2 }
 0xbf7   : > { %v3937_v50 = vadd.f32 %v3936_v6, %v3793_v3  ;;  %v3945_v60 = vadd.f32 %v3944_v8, %v3863_v7 }
 0xbf9   : > { %v7703_v22 = vmul.f32 -1.442695, %v3937_v50  ;;  %v7704_v12 = vmul.f32 -1.442695, %v3945_v60  ;;  %v4412_v60 = vld [vmem:[#allocation2 + $0x4] sm:$0x1] }
 0xbfb   : > { %9624 = vpow2.f32 %v7703_v22 }
 0xbfc   : > { %v3932_v28 = vpop.f32.mrb[38].mxu0  ;;  %9626 = vpow2.f32 %v7704_v12 }
 0xbfd   : > { %v8597_v11 = vpop.f32.mrb[39].mxu0  ;;  %v3933_v16 = vadd.f32 %v10742_v9, %v3932_v28 }
 0xc05   : > { %v9625_v13 = vpop.eup %9624 }
 0xc06   : > { %v3941_v14 = vadd.f32 1.0, %v9625_v13  ;;  %v9627_v33 = vpop.eup %9626  ;;  %v4420_v13 = vld [vmem:[#allocation3 + $0x4] sm:$0x1] }
 0xc07   : > { %v3949_v15 = vadd.f32 1.0, %v9627_v33 }
 0xc08   : > { %9628 = vrcp.f32 %v3941_v14 }
 0xc09   : > { %9630 = vrcp.f32 %v3949_v15 }
 0xc12   : > { %v9629_v10 = vpop.eup %9628 }
 0xc13   : > { %v3953_v17 = vmul.f32 %v9629_v10, %v3933_v16  ;;  %v9631_v20 = vpop.eup %9630 }
 0xc14   : > { %v3956_v21 = vsub.f32 1.0, %v9631_v20  ;;  %v3958_v25 = vmul.f32 %v9631_v20, %v3721_v61 }
 0xc15   : > { %v3954_v39 = vadd.f32 %v3953_v17, %v3952_v18 }
 0xc17   : > { %9632 = vtanh.f32 %v3954_v39 }
 0xc21   : > { %v9633_v23 = vpop.eup %9632 }
 0xc22   : > { %v3957_v24 = vmul.f32 %v9633_v23, %v3956_v21 }
 0xc24   : > { %v3959_v27 = vadd.f32 %v3958_v25, %v3957_v24  ;;  %v4428_v24 = vld [vmem:[#allocation4 + $0x4] sm:$0x1] }
 0xc26   : > { %3960 = vst.msk [vmem:[#allocation5 + $0x2] sm:$0x1] %vm1305_vm2, %v3959_v27  ;;  %8607 = vmatmul.mubr.msk.f32.vlgmr.msra.gmra.mrb[38].mxu1 %vm806_vm1, %v3959_v27  ;;  %8618 = vmatmul.mubr.msk.f32.vlgmr.msra.gmra.mrb[40].mxu0 %vm806_vm1, %v3959_v27 }
 0xc27   : > { %9244 = vmatpush3.bf16.msra.mxu1 %v10675_v37  ;;  %8628 = vmatprep.mubr.msk.f32.mxu1 %vm9965_vm0, %v9966_v1 }
 0xc28   : > { %9245 = vmatprep.subr.bf16.mxu1 %v9964_v0  ;;  %9250 = vmatpush3.bf16.msra.mxu0 %v10633_v19 }
 0xc29   : > { %9251 = vmatprep.subr.bf16.mxu0 %v9964_v0  ;;  %8639 = vmatprep.mubr.msk.f32.mxu0 %vm9965_vm0, %v9966_v1 }
 0xc2b   : > { %9247 = vmatpush3.bf16.msra.mxu1 %v10692_v42 }
 0xc2c   : > { %9254 = vmatprep.subr.bf16.mxu1 %v9964_v0  ;;  %9253 = vmatpush3.bf16.msra.mxu0 %v10644_v26 }
 0xc2d   : > { %9260 = vmatprep.subr.bf16.mxu0 %v9964_v0 }
 0xc2e   : > { %8629 = vmatmul.mubr.msk.f32.vlgmr.msra.gmra.mrb[40].mxu1 %vm806_vm1, %v3959_v27 }
 0xc2f   : > { %9256 = vmatpush3.bf16.msra.mxu1 %v10665_v32  ;;  %8650 = vmatprep.mubr.msk.f32.mxu1 %vm9965_vm0, %v9966_v1 }
 0xc30   : > { %9257 = vmatprep.subr.bf16.mxu1 %v9964_v0 }
 0xc33   : > { %9259 = vmatpush3.bf16.msra.mxu1 %v10686_v41 }
 0xc34   : > { %9266 = vmatprep.subr.bf16.mxu1 %v9964_v0 }
 0xcf9   : > { %v4030_v29 = vpop.f32.mrb[38].mxu1  ;;  %v4100_v30 = vpop.f32.mrb[40].mxu0 }
 0xcfa   : > { %v4031_v31 = vadd.f32 %v10729_v52, %v4030_v29  ;;  %v8608_v34 = vpop.f32.mrb[39].mxu1  ;;  %v8619_v35 = vpop.f32.mrb[41].mxu0  ;;  %v4101_v36 = vadd.f32 %v10736_v63, %v4100_v30 }
 0xcfc   : > { %v4175_v43 = vadd.f32 %v4174_v38, %v4031_v31  ;;  %v4183_v46 = vadd.f32 %v4182_v45, %v4101_v36 }
 0xcfe   : > { %v7708_v44 = vmul.f32 -1.442695, %v4175_v43  ;;  %v7709_v40 = vmul.f32 -1.442695, %v4183_v46  ;;  %v4650_v46 = vld [vmem:[#allocation2 + $0x5] sm:$0x1] }
 0xd00   : > { %9634 = vpow2.f32 %v7708_v44 }
 0xd01   : > { %v4170_v47 = vpop.f32.mrb[40].mxu1  ;;  %9636 = vpow2.f32 %v7709_v40 }
 0xd02   : > { %v8630_v48 = vpop.f32.mrb[41].mxu1  ;;  %v4171_v55 = vadd.f32 %v10742_v9, %v4170_v47 }
 0xd0a   : > { %v9635_v49 = vpop.eup %9634 }
 0xd0b   : > { %v4179_v51 = vadd.f32 1.0, %v9635_v49  ;;  %v9637_v53 = vpop.eup %9636  ;;  %v4658_v49 = vld [vmem:[#allocation3 + $0x5] sm:$0x1] }
 0xd0c   : > { %v4187_v54 = vadd.f32 1.0, %v9637_v53 }
 0xd0d   : > { %9638 = vrcp.f32 %v4179_v51 }
 0xd0e   : > { %9640 = vrcp.f32 %v4187_v54 }
 0xd17   : > { %v9639_v56 = vpop.eup %9638 }
 0xd18   : > { %v4191_v57 = vmul.f32 %v9639_v56, %v4171_v55  ;;  %v9641_v61 = vpop.eup %9640 }
 0xd19   : > { %v4194_v62 = vsub.f32 1.0, %v9641_v61  ;;  %v4196_v4 = vmul.f32 %v9641_v61, %v3959_v27 }
 0xd1a   : > { %v4192_v59 = vadd.f32 %v4191_v57, %v4190_v58 }
 0xd1c   : > { %9642 = vtanh.f32 %v4192_v59 }
 0xd26   : > { %v9643_v2 = vpop.eup %9642 }
 0xd27   : > { %v4195_v3 = vmul.f32 %v9643_v2, %v4194_v62 }
 0xd29   : > { %v4197_v5 = vadd.f32 %v4196_v4, %v4195_v3  ;;  %v4666_v3 = vld [vmem:[#allocation4 + $0x5] sm:$0x1] }
 0xd2b   : > { %4198 = vst.msk [vmem:[#allocation5 + $0x3] sm:$0x1] %vm1305_vm2, %v4197_v5  ;;  %8640 = vmatmul.mubr.msk.f32.vlgmr.msra.gmra.mrb[42].mxu0 %vm806_vm1, %v4197_v5  ;;  %8651 = vmatmul.mubr.msk.f32.vlgmr.msra.gmra.mrb[42].mxu1 %vm806_vm1, %v4197_v5 }
 0xd2c   : > { %9262 = vmatpush3.bf16.msra.mxu0 %v10675_v37  ;;  %8661 = vmatprep.mubr.msk.f32.mxu0 %vm9965_vm0, %v9966_v1 }
 0xd2d   : > { %9263 = vmatprep.subr.bf16.mxu0 %v9964_v0  ;;  %9268 = vmatpush3.bf16.msra.mxu1 %v10633_v19 }
 0xd2e   : > { %9269 = vmatprep.subr.bf16.mxu1 %v9964_v0  ;;  %8672 = vmatprep.mubr.msk.f32.mxu1 %vm9965_vm0, %v9966_v1 }
 0xd30   : > { %9265 = vmatpush3.bf16.msra.mxu0 %v10692_v42 }
 0xd31   : > { %9272 = vmatprep.subr.bf16.mxu0 %v9964_v0  ;;  %9271 = vmatpush3.bf16.msra.mxu1 %v10644_v26 }
 0xd32   : > { %9278 = vmatprep.subr.bf16.mxu1 %v9964_v0 }
 0xd33   : > { %8662 = vmatmul.mubr.msk.f32.vlgmr.msra.gmra.mrb[44].mxu0 %vm806_vm1, %v4197_v5 }
 0xd34   : > { %9274 = vmatpush3.bf16.msra.mxu0 %v10665_v32  ;;  %8683 = vmatprep.mubr.msk.f32.mxu0 %vm9965_vm0, %v9966_v1 }
 0xd35   : > { %9275 = vmatprep.subr.bf16.mxu0 %v9964_v0 }
 0xd38   : > { %9277 = vmatpush3.bf16.msra.mxu0 %v10686_v41 }
 0xd39   : > { %9284 = vmatprep.subr.bf16.mxu0 %v9964_v0 }
 0xdfe   : > { %v4268_v6 = vpop.f32.mrb[42].mxu0  ;;  %v4338_v7 = vpop.f32.mrb[42].mxu1 }
 0xdff   : > { %v4269_v50 = vadd.f32 %v10729_v52, %v4268_v6  ;;  %v8641_v22 = vpop.f32.mrb[43].mxu0  ;;  %v8652_v8 = vpop.f32.mrb[43].mxu1  ;;  %v4339_v28 = vadd.f32 %v10736_v63, %v4338_v7 }
 0xe01   : > { %v4413_v11 = vadd.f32 %v4412_v60, %v4269_v50  ;;  %v4421_v14 = vadd.f32 %v4420_v13, %v4339_v28  ;;  %v9967_v28 = vmov 0  }
 0xe03   : > { %v7713_v12 = vmul.f32 -1.442695, %v4413_v11  ;;  %v7714_v16 = vmul.f32 -1.442695, %v4421_v14 }
 0xe05   : > { %9644 = vpow2.f32 %v7713_v12 }
 0xe06   : > { %v4408_v33 = vpop.f32.mrb[44].mxu0  ;;  %9646 = vpow2.f32 %v7714_v16  ;;  %v5651_v16 = vld [vmem:[#allocation9 + $0xa0] sm:$0xff] }
 0xe07   : > { %v8663_v15 = vpop.f32.mrb[45].mxu0  ;;  %v4409_v20 = vadd.f32 %v10742_v9, %v4408_v33 }
 0xe0f   : > { %v9645_v10 = vpop.eup %9644 }
 0xe10   : > { %v4417_v17 = vadd.f32 1.0, %v9645_v10  ;;  %v9647_v18 = vpop.eup %9646 }
 0xe11   : > { %v4425_v39 = vadd.f32 1.0, %v9647_v18 }
 0xe12   : > { %9648 = vrcp.f32 %v4417_v17 }
 0xe13   : > { %9650 = vrcp.f32 %v4425_v39 }
 0xe1c   : > { %v9649_v21 = vpop.eup %9648 }
 0xe1d   : > { %v4429_v23 = vmul.f32 %v9649_v21, %v4409_v20  ;;  %v9651_v27 = vpop.eup %9650 }
 0xe1e   : > { %v4432_v29 = vsub.f32 1.0, %v9651_v27  ;;  %v4434_v34 = vmul.f32 %v9651_v27, %v4197_v5 }
 0xe1f   : > { %v4430_v25 = vadd.f32 %v4429_v23, %v4428_v24  ;;  %v4888_v23 = vld [vmem:[#allocation2 + $0x6] sm:$0x1] }
 0xe21   : > { %9652 = vtanh.f32 %v4430_v25 }
 0xe2b   : > { %v9653_v30 = vpop.eup %9652 }
 0xe2c   : > { %v4433_v31 = vmul.f32 %v9653_v30, %v4432_v29  ;;  %v4896_v29 = vld [vmem:[#allocation3 + $0x6] sm:$0x1] }
 0xe2e   : > { %v4435_v35 = vadd.f32 %v4434_v34, %v4433_v31 }
 0xe30   : > { %4436 = vst.msk [vmem:[#allocation5 + $0x4] sm:$0x1] %vm1305_vm2, %v4435_v35  ;;  %8673 = vmatmul.mubr.msk.f32.vlgmr.msra.gmra.mrb[44].mxu1 %vm806_vm1, %v4435_v35  ;;  %8684 = vmatmul.mubr.msk.f32.vlgmr.msra.gmra.mrb[46].mxu0 %vm806_vm1, %v4435_v35 }
 0xe31   : > { %9280 = vmatpush3.bf16.msra.mxu1 %v10675_v37  ;;  %8694 = vmatprep.mubr.msk.f32.mxu1 %vm9965_vm0, %v9966_v1 }
 0xe32   : > { %9281 = vmatprep.subr.bf16.mxu1 %v9964_v0  ;;  %9286 = vmatpush3.bf16.msra.mxu0 %v10633_v19 }
 0xe33   : > { %9287 = vmatprep.subr.bf16.mxu0 %v9964_v0  ;;  %8705 = vmatprep.mubr.msk.f32.mxu0 %vm9965_vm0, %v9966_v1 }
 0xe35   : > { %9283 = vmatpush3.bf16.msra.mxu1 %v10692_v42 }
 0xe36   : > { %9290 = vmatprep.subr.bf16.mxu1 %v9964_v0  ;;  %9289 = vmatpush3.bf16.msra.mxu0 %v10644_v26 }
 0xe37   : > { %9296 = vmatprep.subr.bf16.mxu0 %v9964_v0 }
 0xe38   : > { %8695 = vmatmul.mubr.msk.f32.vlgmr.msra.gmra.mrb[46].mxu1 %vm806_vm1, %v4435_v35 }
 0xe39   : > { %9292 = vmatpush3.bf16.msra.mxu1 %v10665_v32  ;;  %8716 = vmatprep.mubr.msk.f32.mxu1 %vm9965_vm0, %v9966_v1 }
 0xe3a   : > { %9293 = vmatprep.subr.bf16.mxu1 %v9964_v0 }
 0xe3d   : > { %9295 = vmatpush3.bf16.msra.mxu1 %v10686_v41 }
 0xe3e   : > { %9302 = vmatprep.subr.bf16.mxu1 %v9964_v0 }
 0xf03   : > { %v4506_v38 = vpop.f32.mrb[44].mxu1  ;;  %v4576_v36 = vpop.f32.mrb[46].mxu0 }
 0xf04   : > { %v4507_v43 = vadd.f32 %v10729_v52, %v4506_v38  ;;  %v8674_v44 = vpop.f32.mrb[45].mxu1  ;;  %v8685_v45 = vpop.f32.mrb[47].mxu0  ;;  %v4577_v47 = vadd.f32 %v10736_v63, %v4576_v36 }
 0xf06   : > { %v4651_v48 = vadd.f32 %v4650_v46, %v4507_v43  ;;  %v4659_v51 = vadd.f32 %v4658_v49, %v4577_v47 }
 0xf08   : > { %v7718_v40 = vmul.f32 -1.442695, %v4651_v48  ;;  %v7719_v55 = vmul.f32 -1.442695, %v4659_v51  ;;  %v4904_v48 = vld [vmem:[#allocation4 + $0x6] sm:$0x1] }
 0xf0a   : > { %9654 = vpow2.f32 %v7718_v40 }
 0xf0b   : > { %v4646_v53 = vpop.f32.mrb[46].mxu1  ;;  %9656 = vpow2.f32 %v7719_v55 }
 0xf0c   : > { %v8696_v54 = vpop.f32.mrb[47].mxu1  ;;  %v4647_v61 = vadd.f32 %v10742_v9, %v4646_v53 }
 0xf14   : > { %v9655_v56 = vpop.eup %9654 }
 0xf15   : > { %v4655_v57 = vadd.f32 1.0, %v9655_v56  ;;  %v9657_v58 = vpop.eup %9656 }
 0xf16   : > { %v4663_v59 = vadd.f32 1.0, %v9657_v58 }
 0xf17   : > { %9658 = vrcp.f32 %v4655_v57  ;;  %v5153_v57 = vld [vmem:[#allocation9] sm:$0xff] }
 0xf18   : > { %9660 = vrcp.f32 %v4663_v59  ;;  %v5238_v59 = vld [vmem:[#allocation9 + $0x80] sm:$0xff] }
 0xf21   : > { %v9659_v62 = vpop.eup %9658 }
 0xf22   : > { %v4667_v2 = vmul.f32 %v9659_v62, %v4647_v61  ;;  %v9661_v5 = vpop.eup %9660  ;;  %v5239_v61 = vld [vmem:[#allocation9 + $0x88] sm:$0xff] }
 0xf23   : > { %v4670_v6 = vsub.f32 1.0, %v9661_v5  ;;  %v4672_v22 = vmul.f32 %v9661_v5, %v4435_v35  ;;  %v9327_v62 = vpack.c.bf16 %v5239_v61, %v5238_v59  ;;  %v5241_v5 = vld [vmem:[#allocation9 + $0x98] sm:$0xff]  ;;  %v5734_v59 = vld [vmem:[#allocation9 + $0x120] sm:$0xff]  ;;  %v5735_v61 = vld [vmem:[#allocation9 + $0x128] sm:$0xff] }
 0xf24   : > { %v4668_v4 = vadd.f32 %v4667_v2, %v4666_v3  ;;  %v5155_v2 = vld [vmem:[#allocation9 + $0x10] sm:$0xff] }
 0xf25   : > { %v5240_v3 = vld [vmem:[#allocation9 + $0x90] sm:$0xff] }
 0xf26   : > { %9662 = vtanh.f32 %v4668_v4 }
 0xf30   : > { %v9663_v7 = vpop.eup %9662 }
 0xf31   : > { %v4671_v50 = vmul.f32 %v9663_v7, %v4670_v6  ;;  %v9330_v6 = vpack.c.bf16 %v5241_v5, %v5240_v3 }
 0xf33   : > { %v10870_v8 = vadd.f32 %v4672_v22, %v4671_v50 }
 0xf35   : > { %4674 = vst.msk [vmem:[#allocation5 + $0x5] sm:$0x1] %vm1305_vm2, %v10870_v8  ;;  %8706 = vmatmul.mubr.msk.f32.vlgmr.msra.gmra.mrb[48].mxu0 %vm806_vm1, %v10870_v8  ;;  %8717 = vmatmul.mubr.msk.f32.vlgmr.msra.gmra.mrb[48].mxu1 %vm806_vm1, %v10870_v8 }
 0xf36   : > { %9298 = vmatpush3.bf16.msra.mxu0 %v10675_v37  ;;  %8727 = vmatprep.mubr.msk.f32.mxu0 %vm9965_vm0, %v9966_v1 }
 0xf37   : > { %9299 = vmatprep.subr.bf16.mxu0 %v9964_v0  ;;  %9304 = vmatpush3.bf16.msra.mxu1 %v10633_v19  ;;  %v776_v19 = vlaneseq }
 0xf38   : > { %9305 = vmatprep.subr.bf16.mxu1 %v9964_v0  ;;  %8738 = vmatprep.mubr.msk.f32.mxu1 %vm9965_vm0, %v9966_v1 }
 0xf39   : > { %v10902_v60 = vshrl.u32 %v776_v19, 7 }
 0xf3a   : > { %9301 = vmatpush3.bf16.msra.mxu0 %v10692_v42 }
 0xf3b   : > { %9308 = vmatprep.subr.bf16.mxu0 %v9964_v0  ;;  %9307 = vmatpush3.bf16.msra.mxu1 %v10644_v26  ;;  %v757_v26 = vld [vmem:[%s749_s18] sm:$0x1]  ;;  %v780_v13 = vsub.s32 0, %v10902_v60  ;;  %s746_s18 = scalar_lea.vmem [#allocation17], %s7611_s28  ;;  %s9880_s28 = sshll.u32 %s9970_s3, 4  ;;  %s9881_s28 = int_to_ptr.vmem [resolvable:$false] %s9880_s28 }
 0xf3c   : > { %9314 = vmatprep.subr.bf16.mxu1 %v9964_v0  ;;  %vm758_vm4 = vcmp.ne.s32.totalorder %v757_v26, 0  ;;  %v5126_v26 = vld [vmem:[#allocation2 + $0x7] sm:$0x1]  ;;  %s7467_s21 = sshll.u32 %s746_s18, 4  ;;  %s9882_s2 = scalar_lea.vmem %s9881_s28, 256  ;;  %s11172_s21 = int_to_ptr.vmem [resolvable:$true] %s7467_s21 }
 0xf3d   : > { %8728 = vmatmul.mubr.msk.f32.vlgmr.msra.gmra.mrb[50].mxu0 %vm806_vm1, %v10870_v8  ;;  %v759_v11 = vsel %vm758_vm4, 1, %v9967_v28  ;;  %p9883_p5 = scmp.lt.s32.totalorder %s11172_s21, %s9881_s28 }
 0xf3e   : > { %9310 = vmatpush3.bf16.msra.mxu0 %v10665_v32  ;;  %8749 = vmatprep.mubr.msk.f32.mxu0 %vm9965_vm0, %v9966_v1  ;;  %v786_v32 = vand.u32 127, %v776_v19  ;;  %v761_v12 = vsel %vm760_vm3, %v759_v11, 0  ;;  %v791_v33 = vrot.slane %v759_v11, %v780_v13 }
 0xf3f   : > { %9311 = vmatprep.subr.bf16.mxu0 %v9964_v0  ;;  %v763_v14 = vshrl.u32 %v761_v12, 16 }
 0xf40   : > { %vm787_vm5 = vcmp.le.s32.totalorder %v786_v32, %v10902_v60  ;;  %vm792_vm6 = vcmp.eq.s32.totalorder %v791_v33, 1 }
 0xf41   : > { %v765_v15 = vcvt.s32.f32 %v763_v14  ;;  %vm10908_vm7 = vmand %vm787_vm5, %vm792_vm6 }
 0xf42   : > { %9313 = vmatpush3.bf16.msra.mxu0 %v10686_v41  ;;  %v762_v41 = vand.u32 65535, %v761_v12  ;;  %v5134_v12 = vld [vmem:[#allocation3 + $0x7] sm:$0x1] }
 0xf43   : > { %9320 = vmatprep.subr.bf16.mxu0 %v9964_v0  ;;  %768 = vadd.xlane.f32.xlu0 %v765_v15 }
 0xf44   : > { %v764_v10 = vcvt.s32.f32 %v762_v41 }
 0xf47   : > { %766 = vadd.xlane.f32.xlu0 %v764_v10 }
0x1008   : > { %v4744_v17 = vpop.f32.mrb[48].mxu0  ;;  %v4814_v18 = vpop.f32.mrb[48].mxu1 }
0x1009   : > { %v4745_v39 = vadd.f32 %v10729_v52, %v4744_v17  ;;  %v8707_v20 = vpop.f32.mrb[49].mxu0  ;;  %v8718_v21 = vpop.f32.mrb[49].mxu1  ;;  %v4815_v24 = vadd.f32 %v10736_v63, %v4814_v18 }
0x100b   : > { %v4889_v25 = vadd.f32 %v4888_v23, %v4745_v39  ;;  %v4897_v30 = vadd.f32 %v4896_v29, %v4815_v24  ;;  %v5142_v23 = vld [vmem:[#allocation4 + $0x7] sm:$0x1] }
0x100d   : > { %v7723_v27 = vmul.f32 -1.442695, %v4889_v25  ;;  %v7724_v35 = vmul.f32 -1.442695, %v4897_v30 }
0x100f   : > { %9664 = vpow2.f32 %v7723_v27 }
0x1010   : > { %v4884_v31 = vpop.f32.mrb[50].mxu0  ;;  %9666 = vpow2.f32 %v7724_v35 }
0x1011   : > { %v8729_v34 = vpop.f32.mrb[51].mxu0  ;;  %v4885_v45 = vadd.f32 %v10742_v9, %v4884_v31 }
0x1019   : > { %v9665_v38 = vpop.eup %9664 }
0x101a   : > { %v4893_v36 = vadd.f32 1.0, %v9665_v38  ;;  %v9667_v43 = vpop.eup %9666 }
0x101b   : > { %v4901_v44 = vadd.f32 1.0, %v9667_v43 }
0x101c   : > { %9668 = vrcp.f32 %v4893_v36 }
0x101d   : > { %9670 = vrcp.f32 %v4901_v44 }
0x1026   : > { %v9669_v46 = vpop.eup %9668 }
0x1027   : > { %v4905_v47 = vmul.f32 %v9669_v46, %v4885_v45  ;;  %v9671_v49 = vpop.eup %9670  ;;  %v5321_v46 = vld [vmem:[#allocation9 + $0x100] sm:$0xff] }
0x1028   : > { %v4908_v51 = vsub.f32 1.0, %v9671_v49  ;;  %v4910_v55 = vmul.f32 %v9671_v49, %v10870_v8 }
0x1029   : > { %v4906_v40 = vadd.f32 %v4905_v47, %v4904_v48  ;;  %v5322_v47 = vld [vmem:[#allocation9 + $0x108] sm:$0xff] }
0x102a   : > { %v9333_v49 = vpack.c.bf16 %v5322_v47, %v5321_v46  ;;  %v7742_v46 = vld [vmem:[%s11220_s8 + $0x1] ss:$0 sm:$0xff] }
0x102b   : > { %9672 = vtanh.f32 %v4906_v40 }
0x1035   : > { %v9673_v53 = vpop.eup %9672 }
0x1036   : > { %v4909_v54 = vmul.f32 %v9673_v53, %v4908_v51  ;;  %v5323_v53 = vld [vmem:[#allocation9 + $0x110] sm:$0xff] }
0x1038   : > { %v10916_v56 = vadd.f32 %v4910_v55, %v4909_v54  ;;  %v5324_v54 = vld [vmem:[#allocation9 + $0x118] sm:$0xff]  ;;  %v5569_v55 = vld [vmem:[#allocation9 + $0x28] sm:$0xff] }
0x103a   : > { %4912 = vst.msk [vmem:[#allocation5 + $0x6] sm:$0x1] %vm1305_vm2, %v10916_v56  ;;  %8739 = vmatmul.mubr.msk.f32.vlgmr.msra.gmra.mrb[50].mxu1 %vm806_vm1, %v10916_v56  ;;  %8750 = vmatmul.mubr.msk.f32.vlgmr.msra.gmra.mrb[52].mxu0 %vm806_vm1, %v10916_v56 }
0x103b   : > { %9316 = vmatpush3.bf16.msra.mxu1 %v10675_v37  ;;  %8760 = vmatprep.mubr.msk.f32.mxu1 %vm9965_vm0, %v9966_v1  ;;  %v5154_v37 = vld [vmem:[#allocation9 + $0x8] sm:$0xff] }
0x103c   : > { %9317 = vmatprep.subr.bf16.mxu1 %v9964_v0  ;;  %8771 = vmatprep.mubr.msk.f32.mxu0 %vm9965_vm0, %v9966_v1  ;;  %v9321_v58 = vpack.c.bf16 %v5154_v37, %v5153_v57  ;;  %v5570_v57 = vld [vmem:[#allocation9 + $0x30] sm:$0xff]  ;;  %v5571_v37 = vld [vmem:[#allocation9 + $0x38] sm:$0xff] }
0x103e   : > { %9322 = vmatpush3.bf16.msra.mxu0 %v9321_v58  ;;  %v9342_v58 = vpack.c.bf16 %v5571_v37, %v5570_v57 }
0x103f   : > { %9319 = vmatpush3.bf16.msra.mxu1 %v10692_v42  ;;  %9323 = vmatprep.subr.bf16.mxu0 %v9964_v0  ;;  %v5156_v42 = vld [vmem:[#allocation9 + $0x18] sm:$0xff] }
0x1040   : > { %9326 = vmatprep.subr.bf16.mxu1 %v9964_v0  ;;  %v9324_v4 = vpack.c.bf16 %v5156_v42, %v5155_v2  ;;  %v5736_v2 = vld [vmem:[#allocation9 + $0x130] sm:$0xff]  ;;  %v5737_v42 = vld [vmem:[#allocation9 + $0x138] sm:$0xff] }
0x1041   : > { %v9354_v3 = vpack.c.bf16 %v5737_v42, %v5736_v2 }
0x1042   : > { %8761 = vmatmul.mubr.msk.f32.vlgmr.msra.gmra.mrb[52].mxu1 %vm806_vm1, %v10916_v56  ;;  %9325 = vmatpush3.bf16.msra.mxu0 %v9324_v4  ;;  %v7733_v4 = vld [vmem:[%s11220_s8 + $0x4] ss:$0 sm:$0xff] }
0x1043   : > { %8782 = vmatprep.mubr.msk.f32.mxu1 %vm9965_vm0, %v9966_v1  ;;  %9328 = vmatpush3.bf16.msra.mxu1 %v9327_v62  ;;  %v9351_v62 = vpack.c.bf16 %v5735_v61, %v5734_v59 }
0x1044   : > { %9329 = vmatprep.subr.bf16.mxu1 %v9964_v0  ;;  %9332 = vmatprep.subr.bf16.mxu0 %v9964_v0 }
0x1047   : > { %9331 = vmatpush3.bf16.msra.mxu1 %v9330_v6 }
0x1048   : > { %8796 = vmatprep.subr.mxu1 %v9966_v1 }
0x110d   : > { %v4982_v7 = vpop.f32.mrb[50].mxu1  ;;  %v5052_v50 = vpop.f32.mrb[52].mxu0 }
0x110e   : > { %v4983_v22 = vadd.f32 %v10729_v52, %v4982_v7  ;;  %v8740_v8 = vpop.f32.mrb[51].mxu1  ;;  %v8751_v19 = vpop.f32.mrb[53].mxu0  ;;  %v5053_v32 = vadd.f32 %v10736_v63, %v5052_v50  ;;  %v7730_v7 = vld [vmem:[%s11220_s8] ss:$0 sm:$0xff] }
0x110f   : > { %v769_v52 = vpop.xlane.xlu0 %768 }
0x1110   : > { %v5127_v28 = vadd.f32 %v5126_v26, %v4983_v22  ;;  %v5135_v14 = vadd.f32 %v5134_v12, %v5053_v32  ;;  %v771_v24 = vcvt.f32.s32 %v769_v52  ;;  %v7736_v26 = vld [vmem:[%s11220_s8 + $0x8] ss:$0 sm:$0xff] }
0x1112   : > { %v7728_v11 = vmul.f32 -1.442695, %v5127_v28  ;;  %v7729_v15 = vmul.f32 -1.442695, %v5135_v14  ;;  %v772_v29 = vshll.u32 %v771_v24, 16 }
0x1113   : > { %v767_v27 = vpop.xlane.xlu0 %766 }
0x1114   : > { %9674 = vpow2.f32 %v7728_v11  ;;  %v770_v30 = vcvt.f32.s32 %v767_v27 }
0x1115   : > { %v5122_v41 = vpop.f32.mrb[52].mxu1  ;;  %9676 = vpow2.f32 %v7729_v15 }
0x1116   : > { %v8762_v33 = vpop.f32.mrb[53].mxu1  ;;  %v5123_v20 = vadd.f32 %v10742_v9, %v5122_v41  ;;  %v773_v31 = vadd.s32 %v772_v29, %v770_v30  ;;  %v5652_v29 = vld [vmem:[#allocation9 + $0xa8] sm:$0xff] }
0x1118   : > { %vm774_vm8 = vcmp.gt.s32.totalorder %v773_v31, 1 }
0x1119   : > { %v775_v44 = vsel %vm774_vm8, %v773_v31, 1  ;;  %v9345_v31 = vpack.c.bf16 %v5652_v29, %v5651_v16 }
0x111a   : > { %v781_v45 = vrot.slane %v775_v44, %v780_v13  ;;  %v9336_v13 = vpack.c.bf16 %v5324_v54, %v5323_v53 }
0x111c   : > { %vm782_vm9 = vcmp.lt.s32.totalorder %v10902_v60, %v781_v45  ;;  %v5568_v60 = vld [vmem:[#allocation9 + $0x20] sm:$0xff] }
0x111d   : > { %v7613_v48 = vsel %vm782_vm9, 1.0, %v9966_v1 }
0x111e   : > { %v9675_v10 = vpop.eup %9674 }
0x111f   : > { %v5131_v17 = vadd.f32 1.0, %v9675_v10  ;;  %v9677_v18 = vpop.eup %9676  ;;  %v9968_v10 = vmov -1e+30  }
0x1120   : > { %v5139_v39 = vadd.f32 1.0, %v9677_v18 }
0x1121   : > { %9678 = vrcp.f32 %v5131_v17  ;;  %v10994_v17 = vsel %vm10908_vm7, 0.0, %v9968_v10 }
0x1122   : > { %9680 = vrcp.f32 %v5139_v39 }
0x112b   : > { %v9679_v21 = vpop.eup %9678 }
0x112c   : > { %v5143_v63 = vmul.f32 %v9679_v21, %v5123_v20  ;;  %v9681_v34 = vpop.eup %9680 }
0x112d   : > { %v5146_v35 = vsub.f32 1.0, %v9681_v34  ;;  %v5148_v36 = vmul.f32 %v9681_v34, %v10916_v56  ;;  %v9339_v56 = vpack.c.bf16 %v5569_v55, %v5568_v60 }
0x112e   : > { %v5144_v25 = vadd.f32 %v5143_v63, %v5142_v23 }
0x1130   : > { %9682 = vtanh.f32 %v5144_v25 }
0x113a   : > { %v9683_v38 = vpop.eup %9682 }
0x113b   : > { %v5147_v43 = vmul.f32 %v9683_v38, %v5146_v35  ;;  %v5653_v35 = vld [vmem:[#allocation9 + $0xb0] sm:$0xff]  ;;  %v5654_v38 = vld [vmem:[#allocation9 + $0xb8] sm:$0xff] }
0x113d   : > { %v5149_v9 = vadd.f32 %v5148_v36, %v5147_v43  ;;  %v9348_v36 = vpack.c.bf16 %v5654_v38, %v5653_v35  ;;  %v7762_v38 = vld [vmem:[%s11220_s8 + $0xa] ss:$0 sm:$0xff] }
0x113f   : > { %5150 = vst.msk [vmem:[#allocation5 + $0x7] sm:$0x1] %vm1305_vm2, %v5149_v9  ;;  %v7745_v9 = vld [vmem:[%s11220_s8 + $0x5] ss:$0 sm:$0xff] }
0x1146   : > { %v5151_v40 = vld [vmem:[#allocation5] sm:$0xff] }
0x1147   : > { %v10949_v51 = vmul.f32 %v7613_v48, %v5151_v40  ;;  %v7748_v40 = vld [vmem:[%s11220_s8 + $0x9] ss:$0 sm:$0xff] }
0x1149   : > { %8772 = vmatmul.mubr.msk.f32.vlgmr.msra.gmra.mrb[54].mxu0 %vm806_vm1, %v10949_v51  ;;  %8783 = vmatmul.mubr.msk.f32.vlgmr.msra.gmra.mrb[54].mxu1 %vm806_vm1, %v10949_v51 }
0x114a   : > { %9334 = vmatpush3.bf16.msra.mxu0 %v9333_v49  ;;  %8793 = vmatprep.mubr.msk.f32.mxu0 %vm9965_vm0, %v9966_v1 }
0x114b   : > { %9335 = vmatprep.subr.bf16.mxu0 %v9964_v0  ;;  %8798 = vmatprep.mubr.msk.f32.mxu1 %vm9965_vm0, %v9966_v1 }
0x114e   : > { %9337 = vmatpush3.bf16.msra.mxu0 %v9336_v13 }
0x114f   : > { %9338 = vmatprep.subr.bf16.mxu0 %v9964_v0 }
0x1151   : > { %8794 = vmatmul.mubr.msk.f32.vlgmr.msra.gmra.mrb[56].mxu0 %vm806_vm1, %v10949_v51 }
0x1152   : > { %9340 = vmatpush3.bf16.msra.mxu0 %v9339_v56  ;;  %8814 = vmatprep.mubr.msk.f32.mxu0 %vm9965_vm0, %v9966_v1 }
0x1153   : > { %9341 = vmatprep.subr.bf16.mxu0 %v9964_v0 }
0x1156   : > { %9343 = vmatpush3.bf16.msra.mxu0 %v9342_v58 }
0x1157   : > { %9350 = vmatprep.subr.bf16.mxu0 %v9964_v0 }
0x1159   : > { %8815 = vmatmul.mubr.msk.f32.vlgmr.msra.gmra.mrb[58].mxu0 %vm806_vm1, %v10949_v51 }
0x115a   : > { %9352 = vmatpush3.bf16.msra.mxu0 %v9351_v62  ;;  %8836 = vmatprep.mubr.msk.f32.mxu0 %vm9965_vm0, %v9966_v1  ;;  %v5979_v62 = vld [vmem:[#allocation11 + $0x8] sm:$0xff] }
0x115b   : > { %9353 = vmatprep.subr.bf16.mxu0 %v9964_v0 }
0x115e   : > { %9355 = vmatpush3.bf16.msra.mxu0 %v9354_v3 }
0x115f   : > { %8849 = vmatprep.subr.mxu0 %v9966_v1 }
0x1161   : > { %8837 = vmatmul.mubr.msk.f32.vlgmr.msra.gmra.mrb[60].mxu0 %vm806_vm1, %v10949_v51 }
0x1162   : > { %8851 = vmatprep.mubr.msk.f32.mxu0 %vm9965_vm0, %v9966_v1  ;;  %8850 = vmatpush3.msra.mxu0 %v5979_v62  ;;  %v6617_v62 = vld [vmem:[#allocation9 + $0x78] sm:$0xff] }
0x1163   : > { %9356 = vmatprep.subr.bf16.mxu0 %v9964_v0 }
0x121c   : > { %v5233_v5 = vpop.f32.mrb[54].mxu0  ;;  %v5316_v6 = vpop.f32.mrb[54].mxu1 }
0x121d   : > { %v5317_v50 = vadd.f32 %v7733_v4, %v5316_v6  ;;  %v8773_v22 = vpop.f32.mrb[55].mxu0  ;;  %v8784_v8 = vpop.f32.mrb[55].mxu1  ;;  %v5234_v19 = vadd.f32 %v7730_v7, %v5233_v5  ;;  %v5566_v4 = vld [vmem:[#allocation11] sm:$0xff]  ;;  %v6211_v6 = vld [vmem:[#allocation9 + $0xc8] sm:$0xff] }
0x121e   : > { %v6210_v5 = vld [vmem:[#allocation9 + $0xc0] sm:$0xff]  ;;  %v6213_v22 = vld [vmem:[#allocation9 + $0xd8] sm:$0xff] }
0x121f   : > { %8797 = vmatpush3.xpose.msk.msra.mxu1 %vm5403_vm10, %v5317_v50  ;;  %v9363_v7 = vpack.c.bf16 %v6211_v6, %v6210_v5  ;;  %v6212_v50 = vld [vmem:[#allocation9 + $0xd0] sm:$0xff]  ;;  %v6783_v6 = vld [vmem:[#allocation9 + $0x178] sm:$0xff] }
0x1220   : > { %8801 = vmatprep.subr.mxu1 %v9966_v1  ;;  %v9366_v8 = vpack.c.bf16 %v6213_v22, %v6212_v50  ;;  %v6782_v5 = vld [vmem:[#allocation9 + $0x170] sm:$0xff]  ;;  %v6697_v50 = vld [vmem:[#allocation9 + $0xe0] sm:$0xff]  ;;  %v6698_v22 = vld [vmem:[#allocation9 + $0xe8] sm:$0xff] }
0x1222   : > { %8799 = vmatmul.mubr.msk.f32.vlgmr.msra.gmra.mrb[56].mxu1 %vm5403_vm10, %v5234_v19  ;;  %v6127_v19 = vld [vmem:[#allocation9 + $0x40] sm:$0xff] }
0x1223   : > { %8803 = vmatprep.mubr.msk.f32.mxu1 %vm9965_vm0, %v9966_v1 }
0x1224   : > { %v5399_v32 = vpop.f32.mrb[56].mxu0 }
0x1225   : > { %v5400_v28 = vadd.f32 %v7736_v26, %v5399_v32  ;;  %v8795_v11 = vpop.f32.mrb[57].mxu0  ;;  %v6128_v26 = vld [vmem:[#allocation9 + $0x48] sm:$0xff] }
0x1226   : > { %v9357_v32 = vpack.c.bf16 %v6128_v26, %v6127_v19  ;;  %v6130_v11 = vld [vmem:[#allocation9 + $0x58] sm:$0xff]  ;;  %v6699_v19 = vld [vmem:[#allocation9 + $0xf0] sm:$0xff] }
0x1227   : > { %8802 = vmatpush3.msra.mxu1 %v5400_v28  ;;  %v6129_v28 = vld [vmem:[#allocation9 + $0x50] sm:$0xff]  ;;  %v6700_v26 = vld [vmem:[#allocation9 + $0xf8] sm:$0xff] }
0x1228   : > { %9344 = vmatprep.subr.bf16.mxu1 %v9964_v0 }
0x122c   : > { %v5646_v12 = vpop.f32.mrb[58].mxu0 }
0x122d   : > { %v8816_v14 = vpop.f32.mrb[59].mxu0  ;;  %v5647_v49 = vadd.f32 %v7742_v46, %v5646_v12 }
0x1234   : > { %v5812_v41 = vpop.f32.mrb[60].mxu0 }
0x1235   : > { %v8838_v33 = vpop.f32.mrb[61].mxu0  ;;  %v5813_v53 = vadd.f32 %v7748_v40, %v5812_v41  ;;  %v9360_v41 = vpack.c.bf16 %v6130_v11, %v6129_v28  ;;  %v9384_v11 = vpack.c.bf16 %v6700_v26, %v6699_v19  ;;  %v7250_v26 = vld [vmem:[#allocation14] sm:$0xff] }
0x1236   : > { %v6293_v33 = vld [vmem:[#allocation9 + $0x140] sm:$0xff] }
0x12f5   : > { %v5476_v15 = vpop.f32.mrb[56].mxu1 }
0x12f6   : > { %v5480_v18 = vmul.f32 0.35355338, %v5476_v15  ;;  %v8800_v39 = vpop.f32.mrb[57].mxu1  ;;  %v6294_v15 = vld [vmem:[#allocation9 + $0x148] sm:$0xff] }
0x12f7   : > { %v9369_v39 = vpack.c.bf16 %v6294_v15, %v6293_v33 }
0x12f8   : > { %v5481_v52 = vadd.f32 %v5480_v18, %v10994_v17 }
0x12fa   : > { %v5482_v20 = vsel %vm5403_vm10, %v5481_v52, -inf }
0x12fb   : > { %5483 = vmax.xlane.f32.xlu1 %v5482_v20  ;;  %v6296_v20 = vld [vmem:[#allocation9 + $0x158] sm:$0xff] }
0x1388   : > { %v5484_v21 = vpop.xlane.xlu1 %5483 }
0x1389   : > { %v5485_v63 = vsub.f32 %v5481_v52, %v5484_v21  ;;  %v6295_v52 = vld [vmem:[#allocation9 + $0x150] sm:$0xff]  ;;  %v7759_v21 = vld [vmem:[%s11220_s8 + $0x6] ss:$0 sm:$0xff] }
0x138b   : > { %v5486_v23 = vmul.f32 1.442695, %v5485_v63  ;;  %v9372_v63 = vpack.c.bf16 %v6296_v20, %v6295_v52  ;;  %v7769_v20 = vld [vmem:[%s11220_s8 + $0x3] ss:$0 sm:$0xff] }
0x138d   : > { %9684 = vpow2.f32 %v5486_v23 }
0x1397   : > { %v9685_v24 = vpop.eup %9684 }
0x1398   : > { %v5488_v25 = vsel %vm5403_vm10, %v9685_v24, 0.0 }
0x1399   : > { %5489 = vadd.xlane.f32.xlu1 %v5488_v25 }
0x1426   : > { %v5490_v27 = vpop.xlane.xlu1 %5489 }
0x1427   : > { %9686 = vrcp.f32 %v5490_v27 }
0x1431   : > { %v9687_v30 = vpop.eup %9686 }
0x1432   : > { %v5492_v34 = vmul.f32 %v9687_v30, %v9685_v24  ;;  %v7756_v30 = vld [vmem:[%s11220_s8 + $0x2] ss:$0 sm:$0xff] }
0x1434   : > { %8804 = vmatmul.mubr.msk.f32.vlgmr.msra.gmra.mrb[58].mxu1 %vm5403_vm10, %v5492_v34 }
0x1435   : > { %9346 = vmatpush3.bf16.msra.mxu1 %v9345_v31  ;;  %8825 = vmatprep.mubr.msk.f32.mxu1 %vm9965_vm0, %v9966_v1 }
0x1436   : > { %9347 = vmatprep.subr.bf16.mxu1 %v9964_v0 }
0x1439   : > { %9349 = vmatpush3.bf16.msra.mxu1 %v9348_v36 }
0x143a   : > { %8839 = vmatprep.subr.mxu1 %v9966_v1 }
0x143c   : > { %8826 = vmatmul.mubr.msk.f32.vlgmr.msra.gmra.mrb[60].mxu1 %vm806_vm1, %v10949_v51 }
0x143d   : > { %8841 = vmatprep.mubr.msk.f32.mxu1 %vm9965_vm0, %v9966_v1 }
0x1507   : > { %v5562_v43 = vpop.f32.mrb[58].mxu1 }
0x1508   : > { %v8805_v44 = vpop.f32.mrb[59].mxu1 }
0x150f   : > { %v5729_v45 = vpop.f32.mrb[60].mxu1 }
0x1510   : > { %v5730_v47 = vadd.f32 %v7745_v9, %v5729_v45  ;;  %v8827_v48 = vpop.f32.mrb[61].mxu1 }
0x1512   : > { %8840 = vmatpush3.xpose.msk.msra.mxu1 %vm5403_vm10, %v5730_v47 }
0x1513   : > { %8844 = vmatprep.subr.mxu1 %v9966_v1 }
0x1515   : > { %8842 = vmatmul.mubr.msk.f32.vlgmr.msra.gmra.mrb[62].mxu1 %vm5403_vm10, %v5647_v49 }
0x1516   : > { %8845 = vmatpush3.msra.mxu1 %v5813_v53  ;;  %8846 = vmatprep.mubr.msk.f32.mxu1 %vm9965_vm0, %v9966_v1 }
0x1517   : > { %8854 = vmatprep.subr.mxu1 %v9966_v1 }
0x15e8   : > { %v5888_v54 = vpop.f32.mrb[62].mxu1 }
0x15e9   : > { %v5892_v13 = vmul.f32 0.35355338, %v5888_v54  ;;  %v8843_v60 = vpop.f32.mrb[63].mxu1 }
0x15ea   : > { %v6538_v60 = vld [vmem:[#allocation11 + $0x10] sm:$0xff] }
0x15eb   : > { %v5893_v55 = vadd.f32 %v5892_v13, %v10994_v17 }
0x15ed   : > { %v5894_v56 = vsel %vm5403_vm10, %v5893_v55, -inf }
0x15ee   : > { %5895 = vmax.xlane.f32.xlu0 %v5894_v56  ;;  %v6614_v56 = vld [vmem:[#allocation9 + $0x60] sm:$0xff] }
0x167b   : > { %v5896_v57 = vpop.xlane.xlu0 %5895 }
0x167c   : > { %v5897_v37 = vsub.f32 %v5893_v55, %v5896_v57  ;;  %v6615_v57 = vld [vmem:[#allocation9 + $0x68] sm:$0xff] }
0x167e   : > { %v5898_v58 = vmul.f32 1.442695, %v5897_v37 }
0x1680   : > { %9688 = vpow2.f32 %v5898_v58  ;;  %v9375_v58 = vpack.c.bf16 %v6615_v57, %v6614_v56 }
0x168a   : > { %v9689_v59 = vpop.eup %9688 }
0x168b   : > { %v5900_v61 = vsel %vm5403_vm10, %v9689_v59, 0.0 }
0x168c   : > { %5901 = vadd.xlane.f32.xlu1 %v5900_v61  ;;  %v6616_v61 = vld [vmem:[#allocation9 + $0x70] sm:$0xff] }
0x1719   : > { %v5902_v2 = vpop.xlane.xlu1 %5901 }
0x171a   : > { %9690 = vrcp.f32 %v5902_v2  ;;  %v9378_v2 = vpack.c.bf16 %v6617_v62, %v6616_v61  ;;  %v7140_v61 = vld [vmem:[#allocation12 + $0x8] sm:$0xff] }
0x1724   : > { %v9691_v42 = vpop.eup %9690 }
0x1725   : > { %v5904_v3 = vmul.f32 %v9691_v42, %v9689_v59  ;;  %v6780_v42 = vld [vmem:[#allocation9 + $0x160] sm:$0xff] }
0x1727   : > { %8847 = vmatmul.mubr.msk.f32.vlgmr.msra.gmra.mrb[64].mxu1 %vm5403_vm10, %v5904_v3  ;;  %v6781_v3 = vld [vmem:[#allocation9 + $0x168] sm:$0xff] }
0x1728   : > { %8855 = vmatpush3.msra.mxu1 %v5566_v4  ;;  %8856 = vmatprep.mubr.msk.f32.mxu1 %vm9965_vm0, %v9966_v1  ;;  %v9387_v4 = vpack.c.bf16 %v6781_v3, %v6780_v42  ;;  %v7142_v42 = vld [vmem:[#allocation12 + $0x18] sm:$0xff] }
0x1729   : > { %9362 = vmatprep.subr.bf16.mxu1 %v9964_v0 }
0x172b   : > { %8857 = vmatmul.mubr.msk.f32.vlgmr.msra.gmra.mrb[66].mxu1 %vm5403_vm10, %v5562_v43 }
0x172c   : > { %9364 = vmatpush3.bf16.msra.mxu1 %v9363_v7  ;;  %8878 = vmatprep.mubr.msk.f32.mxu1 %vm9965_vm0, %v9966_v1  ;;  %v9390_v7 = vpack.c.bf16 %v6783_v6, %v6782_v5 }
0x172d   : > { %9365 = vmatprep.subr.bf16.mxu1 %v9964_v0 }
0x1730   : > { %9367 = vmatpush3.bf16.msra.mxu1 %v9366_v8  ;;  %v9381_v8 = vpack.c.bf16 %v6698_v22, %v6697_v50  ;;  %v7783_v22 = vld [vmem:[%s11224_s12] ss:$0 sm:$0xff] }
0x1731   : > { %8892 = vmatprep.subr.mxu1 %v9966_v1 }
0x1733   : > { %8879 = vmatmul.mubr.msk.f32.vlgmr.msra.gmra.mrb[68].mxu1 %vm806_vm1, %v10949_v51 }
0x1734   : > { %8894 = vmatprep.mubr.msk.f32.mxu1 %vm9965_vm0, %v9966_v1 }
0x17fa   : > { %v5974_v12 = vpop.f32.mrb[64].mxu1 }
0x17fb   : > { %v8848_v14 = vpop.f32.mrb[65].mxu1  ;;  %8852 = vmatmul.mubr.msk.f32.vlgmr.msra.gmra.mrb[62].mxu0 %vm5403_vm10, %v5974_v12 }
0x17fc   : > { %9358 = vmatpush3.bf16.msra.mxu0 %v9357_v32  ;;  %8867 = vmatprep.mubr.msk.f32.mxu0 %vm9965_vm0, %v9966_v1 }
0x17fd   : > { %9359 = vmatprep.subr.bf16.mxu0 %v9964_v0 }
0x17fe   : > { %v6122_v10 = vpop.f32.mrb[66].mxu1 }
0x17ff   : > { %v8858_v18 = vpop.f32.mrb[67].mxu1 }
0x1800   : > { %9361 = vmatpush3.bf16.msra.mxu0 %v9360_v41 }
0x1801   : > { %9368 = vmatprep.subr.bf16.mxu0 %v9964_v0 }
0x1803   : > { %8868 = vmatmul.mubr.msk.f32.vlgmr.msra.gmra.mrb[64].mxu0 %vm806_vm1, %v10949_v51 }
0x1804   : > { %9370 = vmatpush3.bf16.msra.mxu0 %v9369_v39  ;;  %8889 = vmatprep.mubr.msk.f32.mxu0 %vm9965_vm0, %v9966_v1  ;;  %v7772_v39 = vld [vmem:[%s11220_s8 + $0x7] ss:$0 sm:$0xff] }
0x1805   : > { %9371 = vmatprep.subr.bf16.mxu0 %v9964_v0 }
0x1806   : > { %v6288_v23 = vpop.f32.mrb[68].mxu1 }
0x1807   : > { %v6289_v24 = vadd.f32 %v7759_v21, %v6288_v23  ;;  %v8880_v25 = vpop.f32.mrb[69].mxu1  ;;  %v7775_v23 = vld [vmem:[%s11220_s8 + $0xb] ss:$0 sm:$0xff] }
0x1808   : > { %9373 = vmatpush3.bf16.msra.mxu0 %v9372_v63 }
0x1809   : > { %8893 = vmatpush3.xpose.msk.msra.mxu1 %vm5403_vm10, %v6289_v24  ;;  %8902 = vmatprep.subr.mxu0 %v9966_v1 }
0x180a   : > { %8897 = vmatprep.subr.mxu1 %v9966_v1 }
0x180b   : > { %8890 = vmatmul.mubr.msk.f32.vlgmr.msra.gmra.mrb[66].mxu0 %vm806_vm1, %v10949_v51 }
0x180c   : > { %8904 = vmatprep.mubr.msk.f32.mxu0 %vm9965_vm0, %v9966_v1  ;;  %8903 = vmatpush3.msra.mxu0 %v6538_v60 }
0x180d   : > { %9380 = vmatprep.subr.bf16.mxu0 %v9964_v0 }
0x18ce   : > { %v6049_v27 = vpop.f32.mrb[62].mxu0 }
0x18cf   : > { %v11060_v16 = vadd.f32 %v6122_v10, %v6049_v27  ;;  %v8853_v29 = vpop.f32.mrb[63].mxu0 }
0x18d6   : > { %v6205_v31 = vpop.f32.mrb[64].mxu0 }
0x18d7   : > { %v6206_v34 = vadd.f32 %v7756_v30, %v6205_v31  ;;  %v8869_v35 = vpop.f32.mrb[65].mxu0 }
0x18d9   : > { %8895 = vmatmul.mubr.msk.f32.vlgmr.msra.gmra.mrb[70].mxu1 %vm5403_vm10, %v6206_v34 }
0x18da   : > { %8899 = vmatprep.mubr.msk.f32.mxu1 %vm9965_vm0, %v9966_v1 }
0x18de   : > { %v6371_v36 = vpop.f32.mrb[66].mxu0 }
0x18df   : > { %v6372_v43 = vadd.f32 %v7762_v38, %v6371_v36  ;;  %v8891_v44 = vpop.f32.mrb[67].mxu0 }
0x18e0   : > { %v7025_v44 = vld [vmem:[#allocation11 + $0x18] sm:$0xff] }
0x18e1   : > { %8898 = vmatpush3.msra.mxu1 %v6372_v43 }
0x18e2   : > { %9374 = vmatprep.subr.bf16.mxu1 %v9964_v0 }
0x19ac   : > { %v6447_v9 = vpop.f32.mrb[70].mxu1 }
0x19ad   : > { %v6451_v45 = vmul.f32 0.35355338, %v6447_v9  ;;  %v8896_v46 = vpop.f32.mrb[71].mxu1 }
0x19af   : > { %v6452_v47 = vadd.f32 %v6451_v45, %v10994_v17 }
0x19b1   : > { %v6453_v48 = vsel %vm5403_vm10, %v6452_v47, -inf }
0x19b2   : > { %6454 = vmax.xlane.f32.xlu0 %v6453_v48 }
0x1a3f   : > { %v6455_v40 = vpop.xlane.xlu0 %6454 }
0x1a40   : > { %v6456_v49 = vsub.f32 %v6452_v47, %v6455_v40  ;;  %v7781_v40 = vld [vmem:[%s11222_s10] ss:$0 sm:$0xff] }
0x1a42   : > { %v6457_v53 = vmul.f32 1.442695, %v6456_v49 }
0x1a44   : > { %9692 = vpow2.f32 %v6457_v53 }
0x1a4e   : > { %v9693_v54 = vpop.eup %9692 }
0x1a4f   : > { %v6459_v13 = vsel %vm5403_vm10, %v9693_v54, 0.0 }
0x1a50   : > { %6460 = vadd.xlane.f32.xlu1 %v6459_v13 }
0x1add   : > { %v6461_v55 = vpop.xlane.xlu1 %6460 }
0x1ade   : > { %9694 = vrcp.f32 %v6461_v55 }
0x1ae8   : > { %v9695_v37 = vpop.eup %9694 }
0x1ae9   : > { %v6463_v59 = vmul.f32 %v9695_v37, %v9693_v54 }
0x1aeb   : > { %8900 = vmatmul.mubr.msk.f32.vlgmr.msra.gmra.mrb[72].mxu1 %vm5403_vm10, %v6463_v59  ;;  %v7139_v59 = vld [vmem:[#allocation12] sm:$0xff] }
0x1aec   : > { %9376 = vmatpush3.bf16.msra.mxu1 %v9375_v58  ;;  %8915 = vmatprep.mubr.msk.f32.mxu1 %vm9965_vm0, %v9966_v1  ;;  %v9393_v62 = vpack.c.bf16 %v7140_v61, %v7139_v59 }
0x1aed   : > { %9377 = vmatprep.subr.bf16.mxu1 %v9964_v0 }
0x1af0   : > { %9379 = vmatpush3.bf16.msra.mxu1 %v9378_v2  ;;  %v7141_v2 = vld [vmem:[#allocation12 + $0x10] sm:$0xff] }
0x1af1   : > { %9386 = vmatprep.subr.bf16.mxu1 %v9964_v0  ;;  %v9396_v3 = vpack.c.bf16 %v7142_v42, %v7141_v2  ;;  %v7368_v42 = vld [vmem:[#allocation15] sm:$0xff] }
0x1af3   : > { %8916 = vmatmul.mubr.msk.f32.vlgmr.msra.gmra.mrb[74].mxu1 %vm806_vm1, %v10949_v51 }
0x1af4   : > { %9388 = vmatpush3.bf16.msra.mxu1 %v9387_v4  ;;  %8937 = vmatprep.mubr.msk.f32.mxu1 %vm9965_vm0, %v9966_v1 }
0x1af5   : > { %9389 = vmatprep.subr.bf16.mxu1 %v9964_v0 }
0x1af8   : > { %9391 = vmatpush3.bf16.msra.mxu1 %v9390_v7  ;;  %v7782_v7 = vld [vmem:[%s11223_s11] ss:$0 sm:$0xff] }
0x1af9   : > { %8950 = vmatprep.subr.mxu1 %v9966_v1 }
0x1afb   : > { %8938 = vmatmul.mubr.msk.f32.vlgmr.msra.gmra.mrb[76].mxu1 %vm806_vm1, %v10949_v51 }
0x1afc   : > { %8952 = vmatprep.mubr.msk.f32.mxu1 %vm9965_vm0, %v9966_v1  ;;  %8951 = vmatpush3.msra.mxu1 %v7025_v44 }
0x1afd   : > { %9398 = vmatprep.subr.bf16.mxu1 %v9964_v0 }
0x1bbe   : > { %v6533_v32 = vpop.f32.mrb[72].mxu1 }
0x1bbf   : > { %v8901_v28 = vpop.f32.mrb[73].mxu1  ;;  %8905 = vmatmul.mubr.msk.f32.vlgmr.msra.gmra.mrb[68].mxu0 %vm5403_vm10, %v6533_v32  ;;  %v7251_v32 = vld [vmem:[#allocation14 + $0x8] sm:$0xff] }
0x1bc0   : > { %9382 = vmatpush3.bf16.msra.mxu0 %v9381_v8  ;;  %8926 = vmatprep.mubr.msk.f32.mxu0 %vm9965_vm0, %v9966_v1  ;;  %v9399_v28 = vpack.c.bf16 %v7251_v32, %v7250_v26 }
0x1bc1   : > { %9383 = vmatprep.subr.bf16.mxu0 %v9964_v0 }
0x1bc4   : > { %9385 = vmatpush3.bf16.msra.mxu0 %v9384_v11  ;;  %v7252_v11 = vld [vmem:[#allocation14 + $0x10] sm:$0xff] }
0x1bc5   : > { %8940 = vmatprep.subr.mxu0 %v9966_v1 }
0x1bc6   : > { %v6692_v12 = vpop.f32.mrb[74].mxu1 }
0x1bc7   : > { %v8917_v14 = vpop.f32.mrb[75].mxu1  ;;  %8927 = vmatmul.mubr.msk.f32.vlgmr.msra.gmra.mrb[70].mxu0 %vm806_vm1, %v10949_v51  ;;  %v6693_v24 = vadd.f32 %v7769_v20, %v6692_v12  ;;  %v7253_v12 = vld [vmem:[#allocation14 + $0x18] sm:$0xff] }
0x1bc8   : > { %8942 = vmatprep.mubr.msk.f32.mxu0 %vm9965_vm0, %v9966_v1  ;;  %v9402_v14 = vpack.c.bf16 %v7253_v12, %v7252_v11  ;;  %v7790_v11 = vld [vmem:[%s11295_s7] ss:$0 sm:$0xff] }
0x1bce   : > { %v6858_v41 = vpop.f32.mrb[76].mxu1 }
0x1bcf   : > { %v8939_v33 = vpop.f32.mrb[77].mxu1  ;;  %v6859_v25 = vadd.f32 %v7775_v23, %v6858_v41  ;;  %v7254_v41 = vld [vmem:[#allocation14 + $0x20] sm:$0xff] }
0x1bd0   : > { %v7255_v33 = vld [vmem:[#allocation14 + $0x28] sm:$0xff] }
0x1c92   : > { %v6608_v15 = vpop.f32.mrb[68].mxu0 }
0x1c93   : > { %v6612_v10 = vadd.f32 %v6608_v15, %v11060_v16  ;;  %v8906_v18 = vpop.f32.mrb[69].mxu0  ;;  %v9405_v15 = vpack.c.bf16 %v7255_v33, %v7254_v41 }
0x1c9a   : > { %v6775_v52 = vpop.f32.mrb[70].mxu0 }
0x1c9b   : > { %v6776_v21 = vadd.f32 %v7772_v39, %v6775_v52  ;;  %v8928_v63 = vpop.f32.mrb[71].mxu0  ;;  %v7784_v39 = vld [vmem:[%s11226_s14] ss:$0 sm:$0xff] }
0x1c9d   : > { %8941 = vmatpush3.xpose.msk.msra.mxu0 %vm5403_vm10, %v6776_v21 }
0x1c9e   : > { %8945 = vmatprep.subr.mxu0 %v9966_v1 }
0x1ca0   : > { %8943 = vmatmul.mubr.msk.f32.vlgmr.msra.gmra.mrb[72].mxu0 %vm5403_vm10, %v6693_v24 }
0x1ca1   : > { %8946 = vmatpush3.msra.mxu0 %v6859_v25  ;;  %8947 = vmatprep.mubr.msk.f32.mxu0 %vm9965_vm0, %v9966_v1 }
0x1ca2   : > { %9392 = vmatprep.subr.bf16.mxu0 %v9964_v0 }
0x1d73   : > { %v6934_v27 = vpop.f32.mrb[72].mxu0 }
0x1d74   : > { %v6938_v16 = vmul.f32 0.35355338, %v6934_v27  ;;  %v8944_v29 = vpop.f32.mrb[73].mxu0 }
0x1d76   : > { %v6939_v30 = vadd.f32 %v6938_v16, %v10994_v17 }
0x1d78   : > { %v6940_v31 = vsel %vm5403_vm10, %v6939_v30, -inf }
0x1d79   : > { %6941 = vmax.xlane.f32.xlu0 %v6940_v31 }
0x1e06   : > { %v6942_v34 = vpop.xlane.xlu0 %6941 }
0x1e07   : > { %v6943_v35 = vsub.f32 %v6939_v30, %v6942_v34 }
0x1e09   : > { %v6944_v38 = vmul.f32 1.442695, %v6943_v35 }
0x1e0b   : > { %9696 = vpow2.f32 %v6944_v38 }
0x1e15   : > { %v9697_v36 = vpop.eup %9696 }
0x1e16   : > { %v6946_v43 = vsel %vm5403_vm10, %v9697_v36, 0.0 }
0x1e17   : > { %6947 = vadd.xlane.f32.xlu1 %v6946_v43 }
0x1ea4   : > { %v6948_v9 = vpop.xlane.xlu1 %6947 }
0x1ea5   : > { %9698 = vrcp.f32 %v6948_v9 }
0x1eaf   : > { %v9699_v45 = vpop.eup %9698 }
0x1eb0   : > { %v6950_v46 = vmul.f32 %v9699_v45, %v9697_v36 }
0x1eb2   : > { %8948 = vmatmul.mubr.msk.f32.vlgmr.msra.gmra.mrb[74].mxu0 %vm5403_vm10, %v6950_v46 }
0x1eb3   : > { %8963 = vmatprep.mubr.msk.f32.mxu0 %vm9965_vm0, %v9966_v1  ;;  %9394 = vmatpush3.bf16.msra.mxu0 %v9393_v62 }
0x1eb4   : > { %9395 = vmatprep.subr.bf16.mxu0 %v9964_v0 }
0x1eb7   : > { %9397 = vmatpush3.bf16.msra.mxu0 %v9396_v3  ;;  %v7369_v3 = vld [vmem:[#allocation15 + $0x8] sm:$0xff] }
0x1eb8   : > { %9410 = vmatprep.subr.bf16.mxu0 %v9964_v0 }
0x1f85   : > { %v7020_v17 = vpop.f32.mrb[74].mxu0 }
0x1f86   : > { %v8949_v47 = vpop.f32.mrb[75].mxu0  ;;  %8953 = vmatmul.mubr.msk.f32.vlgmr.msra.gmra.mrb[78].mxu1 %vm5403_vm10, %v7020_v17 }
0x1f87   : > { %8982 = vmatprep.mubr.msk.f32.mxu1 %vm9965_vm0, %v9966_v1  ;;  %9400 = vmatpush3.bf16.msra.mxu1 %v9399_v28 }
0x1f88   : > { %9401 = vmatprep.subr.bf16.mxu1 %v9964_v0 }
0x1f8b   : > { %9403 = vmatpush3.bf16.msra.mxu1 %v9402_v14 }
0x1f8c   : > { %9404 = vmatprep.subr.bf16.mxu1 %v9964_v0 }
0x1f8f   : > { %9406 = vmatpush3.bf16.msra.mxu1 %v9405_v15 }
0x1f90   : > { %9407 = vmatprep.subr.bf16.mxu1 %v9964_v0 }
0x2059   : > { %v7095_v48 = vpop.f32.mrb[78].mxu1 }
0x205a   : > { %v7099_v49 = vadd.f32 %v7095_v48, %v6612_v10  ;;  %v8954_v53 = vpop.f32.mrb[79].mxu1  ;;  %v7256_v10 = vld [vmem:[#allocation14 + $0x30] sm:$0xff]  ;;  %v9969_v48 = vmov -1.0  }
0x205c   : > { %v7107_v54 = vadd.f32 %v7781_v40, %v7099_v49 }
0x205e   : > { %v7108_v13 = vadd.f32 %v7107_v54, %v10949_v51 }
0x2060   : > { %v7111_v60 = vsel %vm806_vm1, %v7108_v13, 0.0 }
0x2061   : > { %7112 = vadd.xlane.f32.xlu0 %v7111_v60  ;;  %v7786_v60 = vld [vmem:[%s11228_s16] ss:$0 sm:$0xff] }
0x20ee   : > { %v7113_v55 = vpop.xlane.xlu0 %7112 }
0x20ef   : > { %v7115_v56 = vmul.f32 0.03125, %v7113_v55 }
0x20f1   : > { %v7116_v57 = vsub.f32 %v7108_v13, %v7115_v56 }
0x20f3   : > { %v7117_v37 = vmul.f32 %v7116_v57, %v7116_v57 }
0x20f5   : > { %v7118_v58 = vsel %vm806_vm1, %v7117_v37, 0.0 }
0x20f6   : > { %7119 = vadd.xlane.f32.xlu1 %v7118_v58 }
0x2183   : > { %v7120_v51 = vpop.xlane.xlu1 %7119 }
0x2184   : > { %v7121_v4 = vmul.f32 0.03125, %v7120_v51  ;;  %v9411_v51 = vpack.c.bf16 %v7369_v3, %v7368_v42 }
0x2186   : > { %v7122_v5 = vadd.f32 1e-05, %v7121_v4  ;;  %v7370_v4 = vld [vmem:[#allocation15 + $0x10] sm:$0xff] }
0x2188   : > { %9700 = vrsqrt.f32 %v7122_v5  ;;  %v7371_v5 = vld [vmem:[#allocation15 + $0x18] sm:$0xff] }
0x2192   : > { %v9701_v6 = vpop.eup %9700 }
0x2193   : > { %v7124_v50 = vmul.f32 %v9701_v6, %v7116_v57  ;;  %v9414_v6 = vpack.c.bf16 %v7371_v5, %v7370_v4 }
0x2195   : > { %v7131_v8 = vmul.f32 %v7782_v7, %v7124_v50 }
0x2197   : > { %v7138_v19 = vadd.f32 %v7783_v22, %v7131_v8 }
0x2199   : > { %8964 = vmatmul.mubr.msk.f32.vlgmr.msra.gmra.mrb[76].mxu0 %vm806_vm1, %v7138_v19  ;;  %v7788_v19 = vld [vmem:[%s11292_s24] ss:$0 sm:$0xff]  ;;  %s11297_s24 = smov %s11296_s27 }
0x219a   : > { %8993 = vmatprep.mubr.msk.f32.mxu0 %vm9965_vm0, %v9966_v1  ;;  %v7257_v1 = vld [vmem:[#allocation14 + $0x38] sm:$0xff]  ;;  %9412 = vmatpush3.bf16.msra.mxu0 %v9411_v51 }
0x219b   : > { %v9408_v18 = vpack.c.bf16 %v7257_v1, %v7256_v10  ;;  %9413 = vmatprep.subr.bf16.mxu0 %v9964_v0  ;;  %v7789_v0 = vld [vmem:[%s11293_s4] ss:$0 sm:$0xff]  ;;  %s9876_s4 = scalar_lea.vmem %s11172_s21, 128 }
0x219c   : > { %p9877_p13 = scmp.ne.s32.totalorder %s11172_s21, %s9876_s4  ;;  %p9884_p0 = scmp.lt.s32.totalorder %s9882_s2, %s9876_s4 }
0x219d   : > { %9409 = vmatpush3.bf16.msra.mxu1 %v9408_v18 }
0x219e   : > { %9415 = vmatpush3.bf16.msra.mxu0 %v9414_v6  ;;  %p9878_p6 = pnand %p9877_p13, %p11298_p1  ;;  %p9885_p10 = por %p9884_p0, %p9883_p5 }
0x21a0   : > { %p9879_p9 = pneg %p9878_p6 }
0x21a2   : > { %p9886_p2 = pnand %p9885_p10, %p9879_p9 }
0x226c   : > { %v7219_v52 = vpop.f32.mrb[76].mxu0 }
0x226d   : > { %v7220_v20 = vadd.f32 %v7784_v39, %v7219_v52  ;;  %v8965_v21 = vpop.f32.mrb[77].mxu0 }
0x226f   : > { %v7224_v63 = vmul.f32 0.70710677, %v7220_v20  ;;  %v7223_v53 = vmul.f32 0.5, %v7220_v20 }
0x2271   : > { %v7227_v23 = vand.u32 2147483647, %v7224_v63  ;;  %vm7225_vm11 = vcmp.ge.f32.partialorder %v7224_v63, 0.0 }
0x2272   : > { %v7226_v40 = vsel %vm7225_vm11, 1.0, %v9969_v48 }
0x2273   : > { %v7228_v24 = vmul.f32 0.3275911, %v7227_v23  ;;  %v7241_v27 = vsub.f32 0.0, %v7227_v23 }
0x2275   : > { %v7229_v25 = vadd.f32 1.0, %v7228_v24  ;;  %v7242_v29 = vmul.f32 %v7241_v27, %v7227_v23 }
0x2277   : > { %9702 = vrcp.f32 %v7229_v25  ;;  %v7243_v34 = vmul.f32 1.442695, %v7242_v29 }
0x2279   : > { %9704 = vpow2.f32 %v7243_v34 }
0x2281   : > { %v9703_v16 = vpop.eup %9702 }
0x2282   : > { %v7232_v30 = vmul.f32 1.0614054, %v9703_v16 }
0x2283   : > { %v9705_v46 = vpop.eup %9704 }
0x2284   : > { %v7233_v31 = vadd.f32 -1.4531521, %v7232_v30 }
0x2286   : > { %v7234_v35 = vmul.f32 %v9703_v16, %v7233_v31 }
0x2288   : > { %v7235_v38 = vadd.f32 1.4214138, %v7234_v35 }
0x228a   : > { %v7236_v36 = vmul.f32 %v9703_v16, %v7235_v38 }
0x228c   : > { %v7237_v43 = vadd.f32 -0.28449672, %v7236_v36 }
0x228e   : > { %v7238_v44 = vmul.f32 %v9703_v16, %v7237_v43 }
0x2290   : > { %v7239_v9 = vadd.f32 0.2548296, %v7238_v44 }
0x2292   : > { %v7240_v45 = vmul.f32 %v9703_v16, %v7239_v9 }
0x2294   : > { %v7245_v17 = vmul.f32 %v9705_v46, %v7240_v45 }
0x2296   : > { %v7246_v47 = vsub.f32 1.0, %v7245_v17 }
0x2298   : > { %v7247_v49 = vmul.f32 %v7246_v47, %v7226_v40 }
0x229a   : > { %v7248_v54 = vadd.f32 1.0, %v7247_v49 }
0x229c   : > { %v7249_v13 = vmul.f32 %v7248_v54, %v7223_v53 }
0x229e   : > { %8983 = vmatmul.mubr.msk.f32.vlgmr.msra.gmra.mrb[80].mxu1 %vm7265_vm12, %v7249_v13 }
0x2371   : > { %v7335_v55 = vpop.f32.mrb[80].mxu1 }
0x2372   : > { %v7336_v56 = vadd.f32 %v7786_v60, %v7335_v55  ;;  %v8984_v57 = vpop.f32.mrb[81].mxu1 }
0x2374   : > { %v7341_v37 = vsel %vm806_vm1, %v7336_v56, 0.0 }
0x2375   : > { %7342 = vadd.xlane.f32.xlu0 %v7341_v37 }
0x2402   : > { %v7343_v58 = vpop.xlane.xlu0 %7342 }
0x2403   : > { %v7344_v59 = vmul.f32 0.03125, %v7343_v58 }
0x2405   : > { %v7345_v61 = vsub.f32 %v7336_v56, %v7344_v59 }
0x2407   : > { %v7346_v62 = vmul.f32 %v7345_v61, %v7345_v61 }
0x2409   : > { %v7347_v2 = vsel %vm806_vm1, %v7346_v62, 0.0 }
0x240a   : > { %7348 = vadd.xlane.f32.xlu1 %v7347_v2 }
0x2497   : > { %v7349_v7 = vpop.xlane.xlu1 %7348 }
0x2498   : > { %v7350_v50 = vmul.f32 0.03125, %v7349_v7 }
0x249a   : > { %v7351_v22 = vadd.f32 1e-05, %v7350_v50 }
0x249c   : > { %9706 = vrsqrt.f32 %v7351_v22 }
0x24a6   : > { %v9707_v8 = vpop.eup %9706 }
0x24a7   : > { %v7353_v26 = vmul.f32 %v9707_v8, %v7345_v61 }
0x24a9   : > { %v7360_v32 = vmul.f32 %v7788_v19, %v7353_v26 }
0x24ab   : > { %v7367_v28 = vadd.f32 %v7789_v0, %v7360_v32 }
0x24ad   : > { %8994 = vmatmul.mubr.msk.f32.vlgmr.msra.gmra.mrb[78].mxu0 %vm806_vm1, %v7367_v28 }
0x2580   : > { %v7448_v12 = vpop.f32.mrb[78].mxu0 }
0x2581   : > { %v7449_v14 = vadd.f32 %v7790_v11, %v7448_v12  ;;  %v8995_v41 = vpop.f32.mrb[79].mxu0 }
0x2583   : > { %7452 = vst [vmem:[%s746_s18] sm:$0xff] %v7449_v14 }
0x2584   : > { %9889 = shalt.err (!%p9886_p2)
}
0x2585   : > { %s9890_s23 = scalar_lea.hbm %s11170_s17, 128  ;;  %s9894_s13 = scalar_lea.hbm %s11297_s24, 256 }
0x2586   : > { %p9891_p3 = scmp.ne.s32.totalorder %s11170_s17, %s9890_s23  ;;  %p9895_p7 = scmp.lt.u32.totalorder %s11170_s17, %s11297_s24 }
0x2587   : > { %p9896_p8 = scmp.lt.u32.totalorder %s9894_s13, %s9890_s23  ;;  %p9898_p13 = scmp.lt.u32.totalorder %s9890_s23, %s11170_s17 }
0x2588   : > { %p9892_p4 = pnand %p9891_p3, %p11298_p1 }
0x2589   : > { %p9897_p11 = por %p9896_p8, %p9895_p7 }
0x258a   : > { %p9893_p12 = pneg %p9892_p4 }
0x258b   : > { %p9899_p6 = por %p9898_p13, %p9897_p11 }
0x258d   : > { %p9900_p9 = pnand %p9899_p6, %p9893_p12 }
0x258f   : > { %9903 = shalt.err (!%p9900_p9)
}
0x2590   : > { %9440 = dma.vmem_to_hbm [thread:$0]  (%p11298_p1), %s11172_s21, 128, %s11170_s17, %s7454_s0  }
0x2591 PF: > { %s11299_s1 = sld [smem:[#allocation25_spill]]  ;;  %s11300_s27 = sld [smem:[#allocation23_spill]] }
0x2592   : > { %s11301_s4 = sld [smem:[#allocation29_spill]] }
0x2597   : > { %p9477_p5 = scmp.ge.s32.totalorder %s11299_s1, 2  ;;  %s7479_s3 = sand.u32 1, %s11300_s27  }
0x2598   : > { %p11302_p0 = scmp.ne.s32.totalorder %s11301_s4, 0  ;;  %s7480_s28 = scalar_lea.sflag [#allocation8], %s7479_s3 }
0x259a   : > { %p9462_p10 = pnand %p9477_p5, %p11302_p0 }
0x259c   : > { %9937 = dma.done.wait (!%p9462_p10), %s7480_s28, 128  }
0x259d   : > { %9939 = vsyncadd (!%p9462_p10), %s7480_s28, 4294967168  ;;  %s11303_s27 = sld [smem:[#allocation26_spill]]  ;;  %s11304_s23 = sld [smem:[#allocation24_spill]] }
0x259e   : > { %s11305_s26 = sld [smem:[#allocation27_spill]]  ;;  %s11306_s2 = smov %s9946_s25 }
0x25a3   : > { %p35_p2 = scmp.ge.s32.totalorder %s11303_s27, 4   ;;  %s11307_s25 = smov %s11304_s23 }
0x25a5   :  { %37 = sbr.rel (!%p35_p2) target bundleno = 20 (0x14), region = 212 }
0x25ac   :  { %7485 = vsyncpa [#allocation7], 1 }
0x25ad   :  { %7487 = vsyncpa [#allocation7 + $0x1], 1 }
0x25ae   :  { %7488 = vsyncpa [#allocation10], 1 }
0x25af   :  { %7489 = vsyncpa [#allocation13], 1 }
0x25b0   :  { %7490 = vsyncpa [#allocation16], 1 }
0x25b1   :  { %7491 = vsyncpa [#allocation8], 1 }
0x25b2   :  { %7493 = vsyncpa [#allocation8 + $0x1], 1 }

</bundles_post_ra>
